<compile_context>
chip_gen: v7x
topology: tpu7x:2x2x1
jax: 0.10.0
libtpu: 0.0.40
codegen_flags: <defaults>
</compile_context>

<pallas_src>
import functools

import jax
import jax.numpy as jnp
from jax import lax
from jax.experimental import pallas as pl
from jax.experimental.pallas import tpu as pltpu


# ----------------------------------------------------------------------------
# Pallas kernels
# ----------------------------------------------------------------------------
def _conv_kernel(x_ref, w_ref, b_ref, out_ref, *stat_refs,
                 oh, ow, wp, kh, kw, cin, cout, act, slope, with_stats):
    """Fused stride-1 conv over a flattened (rows=Hp*Wp, cin) image.

    x_ref  : (1, Hp*Wp, cin)  f32   -- one (padded / phase) image
    w_ref  : (kh*kw*cin, cout) bf16 -- rearranged conv weights
    b_ref  : (1, cout) f32
    out_ref: (1, oh*ow, cout) f32
    stat_refs (optional): sum_ref, sumsq_ref each (1, cout) f32, accumulated
    across the batch grid axis (grid axis must be 'arbitrary').
    """
    if with_stats:
        sum_ref, sumsq_ref = stat_refs

        @pl.when(pl.program_id(0) == 0)
        def _init():
            sum_ref[...] = jnp.zeros_like(sum_ref)
            sumsq_ref[...] = jnp.zeros_like(sumsq_ref)

    bias = b_ref[...]  # (1, cout) f32

    def row_body(r, carry):
        acc = jnp.zeros((ow, cout), jnp.float32)
        # Fused im2col: kh*kw contiguous row loads per output row, each feeds
        # a bf16 MXU matmul accumulated in f32 (never materialized in HBM).
        for i in range(kh):
            for j in range(kw):
                start = (r + i) * wp + j
                xij = x_ref[0, pl.ds(start, ow), :].astype(jnp.bfloat16)
                wij = w_ref[(i * kw + j) * cin:(i * kw + j + 1) * cin, :]
                acc = acc + jnp.dot(xij, wij,
                                    preferred_element_type=jnp.float32)
        acc = acc + bias
        if act == "leaky":
            acc = jnp.where(acc >= 0, acc, slope * acc)
        elif act == "relu":
            acc = jnp.maximum(acc, 0.0)
        out_ref[0, pl.ds(r * ow, ow), :] = acc
        if with_stats:
            sum_ref[...] += jnp.sum(acc, axis=0, keepdims=True)
            sumsq_ref[...] += jnp.sum(acc * acc, axis=0, keepdims=True)
        return carry

    lax.fori_loop(0, oh, row_body, 0)


def _scale_shift_leaky_kernel(x_ref, scale_ref, shift_ref, o_ref, *, slope):
    y = x_ref[...] * scale_ref[...] + shift_ref[...]
    o_ref[...] = jnp.where(y >= 0, y, slope * y)


def _head_kernel(x_ref, hw_ref, k2_ref, out_ref, *, oh2, ow2, ows, slope):
    """Fused fx/fy head on a 1-channel map (pure VPU, no padded matmul).

    x_ref : (1, ohs*ows, 1) f32 (smooth output, flattened rows)
    hw_ref: SMEM (12,) f32 = [w3x3 row-major (9), b3x3, w1x1, b1x1]
    k2_ref: (1, oh2*ow2, 1) f32 -- pre-activation of the 3x3 conv (K2)
    out_ref:(1, oh2*ow2, 1) f32 -- ReLU(1x1 conv(LeakyReLU(k2)))
    """
    def row_body(u, carry):
        acc = jnp.zeros((ow2, 1), jnp.float32)
        for i in range(3):
            for j in range(3):
                xv = x_ref[0, pl.ds((u + i) * ows + j, ow2), :]
                acc = acc + xv * hw_ref[i * 3 + j]
        acc = acc + hw_ref[9]
        k2_ref[0, pl.ds(u * ow2, ow2), :] = acc
        t = jnp.where(acc >= 0, acc, slope * acc)
        y = t * hw_ref[10] + hw_ref[11]
        out_ref[0, pl.ds(u * ow2, ow2), :] = jnp.maximum(y, 0.0)
        return carry

    lax.fori_loop(0, oh2, row_body, 0)


# ----------------------------------------------------------------------------
# Pallas wrappers
# ----------------------------------------------------------------------------
def _conv_flat(x_flat, w_flat, bias, *, oh, ow, wp, kh, kw,
               act="none", slope=0.2, with_stats=False):
    """x_flat: (N, Hp*Wp, cin) f32; w_flat: (kh*kw*cin, cout)."""
    n, rp, cin = x_flat.shape
    cout = w_flat.shape[1]

    out_shapes = [jax.ShapeDtypeStruct((n, oh * ow, cout), jnp.float32)]
    out_specs = [pl.BlockSpec((1, oh * ow, cout), lambda b: (b, 0, 0))]
    if with_stats:
        out_shapes += [jax.ShapeDtypeStruct((1, cout), jnp.float32),
                       jax.ShapeDtypeStruct((1, cout), jnp.float32)]
        out_specs += [pl.BlockSpec((1, cout), lambda b: (0, 0)),
                      pl.BlockSpec((1, cout), lambda b: (0, 0))]

    kernel = functools.partial(
        _conv_kernel, oh=oh, ow=ow, wp=wp, kh=kh, kw=kw, cin=cin, cout=cout,
        act=act, slope=slope, with_stats=with_stats)

    # NOTE: stats accumulate across the batch grid axis -> must be sequential.
    sem = ("arbitrary",) if with_stats else ("parallel",)

    return pl.pallas_call(
        kernel,
        out_shape=tuple(out_shapes),
        grid_spec=pltpu.PrefetchScalarGridSpec(
            num_scalar_prefetch=0,
            grid=(n,),
            in_specs=[
                pl.BlockSpec((1, rp, cin), lambda b: (b, 0, 0)),
                pl.BlockSpec((kh * kw * cin, cout), lambda b: (0, 0)),
                pl.BlockSpec((1, cout), lambda b: (0, 0)),
            ],
            out_specs=tuple(out_specs),
        ),
        compiler_params=pltpu.CompilerParams(dimension_semantics=sem),
    )(x_flat,
      w_flat.astype(jnp.bfloat16),
      bias.reshape(1, cout).astype(jnp.float32))


def _scale_shift_leaky(x_2d, scale, shift, slope=0.2):
    """Per-column scale/shift then LeakyReLU; large row tiles, no padding."""
    m, c = x_2d.shape
    tm = m if m <= 1024 else 1024
    return pl.pallas_call(
        functools.partial(_scale_shift_leaky_kernel, slope=slope),
        out_shape=jax.ShapeDtypeStruct((m, c), jnp.float32),
        grid_spec=pltpu.PrefetchScalarGridSpec(
            num_scalar_prefetch=0,
            grid=(pl.cdiv(m, tm),),
            in_specs=[
                pl.BlockSpec((tm, c), lambda i: (i, 0)),
                pl.BlockSpec((1, c), lambda i: (0, 0)),
                pl.BlockSpec((1, c), lambda i: (0, 0)),
            ],
            out_specs=pl.BlockSpec((tm, c), lambda i: (i, 0)),
        ),
        compiler_params=pltpu.CompilerParams(
            dimension_semantics=("parallel",)),
    )(x_2d.astype(jnp.float32),
      scale.reshape(1, c).astype(jnp.float32),
      shift.reshape(1, c).astype(jnp.float32))


def _head(s_flat, w3, b3, w1, b1, *, ohs, ows, slope=0.2):
    n = s_flat.shape[0]
    oh2, ow2 = ohs - 2, ows - 2
    hw = jnp.concatenate([w3.reshape(-1), b3.reshape(-1),
                          w1.reshape(-1), b1.reshape(-1)]).astype(jnp.float32)
    kernel = functools.partial(_head_kernel, oh2=oh2, ow2=ow2, ows=ows,
                               slope=slope)
    k2, out = pl.pallas_call(
        kernel,
        out_shape=(jax.ShapeDtypeStruct((n, oh2 * ow2, 1), jnp.float32),
                   jax.ShapeDtypeStruct((n, oh2 * ow2, 1), jnp.float32)),
        grid_spec=pltpu.PrefetchScalarGridSpec(
            num_scalar_prefetch=0,
            grid=(n,),
            in_specs=[
                pl.BlockSpec((1, ohs * ows, 1), lambda b: (b, 0, 0)),
                pl.BlockSpec(memory_space=pltpu.MemorySpace.SMEM),
            ],
            out_specs=(pl.BlockSpec((1, oh2 * ow2, 1), lambda b: (b, 0, 0)),
                       pl.BlockSpec((1, oh2 * ow2, 1), lambda b: (b, 0, 0))),
        ),
        compiler_params=pltpu.CompilerParams(
            dimension_semantics=("parallel",)),
    )(s_flat, hw)
    return k2, out, oh2, ow2


# ----------------------------------------------------------------------------
# Host-side layout helpers (cheap: <= one input-sized copy per conv layer)
# ----------------------------------------------------------------------------
def _s2d_pad(x_nhwc, pad):
    """Spatial pad, make dims even, space-to-depth by 2.
    Returns flattened phase image (N, Hp2*Wp2, 4C) and Wp2."""
    n, h, w, c = x_nhwc.shape
    hp, wp = h + 2 * pad, w + 2 * pad
    eh, ew = hp % 2, wp % 2
    xp = jnp.pad(x_nhwc, ((0, 0), (pad, pad + eh), (pad, pad + ew), (0, 0)))
    hp2, wp2 = (hp + eh) // 2, (wp + ew) // 2
    xs = xp.reshape(n, hp2, 2, wp2, 2, c)
    xs = jnp.transpose(xs, (0, 1, 3, 2, 4, 5))        # (n, hp2, wp2, p, q, c)
    return xs.reshape(n, hp2 * wp2, 4 * c), wp2


def _pad_flatten(x_nhwc, pad):
    n, h, w, c = x_nhwc.shape
    xp = jnp.pad(x_nhwc, ((0, 0), (pad, pad), (pad, pad), (0, 0)))
    hp, wp = h + 2 * pad, w + 2 * pad
    return xp.reshape(n, hp * wp, c), wp


def _rearrange_w_s2(w_oihw):
    """(Cout,Cin,4,4) -> (16*Cin, Cout) matching the 2x2 phase-conv layout."""
    co, ci, _, _ = w_oihw.shape
    w = w_oihw.reshape(co, ci, 2, 2, 2, 2)            # (co, ci, a, p, b, q)
    w = jnp.transpose(w, (2, 4, 3, 5, 1, 0))          # (a, b, p, q, ci, co)
    return w.reshape(16 * ci, co)


def _rearrange_w_s1(w_oihw):
    """(Cout,Cin,kh,kw) -> (kh*kw*Cin, Cout)."""
    co = w_oihw.shape[0]
    return jnp.transpose(w_oihw, (2, 3, 1, 0)).reshape(-1, co)


# ----------------------------------------------------------------------------
# Layer building blocks
# ----------------------------------------------------------------------------
def conv4x4_s2(x_nhwc, w_oihw, bias, act="none", with_stats=False):
    """Conv2d(k=4, stride=2, pad=2) as a stride-1 2x2 conv on the phase image."""
    _, h, w, _ = x_nhwc.shape
    oh = (h + 4 - 4) // 2 + 1
    ow = (w + 4 - 4) // 2 + 1
    xs, wp2 = _s2d_pad(x_nhwc, 2)
    w_flat = _rearrange_w_s2(w_oihw)
    res = _conv_flat(xs, w_flat, bias, oh=oh, ow=ow, wp=wp2, kh=2, kw=2,
                     act=act, with_stats=with_stats)
    return res, oh, ow


def conv4x4_s1(x_nhwc, w_oihw, bias, act="none"):
    """Conv2d(k=4, stride=1, pad=2)."""
    _, h, w, _ = x_nhwc.shape
    oh = h + 4 - 4 + 1
    ow = w + 4 - 4 + 1
    xf, wp = _pad_flatten(x_nhwc, 2)
    w_flat = _rearrange_w_s1(w_oihw)
    res = _conv_flat(xf, w_flat, bias, oh=oh, ow=ow, wp=wp, kh=4, kw=4, act=act)
    return res, oh, ow


def batchnorm_leaky_apply(y_flat, sum_, sumsq, gamma, beta, count,
                          slope=0.2, eps=1e-5):
    """Training-mode BN (biased batch stats, computed in the conv kernel)
    followed by LeakyReLU, applied as one Pallas scale/shift pass."""
    mean = sum_[0] / count
    var = jnp.maximum(sumsq[0] / count - mean * mean, 0.0)
    scale = gamma / jnp.sqrt(var + eps)
    shift = beta - mean * scale
    n, m, c = y_flat.shape
    out = _scale_shift_leaky(y_flat.reshape(n * m, c), scale, shift, slope)
    return out.reshape(n, m, c)


# ----------------------------------------------------------------------------
# Parameter construction (deterministic, PyTorch-default-like uniform init)
# ----------------------------------------------------------------------------
def _init_conv(key, out_ch, in_ch, kh, kw):
    kw_, kb_ = jax.random.split(key)
    fan_in = in_ch * kh * kw
    bound = 1.0 / jnp.sqrt(fan_in)
    w = jax.random.uniform(kw_, (out_ch, in_ch, kh, kw), jnp.float32,
                           -bound, bound)
    b = jax.random.uniform(kb_, (out_ch,), jnp.float32, -bound, bound)
    return w, b


def init_params(key, in_channel=3, ndf=64):
    keys = jax.random.split(key, 8)
    nf1 = ndf
    nf2 = min(ndf * 2, 512)
    nf3 = min(nf2 * 2, 512)
    p = {}
    p["share0_w"], p["share0_b"] = _init_conv(keys[0], nf1, in_channel, 4, 4)
    p["share2_w"], p["share2_b"] = _init_conv(keys[1], nf2, nf1, 4, 4)
    p["bn3_gamma"] = jnp.ones((nf2,), jnp.float32)
    p["bn3_beta"] = jnp.zeros((nf2,), jnp.float32)
    p["share5_w"], p["share5_b"] = _init_conv(keys[2], nf3, nf2, 4, 4)
    p["bn6_gamma"] = jnp.ones((nf3,), jnp.float32)
    p["bn6_beta"] = jnp.zeros((nf3,), jnp.float32)
    p["smooth_w"], p["smooth_b"] = _init_conv(keys[3], 1, nf3, 4, 4)
    p["fx0_w"], p["fx0_b"] = _init_conv(keys[4], 1, 1, 3, 3)
    p["fx2_w"], p["fx2_b"] = _init_conv(keys[5], 1, 1, 1, 1)
    p["fy0_w"], p["fy0_b"] = _init_conv(keys[6], 1, 1, 3, 3)
    p["fy2_w"], p["fy2_b"] = _init_conv(keys[7], 1, 1, 1, 1)
    return p


# ----------------------------------------------------------------------------
# Forward pass (matches AniGANDiscriminator.forward; NCHW in/out like PyTorch)
# ----------------------------------------------------------------------------
def anigan_discriminator_forward(params, z_nchw, domain):
    if domain == "X":
        pre = "fx"
    elif domain == "Y":
        pre = "fy"
    else:
        print("???????????????")
        assert 1 > 2

    z = jnp.transpose(z_nchw, (0, 2, 3, 1)).astype(jnp.float32)  # NCHW -> NHWC
    n = z.shape[0]
    K1 = []

    # share[0]: Conv(4,s2,p2)  share[1]: LeakyReLU(0.2)  -- fused epilogue
    (y1,), oh1, ow1 = conv4x4_s2(z, params["share0_w"], params["share0_b"],
                                 act="leaky")
    nf1 = params["share0_w"].shape[0]
    z1 = y1.reshape(n, oh1, ow1, nf1)

    # share[2]: Conv  share[3]: BN  share[4]: LeakyReLU  -> K1[0]
    (y2, s2, q2), oh2, ow2 = conv4x4_s2(z1, params["share2_w"],
                                        params["share2_b"],
                                        act="none", with_stats=True)
    nf2 = params["share2_w"].shape[0]
    z2 = batchnorm_leaky_apply(y2, s2, q2, params["bn3_gamma"],
                               params["bn3_beta"], float(n * oh2 * ow2))
    z2 = z2.reshape(n, oh2, ow2, nf2)
    K1.append(jnp.transpose(z2, (0, 3, 1, 2)))

    # share[5]: Conv  share[6]: BN  share[7]: LeakyReLU  -> K1[1]
    (y3, s3, q3), oh3, ow3 = conv4x4_s2(z2, params["share5_w"],
                                        params["share5_b"],
                                        act="none", with_stats=True)
    nf3 = params["share5_w"].shape[0]
    z3 = batchnorm_leaky_apply(y3, s3, q3, params["bn6_gamma"],
                               params["bn6_beta"], float(n * oh3 * ow3))
    z3 = z3.reshape(n, oh3, ow3, nf3)
    K1.append(jnp.transpose(z3, (0, 3, 1, 2)))

    # smooth: Conv(4, s1, p2) -> 1 channel
    (sm,), ohs, ows = conv4x4_s1(z3, params["smooth_w"], params["smooth_b"],
                                 act="none")

    # func_X / func_Y head: Conv3x3 (-> K2) + LeakyReLU + Conv1x1 + ReLU, fused
    k2_flat, out_flat, oh_h, ow_h = _head(
        sm, params[pre + "0_w"], params[pre + "0_b"],
        params[pre + "2_w"], params[pre + "2_b"], ohs=ohs, ows=ows)

    K2 = [jnp.transpose(k2_flat.reshape(n, oh_h, ow_h, 1), (0, 3, 1, 2))]
    out = jnp.transpose(out_flat.reshape(n, oh_h, ow_h, 1), (0, 3, 1, 2))
    return out, K1, K2


# ----------------------------------------------------------------------------
if __name__ == "__main__":
    key = jax.random.PRNGKey(0)
    k_params, k_input = jax.random.split(key)

    IN_CHANNEL, NDF = 3, 8          # small but shape-consistent with the module
    params = init_params(k_params, in_channel=IN_CHANNEL, ndf=NDF)

    z = jax.random.normal(k_input, (2, IN_CHANNEL, 32, 32), jnp.float32)

    fwd = jax.jit(anigan_discriminator_forward, static_argnums=(2,))
    out, K1, K2 = fwd(params, z, "X")
    jax.block_until_ready((out, K1, K2))
    print("KERNEL_OK")
</pallas_src>

<mosaic_0001>
module attributes {stable_mosaic.version = 11 : i64} {
  func.func @_conv_kernel(%arg0: i32, %arg1: memref<1x324x12xf32, #tpu.memory_space<vmem>>, %arg2: memref<48x8xbf16, #tpu.memory_space<vmem>>, %arg3: memref<1x8xf32, #tpu.memory_space<vmem>>, %arg4: memref<1x289x8xf32, #tpu.memory_space<vmem>>) attributes {dimension_semantics = [#tpu.dimension_semantics<parallel>], iteration_bounds = array<i64: 2>, scalar_prefetch = 0 : i64, scratch_operands = 0 : i64, tpu.core_type = #tpu.core_type<tc>, window_params = [{transform_indices = @transform_0, window_bounds = array<i64: 1, 324, 12>}, {pipeline_mode = #tpu.pipeline_mode<synchronous>, transform_indices = @transform_1, window_bounds = array<i64: 48, 8>}, {pipeline_mode = #tpu.pipeline_mode<synchronous>, transform_indices = @transform_2, window_bounds = array<i64: 1, 8>}, {transform_indices = @transform_3, window_bounds = array<i64: 1, 289, 8>}]} {
    %c0 = arith.constant 0 : index
    %c0_0 = arith.constant 0 : index
    %0 = vector.load %arg3[%c0, %c0_0] : memref<1x8xf32, #tpu.memory_space<vmem>>, vector<1x8xf32>
    %c0_i32 = arith.constant 0 : i32
    %c17_i32 = arith.constant 17 : i32
    %1 = arith.addi %c0_i32, %c17_i32 : i32
    %c1_i32 = arith.constant 1 : i32
    scf.for %arg5 = %c0_i32 to %1 step %c1_i32  : i32 {
      %cst = arith.constant 0.000000e+00 : f32
      %2 = vector.broadcast %cst : f32 to vector<17x8xf32>
      %c0_i32_2 = arith.constant 0 : i32
      %3 = arith.addi %arg5, %c0_i32_2 : i32
      %c18_i32 = arith.constant 18 : i32
      %4 = arith.muli %3, %c18_i32 : i32
      %c0_i32_3 = arith.constant 0 : i32
      %5 = arith.addi %4, %c0_i32_3 : i32
      %c0_4 = arith.constant 0 : index
      %6 = arith.index_cast %5 : i32 to index
      %c0_5 = arith.constant 0 : index
      %7 = vector.load %arg1[%c0_4, %6, %c0_5] : memref<1x324x12xf32, #tpu.memory_space<vmem>>, vector<1x17x12xf32>
      %8 = vector.shape_cast %7 : vector<1x17x12xf32> to vector<17x12xf32>
      %9 = arith.truncf %8 : vector<17x12xf32> to vector<17x12xbf16>
      %c0_6 = arith.constant 0 : index
      %c0_7 = arith.constant 0 : index
      %10 = vector.load %arg2[%c0_6, %c0_7] : memref<48x8xbf16, #tpu.memory_space<vmem>>, vector<12x8xbf16>
      %cst_8 = arith.constant dense<0.000000e+00> : vector<17x8xf32>
      %11 = tpu.matmul %9, %10, %cst_8 {dimension_numbers = #tpu.dot_dimension_numbers<[1], [0], [0], [1], [0, 0, 1, 1], [], []>} : vector<17x12xbf16>, vector<12x8xbf16>, vector<17x8xf32> -> vector<17x8xf32>
      %12 = arith.addf %2, %11 : vector<17x8xf32>
      %c0_i32_9 = arith.constant 0 : i32
      %13 = arith.addi %arg5, %c0_i32_9 : i32
      %c18_i32_10 = arith.constant 18 : i32
      %14 = arith.muli %13, %c18_i32_10 : i32
      %c1_i32_11 = arith.constant 1 : i32
      %15 = arith.addi %14, %c1_i32_11 : i32
      %c0_12 = arith.constant 0 : index
      %16 = arith.index_cast %15 : i32 to index
      %c0_13 = arith.constant 0 : index
      %17 = vector.load %arg1[%c0_12, %16, %c0_13] : memref<1x324x12xf32, #tpu.memory_space<vmem>>, vector<1x17x12xf32>
      %18 = vector.shape_cast %17 : vector<1x17x12xf32> to vector<17x12xf32>
      %19 = arith.truncf %18 : vector<17x12xf32> to vector<17x12xbf16>
      %c12 = arith.constant 12 : index
      %c0_14 = arith.constant 0 : index
      %20 = vector.load %arg2[%c12, %c0_14] : memref<48x8xbf16, #tpu.memory_space<vmem>>, vector<12x8xbf16>
      %cst_15 = arith.constant dense<0.000000e+00> : vector<17x8xf32>
      %21 = tpu.matmul %19, %20, %cst_15 {dimension_numbers = #tpu.dot_dimension_numbers<[1], [0], [0], [1], [0, 0, 1, 1], [], []>} : vector<17x12xbf16>, vector<12x8xbf16>, vector<17x8xf32> -> vector<17x8xf32>
      %22 = arith.addf %12, %21 : vector<17x8xf32>
      %c1_i32_16 = arith.constant 1 : i32
      %23 = arith.addi %arg5, %c1_i32_16 : i32
      %c18_i32_17 = arith.constant 18 : i32
      %24 = arith.muli %23, %c18_i32_17 : i32
      %c0_i32_18 = arith.constant 0 : i32
      %25 = arith.addi %24, %c0_i32_18 : i32
      %c0_19 = arith.constant 0 : index
      %26 = arith.index_cast %25 : i32 to index
      %c0_20 = arith.constant 0 : index
      %27 = vector.load %arg1[%c0_19, %26, %c0_20] : memref<1x324x12xf32, #tpu.memory_space<vmem>>, vector<1x17x12xf32>
      %28 = vector.shape_cast %27 : vector<1x17x12xf32> to vector<17x12xf32>
      %29 = arith.truncf %28 : vector<17x12xf32> to vector<17x12xbf16>
      %c24 = arith.constant 24 : index
      %c0_21 = arith.constant 0 : index
      %30 = vector.load %arg2[%c24, %c0_21] : memref<48x8xbf16, #tpu.memory_space<vmem>>, vector<12x8xbf16>
      %cst_22 = arith.constant dense<0.000000e+00> : vector<17x8xf32>
      %31 = tpu.matmul %29, %30, %cst_22 {dimension_numbers = #tpu.dot_dimension_numbers<[1], [0], [0], [1], [0, 0, 1, 1], [], []>} : vector<17x12xbf16>, vector<12x8xbf16>, vector<17x8xf32> -> vector<17x8xf32>
      %32 = arith.addf %22, %31 : vector<17x8xf32>
      %c1_i32_23 = arith.constant 1 : i32
      %33 = arith.addi %arg5, %c1_i32_23 : i32
      %c18_i32_24 = arith.constant 18 : i32
      %34 = arith.muli %33, %c18_i32_24 : i32
      %c1_i32_25 = arith.constant 1 : i32
      %35 = arith.addi %34, %c1_i32_25 : i32
      %c0_26 = arith.constant 0 : index
      %36 = arith.index_cast %35 : i32 to index
      %c0_27 = arith.constant 0 : index
      %37 = vector.load %arg1[%c0_26, %36, %c0_27] : memref<1x324x12xf32, #tpu.memory_space<vmem>>, vector<1x17x12xf32>
      %38 = vector.shape_cast %37 : vector<1x17x12xf32> to vector<17x12xf32>
      %39 = arith.truncf %38 : vector<17x12xf32> to vector<17x12xbf16>
      %c36 = arith.constant 36 : index
      %c0_28 = arith.constant 0 : index
      %40 = vector.load %arg2[%c36, %c0_28] : memref<48x8xbf16, #tpu.memory_space<vmem>>, vector<12x8xbf16>
      %cst_29 = arith.constant dense<0.000000e+00> : vector<17x8xf32>
      %41 = tpu.matmul %39, %40, %cst_29 {dimension_numbers = #tpu.dot_dimension_numbers<[1], [0], [0], [1], [0, 0, 1, 1], [], []>} : vector<17x12xbf16>, vector<12x8xbf16>, vector<17x8xf32> -> vector<17x8xf32>
      %42 = arith.addf %32, %41 : vector<17x8xf32>
      %43 = vector.broadcast %0 : vector<1x8xf32> to vector<17x8xf32>
      %44 = arith.addf %42, %43 : vector<17x8xf32>
      %cst_30 = arith.constant 0.000000e+00 : f32
      %45 = vector.broadcast %cst_30 : f32 to vector<17x8xf32>
      %46 = arith.cmpf oge, %44, %45 : vector<17x8xf32>
      %cst_31 = arith.constant 2.000000e-01 : f32
      %47 = vector.broadcast %cst_31 : f32 to vector<17x8xf32>
      %48 = arith.mulf %47, %44 : vector<17x8xf32>
      %49 = arith.select %46, %44, %48 : vector<17x8xi1>, vector<17x8xf32>
      %c17_i32_32 = arith.constant 17 : i32
      %50 = arith.muli %arg5, %c17_i32_32 : i32
      %c0_33 = arith.constant 0 : index
      %51 = arith.index_cast %50 : i32 to index
      %c0_34 = arith.constant 0 : index
      %52 = vector.load %arg4[%c0_33, %51, %c0_34] : memref<1x289x8xf32, #tpu.memory_space<vmem>>, vector<1x17x8xf32>
      %53 = vector.shape_cast %52 : vector<1x17x8xf32> to vector<17x8xf32>
      %54 = vector.shape_cast %49 : vector<17x8xf32> to vector<1x17x8xf32>
      tpu.vector_store %arg4[%c0_33, %51, %c0_34], %54 {strides = array<i32>} : memref<1x289x8xf32, #tpu.memory_space<vmem>>, vector<1x17x8xf32>,
    }
    %c17_i32_1 = arith.constant 17 : i32
    return
  }
  func.func @transform_0(%arg0: i32) -> (i32, i32, i32) {
    %c0_i32 = arith.constant 0 : i32
    %c0_i32_0 = arith.constant 0 : i32
    %c0_i32_1 = arith.constant 0 : i32
    return %arg0, %c0_i32, %c0_i32_0 : i32, i32, i32
  }
  func.func @transform_1(%arg0: i32) -> (i32, i32) {
    %c0_i32 = arith.constant 0 : i32
    %c0_i32_0 = arith.constant 0 : i32
    %c0_i32_1 = arith.constant 0 : i32
    return %c0_i32, %c0_i32_0 : i32, i32
  }
  func.func @transform_2(%arg0: i32) -> (i32, i32) {
    %c0_i32 = arith.constant 0 : i32
    %c0_i32_0 = arith.constant 0 : i32
    %c0_i32_1 = arith.constant 0 : i32
    return %c0_i32, %c0_i32_0 : i32, i32
  }
  func.func @transform_3(%arg0: i32) -> (i32, i32, i32) {
    %c0_i32 = arith.constant 0 : i32
    %c0_i32_0 = arith.constant 0 : i32
    %c0_i32_1 = arith.constant 0 : i32
    return %arg0, %c0_i32, %c0_i32_0 : i32, i32, i32
  }
}

module attributes {stable_mosaic.version = 11 : i64} {
  func.func @_conv_kernel(%arg0: i32, %arg1: memref<1x121x32xf32, #tpu.memory_space<vmem>>, %arg2: memref<128x16xbf16, #tpu.memory_space<vmem>>, %arg3: memref<1x16xf32, #tpu.memory_space<vmem>>, %arg4: memref<1x81x16xf32, #tpu.memory_space<vmem>>, %arg5: memref<1x16xf32, #tpu.memory_space<vmem>>, %arg6: memref<1x16xf32, #tpu.memory_space<vmem>>) attributes {dimension_semantics = [#tpu.dimension_semantics<arbitrary>], iteration_bounds = array<i64: 2>, scalar_prefetch = 0 : i64, scratch_operands = 0 : i64, tpu.core_type = #tpu.core_type<tc>, window_params = [{transform_indices = @transform_0, window_bounds = array<i64: 1, 121, 32>}, {pipeline_mode = #tpu.pipeline_mode<synchronous>, transform_indices = @transform_1, window_bounds = array<i64: 128, 16>}, {pipeline_mode = #tpu.pipeline_mode<synchronous>, transform_indices = @transform_2, window_bounds = array<i64: 1, 16>}, {transform_indices = @transform_3, window_bounds = array<i64: 1, 81, 16>}, {pipeline_mode = #tpu.pipeline_mode<synchronous>, transform_indices = @transform_4, window_bounds = array<i64: 1, 16>}, {pipeline_mode = #tpu.pipeline_mode<synchronous>, transform_indices = @transform_5, window_bounds = array<i64: 1, 16>}]} {
    %c0_i32 = arith.constant 0 : i32
    %0 = arith.cmpi eq, %arg0, %c0_i32 : i32
    %1 = arith.extui %0 : i1 to i32
    %c0_i32_0 = arith.constant 0 : i32
    %2 = arith.cmpi ne, %1, %c0_i32_0 : i32
    scf.if %2 {
      %cst = arith.constant 0.000000e+00 : f32
      %5 = vector.broadcast %cst : f32 to vector<1x16xf32>
      %c0_4 = arith.constant 0 : index
      %c0_5 = arith.constant 0 : index
      %6 = vector.load %arg5[%c0_4, %c0_5] : memref<1x16xf32, #tpu.memory_space<vmem>>, vector<1x16xf32>
      tpu.vector_store %arg5[%c0_4, %c0_5], %5 {strides = array<i32>} : memref<1x16xf32, #tpu.memory_space<vmem>>, vector<1x16xf32>,
      %cst_6 = arith.constant 0.000000e+00 : f32
      %7 = vector.broadcast %cst_6 : f32 to vector<1x16xf32>
      %c0_7 = arith.constant 0 : index
      %c0_8 = arith.constant 0 : index
      %8 = vector.load %arg6[%c0_7, %c0_8] : memref<1x16xf32, #tpu.memory_space<vmem>>, vector<1x16xf32>
      tpu.vector_store %arg6[%c0_7, %c0_8], %7 {strides = array<i32>} : memref<1x16xf32, #tpu.memory_space<vmem>>, vector<1x16xf32>,
    } else {
    }
    %c0 = arith.constant 0 : index
    %c0_1 = arith.constant 0 : index
    %3 = vector.load %arg3[%c0, %c0_1] : memref<1x16xf32, #tpu.memory_space<vmem>>, vector<1x16xf32>
    %c0_i32_2 = arith.constant 0 : i32
    %c9_i32 = arith.constant 9 : i32
    %4 = arith.addi %c0_i32_2, %c9_i32 : i32
    %c1_i32 = arith.constant 1 : i32
    scf.for %arg7 = %c0_i32_2 to %4 step %c1_i32  : i32 {
      %cst = arith.constant 0.000000e+00 : f32
      %5 = vector.broadcast %cst : f32 to vector<9x16xf32>
      %c0_i32_4 = arith.constant 0 : i32
      %6 = arith.addi %arg7, %c0_i32_4 : i32
      %c11_i32 = arith.constant 11 : i32
      %7 = arith.muli %6, %c11_i32 : i32
      %c0_i32_5 = arith.constant 0 : i32
      %8 = arith.addi %7, %c0_i32_5 : i32
      %c0_6 = arith.constant 0 : index
      %9 = arith.index_cast %8 : i32 to index
      %c0_7 = arith.constant 0 : index
      %10 = vector.load %arg1[%c0_6, %9, %c0_7] : memref<1x121x32xf32, #tpu.memory_space<vmem>>, vector<1x9x32xf32>
      %11 = vector.shape_cast %10 : vector<1x9x32xf32> to vector<9x32xf32>
      %12 = arith.truncf %11 : vector<9x32xf32> to vector<9x32xbf16>
      %c0_8 = arith.constant 0 : index
      %c0_9 = arith.constant 0 : index
      %13 = vector.load %arg2[%c0_8, %c0_9] : memref<128x16xbf16, #tpu.memory_space<vmem>>, vector<32x16xbf16>
      %cst_10 = arith.constant dense<0.000000e+00> : vector<9x16xf32>
      %14 = tpu.matmul %12, %13, %cst_10 {dimension_numbers = #tpu.dot_dimension_numbers<[1], [0], [0], [1], [0, 0, 1, 1], [], []>} : vector<9x32xbf16>, vector<32x16xbf16>, vector<9x16xf32> -> vector<9x16xf32>
      %15 = arith.addf %5, %14 : vector<9x16xf32>
      %c0_i32_11 = arith.constant 0 : i32
      %16 = arith.addi %arg7, %c0_i32_11 : i32
      %c11_i32_12 = arith.constant 11 : i32
      %17 = arith.muli %16, %c11_i32_12 : i32
      %c1_i32_13 = arith.constant 1 : i32
      %18 = arith.addi %17, %c1_i32_13 : i32
      %c0_14 = arith.constant 0 : index
      %19 = arith.index_cast %18 : i32 to index
      %c0_15 = arith.constant 0 : index
      %20 = vector.load %arg1[%c0_14, %19, %c0_15] : memref<1x121x32xf32, #tpu.memory_space<vmem>>, vector<1x9x32xf32>
      %21 = vector.shape_cast %20 : vector<1x9x32xf32> to vector<9x32xf32>
      %22 = arith.truncf %21 : vector<9x32xf32> to vector<9x32xbf16>
      %c32 = arith.constant 32 : index
      %c0_16 = arith.constant 0 : index
      %23 = vector.load %arg2[%c32, %c0_16] : memref<128x16xbf16, #tpu.memory_space<vmem>>, vector<32x16xbf16>
      %cst_17 = arith.constant dense<0.000000e+00> : vector<9x16xf32>
      %24 = tpu.matmul %22, %23, %cst_17 {dimension_numbers = #tpu.dot_dimension_numbers<[1], [0], [0], [1], [0, 0, 1, 1], [], []>} : vector<9x32xbf16>, vector<32x16xbf16>, vector<9x16xf32> -> vector<9x16xf32>
      %25 = arith.addf %15, %24 : vector<9x16xf32>
      %c1_i32_18 = arith.constant 1 : i32
      %26 = arith.addi %arg7, %c1_i32_18 : i32
      %c11_i32_19 = arith.constant 11 : i32
      %27 = arith.muli %26, %c11_i32_19 : i32
      %c0_i32_20 = arith.constant 0 : i32
      %28 = arith.addi %27, %c0_i32_20 : i32
      %c0_21 = arith.constant 0 : index
      %29 = arith.index_cast %28 : i32 to index
      %c0_22 = arith.constant 0 : index
      %30 = vector.load %arg1[%c0_21, %29, %c0_22] : memref<1x121x32xf32, #tpu.memory_space<vmem>>, vector<1x9x32xf32>
      %31 = vector.shape_cast %30 : vector<1x9x32xf32> to vector<9x32xf32>
      %32 = arith.truncf %31 : vector<9x32xf32> to vector<9x32xbf16>
      %c64 = arith.constant 64 : index
      %c0_23 = arith.constant 0 : index
      %33 = vector.load %arg2[%c64, %c0_23] : memref<128x16xbf16, #tpu.memory_space<vmem>>, vector<32x16xbf16>
      %cst_24 = arith.constant dense<0.000000e+00> : vector<9x16xf32>
      %34 = tpu.matmul %32, %33, %cst_24 {dimension_numbers = #tpu.dot_dimension_numbers<[1], [0], [0], [1], [0, 0, 1, 1], [], []>} : vector<9x32xbf16>, vector<32x16xbf16>, vector<9x16xf32> -> vector<9x16xf32>
      %35 = arith.addf %25, %34 : vector<9x16xf32>
      %c1_i32_25 = arith.constant 1 : i32
      %36 = arith.addi %arg7, %c1_i32_25 : i32
      %c11_i32_26 = arith.constant 11 : i32
      %37 = arith.muli %36, %c11_i32_26 : i32
      %c1_i32_27 = arith.constant 1 : i32
      %38 = arith.addi %37, %c1_i32_27 : i32
      %c0_28 = arith.constant 0 : index
      %39 = arith.index_cast %38 : i32 to index
      %c0_29 = arith.constant 0 : index
      %40 = vector.load %arg1[%c0_28, %39, %c0_29] : memref<1x121x32xf32, #tpu.memory_space<vmem>>, vector<1x9x32xf32>
      %41 = vector.shape_cast %40 : vector<1x9x32xf32> to vector<9x32xf32>
      %42 = arith.truncf %41 : vector<9x32xf32> to vector<9x32xbf16>
      %c96 = arith.constant 96 : index
      %c0_30 = arith.constant 0 : index
      %43 = vector.load %arg2[%c96, %c0_30] : memref<128x16xbf16, #tpu.memory_space<vmem>>, vector<32x16xbf16>
      %cst_31 = arith.constant dense<0.000000e+00> : vector<9x16xf32>
      %44 = tpu.matmul %42, %43, %cst_31 {dimension_numbers = #tpu.dot_dimension_numbers<[1], [0], [0], [1], [0, 0, 1, 1], [], []>} : vector<9x32xbf16>, vector<32x16xbf16>, vector<9x16xf32> -> vector<9x16xf32>
      %45 = arith.addf %35, %44 : vector<9x16xf32>
      %46 = vector.broadcast %3 : vector<1x16xf32> to vector<9x16xf32>
      %47 = arith.addf %45, %46 : vector<9x16xf32>
      %c9_i32_32 = arith.constant 9 : i32
      %48 = arith.muli %arg7, %c9_i32_32 : i32
      %c0_33 = arith.constant 0 : index
      %49 = arith.index_cast %48 : i32 to index
      %c0_34 = arith.constant 0 : index
      %50 = vector.load %arg4[%c0_33, %49, %c0_34] : memref<1x81x16xf32, #tpu.memory_space<vmem>>, vector<1x9x16xf32>
      %51 = vector.shape_cast %50 : vector<1x9x16xf32> to vector<9x16xf32>
      %52 = vector.shape_cast %47 : vector<9x16xf32> to vector<1x9x16xf32>
      tpu.vector_store %arg4[%c0_33, %49, %c0_34], %52 {strides = array<i32>} : memref<1x81x16xf32, #tpu.memory_space<vmem>>, vector<1x9x16xf32>,
      %c0_35 = arith.constant 0 : index
      %c0_36 = arith.constant 0 : index
      %53 = vector.load %arg5[%c0_35, %c0_36] : memref<1x16xf32, #tpu.memory_space<vmem>>, vector<1x16xf32>
      %cst_37 = arith.constant dense<0.000000e+00> : vector<16xf32>
      %54 = vector.multi_reduction <add>, %47, %cst_37 [0] : vector<9x16xf32> to vector<16xf32>
      %55 = vector.shape_cast %54 : vector<16xf32> to vector<1x16xf32>
      %56 = arith.addf %53, %55 : vector<1x16xf32>
      %c0_38 = arith.constant 0 : index
      %c0_39 = arith.constant 0 : index
      %57 = vector.load %arg5[%c0_38, %c0_39] : memref<1x16xf32, #tpu.memory_space<vmem>>, vector<1x16xf32>
      tpu.vector_store %arg5[%c0_38, %c0_39], %56 {strides = array<i32>} : memref<1x16xf32, #tpu.memory_space<vmem>>, vector<1x16xf32>,
      %c0_40 = arith.constant 0 : index
      %c0_41 = arith.constant 0 : index
      %58 = vector.load %arg6[%c0_40, %c0_41] : memref<1x16xf32, #tpu.memory_space<vmem>>, vector<1x16xf32>
      %59 = arith.mulf %47, %47 : vector<9x16xf32>
      %cst_42 = arith.constant dense<0.000000e+00> : vector<16xf32>
      %60 = vector.multi_reduction <add>, %59, %cst_42 [0] : vector<9x16xf32> to vector<16xf32>
      %61 = vector.shape_cast %60 : vector<16xf32> to vector<1x16xf32>
      %62 = arith.addf %58, %61 : vector<1x16xf32>
      %c0_43 = arith.constant 0 : index
      %c0_44 = arith.constant 0 : index
      %63 = vector.load %arg6[%c0_43, %c0_44] : memref<1x16xf32, #tpu.memory_space<vmem>>, vector<1x16xf32>
      tpu.vector_store %arg6[%c0_43, %c0_44], %62 {strides = array<i32>} : memref<1x16xf32, #tpu.memory_space<vmem>>, vector<1x16xf32>,
    }
    %c9_i32_3 = arith.constant 9 : i32
    return
  }
  func.func @transform_0(%arg0: i32) -> (i32, i32, i32) {
    %c0_i32 = arith.constant 0 : i32
    %c0_i32_0 = arith.constant 0 : i32
    %c0_i32_1 = arith.constant 0 : i32
    return %arg0, %c0_i32, %c0_i32_0 : i32, i32, i32
  }
  func.func @transform_1(%arg0: i32) -> (i32, i32) {
    %c0_i32 = arith.constant 0 : i32
    %c0_i32_0 = arith.constant 0 : i32
    %c0_i32_1 = arith.constant 0 : i32
    return %c0_i32, %c0_i32_0 : i32, i32
  }
  func.func @transform_2(%arg0: i32) -> (i32, i32) {
    %c0_i32 = arith.constant 0 : i32
    %c0_i32_0 = arith.constant 0 : i32
    %c0_i32_1 = arith.constant 0 : i32
    return %c0_i32, %c0_i32_0 : i32, i32
  }
  func.func @transform_3(%arg0: i32) -> (i32, i32, i32) {
    %c0_i32 = arith.constant 0 : i32
    %c0_i32_0 = arith.constant 0 : i32
    %c0_i32_1 = arith.constant 0 : i32
    return %arg0, %c0_i32, %c0_i32_0 : i32, i32, i32
  }
  func.func @transform_4(%arg0: i32) -> (i32, i32) {
    %c0_i32 = arith.constant 0 : i32
    %c0_i32_0 = arith.constant 0 : i32
    %c0_i32_1 = arith.constant 0 : i32
    return %c0_i32, %c0_i32_0 : i32, i32
  }
  func.func @transform_5(%arg0: i32) -> (i32, i32) {
    %c0_i32 = arith.constant 0 : i32
    %c0_i32_0 = arith.constant 0 : i32
    %c0_i32_1 = arith.constant 0 : i32
    return %c0_i32, %c0_i32_0 : i32, i32
  }
}

module attributes {stable_mosaic.version = 11 : i64} {
  func.func @_scale_shift_leaky_kernel(%arg0: i32, %arg1: memref<162x16xf32, #tpu.memory_space<vmem>>, %arg2: memref<1x16xf32, #tpu.memory_space<vmem>>, %arg3: memref<1x16xf32, #tpu.memory_space<vmem>>, %arg4: memref<162x16xf32, #tpu.memory_space<vmem>>) attributes {dimension_semantics = [#tpu.dimension_semantics<parallel>], iteration_bounds = array<i64: 1>, scalar_prefetch = 0 : i64, scratch_operands = 0 : i64, tpu.core_type = #tpu.core_type<tc>, window_params = [{transform_indices = @transform_0, window_bounds = array<i64: 162, 16>}, {pipeline_mode = #tpu.pipeline_mode<synchronous>, transform_indices = @transform_1, window_bounds = array<i64: 1, 16>}, {pipeline_mode = #tpu.pipeline_mode<synchronous>, transform_indices = @transform_2, window_bounds = array<i64: 1, 16>}, {transform_indices = @transform_3, window_bounds = array<i64: 162, 16>}]} {
    %c0 = arith.constant 0 : index
    %c0_0 = arith.constant 0 : index
    %0 = vector.load %arg1[%c0, %c0_0] : memref<162x16xf32, #tpu.memory_space<vmem>>, vector<162x16xf32>
    %c0_1 = arith.constant 0 : index
    %c0_2 = arith.constant 0 : index
    %1 = vector.load %arg2[%c0_1, %c0_2] : memref<1x16xf32, #tpu.memory_space<vmem>>, vector<1x16xf32>
    %2 = vector.broadcast %1 : vector<1x16xf32> to vector<162x16xf32>
    %3 = arith.mulf %0, %2 : vector<162x16xf32>
    %c0_3 = arith.constant 0 : index
    %c0_4 = arith.constant 0 : index
    %4 = vector.load %arg3[%c0_3, %c0_4] : memref<1x16xf32, #tpu.memory_space<vmem>>, vector<1x16xf32>
    %5 = vector.broadcast %4 : vector<1x16xf32> to vector<162x16xf32>
    %6 = arith.addf %3, %5 : vector<162x16xf32>
    %cst = arith.constant 0.000000e+00 : f32
    %7 = vector.broadcast %cst : f32 to vector<162x16xf32>
    %8 = arith.cmpf oge, %6, %7 : vector<162x16xf32>
    %cst_5 = arith.constant 2.000000e-01 : f32
    %9 = vector.broadcast %cst_5 : f32 to vector<162x16xf32>
    %10 = arith.mulf %9, %6 : vector<162x16xf32>
    %11 = arith.select %8, %6, %10 : vector<162x16xi1>, vector<162x16xf32>
    %c0_6 = arith.constant 0 : index
    %c0_7 = arith.constant 0 : index
    %12 = vector.load %arg4[%c0_6, %c0_7] : memref<162x16xf32, #tpu.memory_space<vmem>>, vector<162x16xf32>
    tpu.vector_store %arg4[%c0_6, %c0_7], %11 {strides = array<i32>} : memref<162x16xf32, #tpu.memory_space<vmem>>, vector<162x16xf32>,
    return
  }
  func.func @transform_0(%arg0: i32) -> (i32, i32) {
    %c0_i32 = arith.constant 0 : i32
    %c0_i32_0 = arith.constant 0 : i32
    return %arg0, %c0_i32 : i32, i32
  }
  func.func @transform_1(%arg0: i32) -> (i32, i32) {
    %c0_i32 = arith.constant 0 : i32
    %c0_i32_0 = arith.constant 0 : i32
    %c0_i32_1 = arith.constant 0 : i32
    return %c0_i32, %c0_i32_0 : i32, i32
  }
  func.func @transform_2(%arg0: i32) -> (i32, i32) {
    %c0_i32 = arith.constant 0 : i32
    %c0_i32_0 = arith.constant 0 : i32
    %c0_i32_1 = arith.constant 0 : i32
    return %c0_i32, %c0_i32_0 : i32, i32
  }
  func.func @transform_3(%arg0: i32) -> (i32, i32) {
    %c0_i32 = arith.constant 0 : i32
    %c0_i32_0 = arith.constant 0 : i32
    return %arg0, %c0_i32 : i32, i32
  }
}

module attributes {stable_mosaic.version = 11 : i64} {
  func.func @_conv_kernel(%arg0: i32, %arg1: memref<1x49x64xf32, #tpu.memory_space<vmem>>, %arg2: memref<256x32xbf16, #tpu.memory_space<vmem>>, %arg3: memref<1x32xf32, #tpu.memory_space<vmem>>, %arg4: memref<1x25x32xf32, #tpu.memory_space<vmem>>, %arg5: memref<1x32xf32, #tpu.memory_space<vmem>>, %arg6: memref<1x32xf32, #tpu.memory_space<vmem>>) attributes {dimension_semantics = [#tpu.dimension_semantics<arbitrary>], iteration_bounds = array<i64: 2>, scalar_prefetch = 0 : i64, scratch_operands = 0 : i64, tpu.core_type = #tpu.core_type<tc>, window_params = [{transform_indices = @transform_0, window_bounds = array<i64: 1, 49, 64>}, {pipeline_mode = #tpu.pipeline_mode<synchronous>, transform_indices = @transform_1, window_bounds = array<i64: 256, 32>}, {pipeline_mode = #tpu.pipeline_mode<synchronous>, transform_indices = @transform_2, window_bounds = array<i64: 1, 32>}, {transform_indices = @transform_3, window_bounds = array<i64: 1, 25, 32>}, {pipeline_mode = #tpu.pipeline_mode<synchronous>, transform_indices = @transform_4, window_bounds = array<i64: 1, 32>}, {pipeline_mode = #tpu.pipeline_mode<synchronous>, transform_indices = @transform_5, window_bounds = array<i64: 1, 32>}]} {
    %c0_i32 = arith.constant 0 : i32
    %0 = arith.cmpi eq, %arg0, %c0_i32 : i32
    %1 = arith.extui %0 : i1 to i32
    %c0_i32_0 = arith.constant 0 : i32
    %2 = arith.cmpi ne, %1, %c0_i32_0 : i32
    scf.if %2 {
      %cst = arith.constant 0.000000e+00 : f32
      %5 = vector.broadcast %cst : f32 to vector<1x32xf32>
      %c0_4 = arith.constant 0 : index
      %c0_5 = arith.constant 0 : index
      %6 = vector.load %arg5[%c0_4, %c0_5] : memref<1x32xf32, #tpu.memory_space<vmem>>, vector<1x32xf32>
      tpu.vector_store %arg5[%c0_4, %c0_5], %5 {strides = array<i32>} : memref<1x32xf32, #tpu.memory_space<vmem>>, vector<1x32xf32>,
      %cst_6 = arith.constant 0.000000e+00 : f32
      %7 = vector.broadcast %cst_6 : f32 to vector<1x32xf32>
      %c0_7 = arith.constant 0 : index
      %c0_8 = arith.constant 0 : index
      %8 = vector.load %arg6[%c0_7, %c0_8] : memref<1x32xf32, #tpu.memory_space<vmem>>, vector<1x32xf32>
      tpu.vector_store %arg6[%c0_7, %c0_8], %7 {strides = array<i32>} : memref<1x32xf32, #tpu.memory_space<vmem>>, vector<1x32xf32>,
    } else {
    }
    %c0 = arith.constant 0 : index
    %c0_1 = arith.constant 0 : index
    %3 = vector.load %arg3[%c0, %c0_1] : memref<1x32xf32, #tpu.memory_space<vmem>>, vector<1x32xf32>
    %c0_i32_2 = arith.constant 0 : i32
    %c5_i32 = arith.constant 5 : i32
    %4 = arith.addi %c0_i32_2, %c5_i32 : i32
    %c1_i32 = arith.constant 1 : i32
    scf.for %arg7 = %c0_i32_2 to %4 step %c1_i32  : i32 {
      %cst = arith.constant 0.000000e+00 : f32
      %5 = vector.broadcast %cst : f32 to vector<5x32xf32>
      %c0_i32_4 = arith.constant 0 : i32
      %6 = arith.addi %arg7, %c0_i32_4 : i32
      %c7_i32 = arith.constant 7 : i32
      %7 = arith.muli %6, %c7_i32 : i32
      %c0_i32_5 = arith.constant 0 : i32
      %8 = arith.addi %7, %c0_i32_5 : i32
      %c0_6 = arith.constant 0 : index
      %9 = arith.index_cast %8 : i32 to index
      %c0_7 = arith.constant 0 : index
      %10 = vector.load %arg1[%c0_6, %9, %c0_7] : memref<1x49x64xf32, #tpu.memory_space<vmem>>, vector<1x5x64xf32>
      %11 = vector.shape_cast %10 : vector<1x5x64xf32> to vector<5x64xf32>
      %12 = arith.truncf %11 : vector<5x64xf32> to vector<5x64xbf16>
      %c0_8 = arith.constant 0 : index
      %c0_9 = arith.constant 0 : index
      %13 = vector.load %arg2[%c0_8, %c0_9] : memref<256x32xbf16, #tpu.memory_space<vmem>>, vector<64x32xbf16>
      %cst_10 = arith.constant dense<0.000000e+00> : vector<5x32xf32>
      %14 = tpu.matmul %12, %13, %cst_10 {dimension_numbers = #tpu.dot_dimension_numbers<[1], [0], [0], [1], [0, 0, 1, 1], [], []>} : vector<5x64xbf16>, vector<64x32xbf16>, vector<5x32xf32> -> vector<5x32xf32>
      %15 = arith.addf %5, %14 : vector<5x32xf32>
      %c0_i32_11 = arith.constant 0 : i32
      %16 = arith.addi %arg7, %c0_i32_11 : i32
      %c7_i32_12 = arith.constant 7 : i32
      %17 = arith.muli %16, %c7_i32_12 : i32
      %c1_i32_13 = arith.constant 1 : i32
      %18 = arith.addi %17, %c1_i32_13 : i32
      %c0_14 = arith.constant 0 : index
      %19 = arith.index_cast %18 : i32 to index
      %c0_15 = arith.constant 0 : index
      %20 = vector.load %arg1[%c0_14, %19, %c0_15] : memref<1x49x64xf32, #tpu.memory_space<vmem>>, vector<1x5x64xf32>
      %21 = vector.shape_cast %20 : vector<1x5x64xf32> to vector<5x64xf32>
      %22 = arith.truncf %21 : vector<5x64xf32> to vector<5x64xbf16>
      %c64 = arith.constant 64 : index
      %c0_16 = arith.constant 0 : index
      %23 = vector.load %arg2[%c64, %c0_16] : memref<256x32xbf16, #tpu.memory_space<vmem>>, vector<64x32xbf16>
      %cst_17 = arith.constant dense<0.000000e+00> : vector<5x32xf32>
      %24 = tpu.matmul %22, %23, %cst_17 {dimension_numbers = #tpu.dot_dimension_numbers<[1], [0], [0], [1], [0, 0, 1, 1], [], []>} : vector<5x64xbf16>, vector<64x32xbf16>, vector<5x32xf32> -> vector<5x32xf32>
      %25 = arith.addf %15, %24 : vector<5x32xf32>
      %c1_i32_18 = arith.constant 1 : i32
      %26 = arith.addi %arg7, %c1_i32_18 : i32
      %c7_i32_19 = arith.constant 7 : i32
      %27 = arith.muli %26, %c7_i32_19 : i32
      %c0_i32_20 = arith.constant 0 : i32
      %28 = arith.addi %27, %c0_i32_20 : i32
      %c0_21 = arith.constant 0 : index
      %29 = arith.index_cast %28 : i32 to index
      %c0_22 = arith.constant 0 : index
      %30 = vector.load %arg1[%c0_21, %29, %c0_22] : memref<1x49x64xf32, #tpu.memory_space<vmem>>, vector<1x5x64xf32>
      %31 = vector.shape_cast %30 : vector<1x5x64xf32> to vector<5x64xf32>
      %32 = arith.truncf %31 : vector<5x64xf32> to vector<5x64xbf16>
      %c128 = arith.constant 128 : index
      %c0_23 = arith.constant 0 : index
      %33 = vector.load %arg2[%c128, %c0_23] : memref<256x32xbf16, #tpu.memory_space<vmem>>, vector<64x32xbf16>
      %cst_24 = arith.constant dense<0.000000e+00> : vector<5x32xf32>
      %34 = tpu.matmul %32, %33, %cst_24 {dimension_numbers = #tpu.dot_dimension_numbers<[1], [0], [0], [1], [0, 0, 1, 1], [], []>} : vector<5x64xbf16>, vector<64x32xbf16>, vector<5x32xf32> -> vector<5x32xf32>
      %35 = arith.addf %25, %34 : vector<5x32xf32>
      %c1_i32_25 = arith.constant 1 : i32
      %36 = arith.addi %arg7, %c1_i32_25 : i32
      %c7_i32_26 = arith.constant 7 : i32
      %37 = arith.muli %36, %c7_i32_26 : i32
      %c1_i32_27 = arith.constant 1 : i32
      %38 = arith.addi %37, %c1_i32_27 : i32
      %c0_28 = arith.constant 0 : index
      %39 = arith.index_cast %38 : i32 to index
      %c0_29 = arith.constant 0 : index
      %40 = vector.load %arg1[%c0_28, %39, %c0_29] : memref<1x49x64xf32, #tpu.memory_space<vmem>>, vector<1x5x64xf32>
      %41 = vector.shape_cast %40 : vector<1x5x64xf32> to vector<5x64xf32>
      %42 = arith.truncf %41 : vector<5x64xf32> to vector<5x64xbf16>
      %c192 = arith.constant 192 : index
      %c0_30 = arith.constant 0 : index
      %43 = vector.load %arg2[%c192, %c0_30] : memref<256x32xbf16, #tpu.memory_space<vmem>>, vector<64x32xbf16>
      %cst_31 = arith.constant dense<0.000000e+00> : vector<5x32xf32>
      %44 = tpu.matmul %42, %43, %cst_31 {dimension_numbers = #tpu.dot_dimension_numbers<[1], [0], [0], [1], [0, 0, 1, 1], [], []>} : vector<5x64xbf16>, vector<64x32xbf16>, vector<5x32xf32> -> vector<5x32xf32>
      %45 = arith.addf %35, %44 : vector<5x32xf32>
      %46 = vector.broadcast %3 : vector<1x32xf32> to vector<5x32xf32>
      %47 = arith.addf %45, %46 : vector<5x32xf32>
      %c5_i32_32 = arith.constant 5 : i32
      %48 = arith.muli %arg7, %c5_i32_32 : i32
      %c0_33 = arith.constant 0 : index
      %49 = arith.index_cast %48 : i32 to index
      %c0_34 = arith.constant 0 : index
      %50 = vector.load %arg4[%c0_33, %49, %c0_34] : memref<1x25x32xf32, #tpu.memory_space<vmem>>, vector<1x5x32xf32>
      %51 = vector.shape_cast %50 : vector<1x5x32xf32> to vector<5x32xf32>
      %52 = vector.shape_cast %47 : vector<5x32xf32> to vector<1x5x32xf32>
      tpu.vector_store %arg4[%c0_33, %49, %c0_34], %52 {strides = array<i32>} : memref<1x25x32xf32, #tpu.memory_space<vmem>>, vector<1x5x32xf32>,
      %c0_35 = arith.constant 0 : index
      %c0_36 = arith.constant 0 : index
      %53 = vector.load %arg5[%c0_35, %c0_36] : memref<1x32xf32, #tpu.memory_space<vmem>>, vector<1x32xf32>
      %cst_37 = arith.constant dense<0.000000e+00> : vector<32xf32>
      %54 = vector.multi_reduction <add>, %47, %cst_37 [0] : vector<5x32xf32> to vector<32xf32>
      %55 = vector.shape_cast %54 : vector<32xf32> to vector<1x32xf32>
      %56 = arith.addf %53, %55 : vector<1x32xf32>
      %c0_38 = arith.constant 0 : index
      %c0_39 = arith.constant 0 : index
      %57 = vector.load %arg5[%c0_38, %c0_39] : memref<1x32xf32, #tpu.memory_space<vmem>>, vector<1x32xf32>
      tpu.vector_store %arg5[%c0_38, %c0_39], %56 {strides = array<i32>} : memref<1x32xf32, #tpu.memory_space<vmem>>, vector<1x32xf32>,
      %c0_40 = arith.constant 0 : index
      %c0_41 = arith.constant 0 : index
      %58 = vector.load %arg6[%c0_40, %c0_41] : memref<1x32xf32, #tpu.memory_space<vmem>>, vector<1x32xf32>
      %59 = arith.mulf %47, %47 : vector<5x32xf32>
      %cst_42 = arith.constant dense<0.000000e+00> : vector<32xf32>
      %60 = vector.multi_reduction <add>, %59, %cst_42 [0] : vector<5x32xf32> to vector<32xf32>
      %61 = vector.shape_cast %60 : vector<32xf32> to vector<1x32xf32>
      %62 = arith.addf %58, %61 : vector<1x32xf32>
      %c0_43 = arith.constant 0 : index
      %c0_44 = arith.constant 0 : index
      %63 = vector.load %arg6[%c0_43, %c0_44] : memref<1x32xf32, #tpu.memory_space<vmem>>, vector<1x32xf32>
      tpu.vector_store %arg6[%c0_43, %c0_44], %62 {strides = array<i32>} : memref<1x32xf32, #tpu.memory_space<vmem>>, vector<1x32xf32>,
    }
    %c5_i32_3 = arith.constant 5 : i32
    return
  }
  func.func @transform_0(%arg0: i32) -> (i32, i32, i32) {
    %c0_i32 = arith.constant 0 : i32
    %c0_i32_0 = arith.constant 0 : i32
    %c0_i32_1 = arith.constant 0 : i32
    return %arg0, %c0_i32, %c0_i32_0 : i32, i32, i32
  }
  func.func @transform_1(%arg0: i32) -> (i32, i32) {
    %c0_i32 = arith.constant 0 : i32
    %c0_i32_0 = arith.constant 0 : i32
    %c0_i32_1 = arith.constant 0 : i32
    return %c0_i32, %c0_i32_0 : i32, i32
  }
  func.func @transform_2(%arg0: i32) -> (i32, i32) {
    %c0_i32 = arith.constant 0 : i32
    %c0_i32_0 = arith.constant 0 : i32
    %c0_i32_1 = arith.constant 0 : i32
    return %c0_i32, %c0_i32_0 : i32, i32
  }
  func.func @transform_3(%arg0: i32) -> (i32, i32, i32) {
    %c0_i32 = arith.constant 0 : i32
    %c0_i32_0 = arith.constant 0 : i32
    %c0_i32_1 = arith.constant 0 : i32
    return %arg0, %c0_i32, %c0_i32_0 : i32, i32, i32
  }
  func.func @transform_4(%arg0: i32) -> (i32, i32) {
    %c0_i32 = arith.constant 0 : i32
    %c0_i32_0 = arith.constant 0 : i32
    %c0_i32_1 = arith.constant 0 : i32
    return %c0_i32, %c0_i32_0 : i32, i32
  }
  func.func @transform_5(%arg0: i32) -> (i32, i32) {
    %c0_i32 = arith.constant 0 : i32
    %c0_i32_0 = arith.constant 0 : i32
    %c0_i32_1 = arith.constant 0 : i32
    return %c0_i32, %c0_i32_0 : i32, i32
  }
}

module attributes {stable_mosaic.version = 11 : i64} {
  func.func @_scale_shift_leaky_kernel(%arg0: i32, %arg1: memref<50x32xf32, #tpu.memory_space<vmem>>, %arg2: memref<1x32xf32, #tpu.memory_space<vmem>>, %arg3: memref<1x32xf32, #tpu.memory_space<vmem>>, %arg4: memref<50x32xf32, #tpu.memory_space<vmem>>) attributes {dimension_semantics = [#tpu.dimension_semantics<parallel>], iteration_bounds = array<i64: 1>, scalar_prefetch = 0 : i64, scratch_operands = 0 : i64, tpu.core_type = #tpu.core_type<tc>, window_params = [{transform_indices = @transform_0, window_bounds = array<i64: 50, 32>}, {pipeline_mode = #tpu.pipeline_mode<synchronous>, transform_indices = @transform_1, window_bounds = array<i64: 1, 32>}, {pipeline_mode = #tpu.pipeline_mode<synchronous>, transform_indices = @transform_2, window_bounds = array<i64: 1, 32>}, {transform_indices = @transform_3, window_bounds = array<i64: 50, 32>}]} {
    %c0 = arith.constant 0 : index
    %c0_0 = arith.constant 0 : index
    %0 = vector.load %arg1[%c0, %c0_0] : memref<50x32xf32, #tpu.memory_space<vmem>>, vector<50x32xf32>
    %c0_1 = arith.constant 0 : index
    %c0_2 = arith.constant 0 : index
    %1 = vector.load %arg2[%c0_1, %c0_2] : memref<1x32xf32, #tpu.memory_space<vmem>>, vector<1x32xf32>
    %2 = vector.broadcast %1 : vector<1x32xf32> to vector<50x32xf32>
    %3 = arith.mulf %0, %2 : vector<50x32xf32>
    %c0_3 = arith.constant 0 : index
    %c0_4 = arith.constant 0 : index
    %4 = vector.load %arg3[%c0_3, %c0_4] : memref<1x32xf32, #tpu.memory_space<vmem>>, vector<1x32xf32>
    %5 = vector.broadcast %4 : vector<1x32xf32> to vector<50x32xf32>
    %6 = arith.addf %3, %5 : vector<50x32xf32>
    %cst = arith.constant 0.000000e+00 : f32
    %7 = vector.broadcast %cst : f32 to vector<50x32xf32>
    %8 = arith.cmpf oge, %6, %7 : vector<50x32xf32>
    %cst_5 = arith.constant 2.000000e-01 : f32
    %9 = vector.broadcast %cst_5 : f32 to vector<50x32xf32>
    %10 = arith.mulf %9, %6 : vector<50x32xf32>
    %11 = arith.select %8, %6, %10 : vector<50x32xi1>, vector<50x32xf32>
    %c0_6 = arith.constant 0 : index
    %c0_7 = arith.constant 0 : index
    %12 = vector.load %arg4[%c0_6, %c0_7] : memref<50x32xf32, #tpu.memory_space<vmem>>, vector<50x32xf32>
    tpu.vector_store %arg4[%c0_6, %c0_7], %11 {strides = array<i32>} : memref<50x32xf32, #tpu.memory_space<vmem>>, vector<50x32xf32>,
    return
  }
  func.func @transform_0(%arg0: i32) -> (i32, i32) {
    %c0_i32 = arith.constant 0 : i32
    %c0_i32_0 = arith.constant 0 : i32
    return %arg0, %c0_i32 : i32, i32
  }
  func.func @transform_1(%arg0: i32) -> (i32, i32) {
    %c0_i32 = arith.constant 0 : i32
    %c0_i32_0 = arith.constant 0 : i32
    %c0_i32_1 = arith.constant 0 : i32
    return %c0_i32, %c0_i32_0 : i32, i32
  }
  func.func @transform_2(%arg0: i32) -> (i32, i32) {
    %c0_i32 = arith.constant 0 : i32
    %c0_i32_0 = arith.constant 0 : i32
    %c0_i32_1 = arith.constant 0 : i32
    return %c0_i32, %c0_i32_0 : i32, i32
  }
  func.func @transform_3(%arg0: i32) -> (i32, i32) {
    %c0_i32 = arith.constant 0 : i32
    %c0_i32_0 = arith.constant 0 : i32
    return %arg0, %c0_i32 : i32, i32
  }
}

module attributes {stable_mosaic.version = 11 : i64} {
  func.func @_conv_kernel(%arg0: i32, %arg1: memref<1x81x32xf32, #tpu.memory_space<vmem>>, %arg2: memref<512x1xbf16, #tpu.memory_space<vmem>>, %arg3: memref<1x1xf32, #tpu.memory_space<vmem>>, %arg4: memref<1x36x1xf32, #tpu.memory_space<vmem>>) attributes {dimension_semantics = [#tpu.dimension_semantics<parallel>], iteration_bounds = array<i64: 2>, scalar_prefetch = 0 : i64, scratch_operands = 0 : i64, tpu.core_type = #tpu.core_type<tc>, window_params = [{transform_indices = @transform_0, window_bounds = array<i64: 1, 81, 32>}, {pipeline_mode = #tpu.pipeline_mode<synchronous>, transform_indices = @transform_1, window_bounds = array<i64: 512, 1>}, {pipeline_mode = #tpu.pipeline_mode<synchronous>, transform_indices = @transform_2, window_bounds = array<i64: 1, 1>}, {transform_indices = @transform_3, window_bounds = array<i64: 1, 36, 1>}]} {
    %c0 = arith.constant 0 : index
    %c0_0 = arith.constant 0 : index
    %0 = vector.load %arg3[%c0, %c0_0] : memref<1x1xf32, #tpu.memory_space<vmem>>, vector<1x1xf32>
    %c0_i32 = arith.constant 0 : i32
    %c6_i32 = arith.constant 6 : i32
    %1 = arith.addi %c0_i32, %c6_i32 : i32
    %c1_i32 = arith.constant 1 : i32
    scf.for %arg5 = %c0_i32 to %1 step %c1_i32  : i32 {
      %cst = arith.constant 0.000000e+00 : f32
      %2 = vector.broadcast %cst : f32 to vector<6x1xf32>
      %c0_i32_2 = arith.constant 0 : i32
      %3 = arith.addi %arg5, %c0_i32_2 : i32
      %c9_i32 = arith.constant 9 : i32
      %4 = arith.muli %3, %c9_i32 : i32
      %c0_i32_3 = arith.constant 0 : i32
      %5 = arith.addi %4, %c0_i32_3 : i32
      %c0_4 = arith.constant 0 : index
      %6 = arith.index_cast %5 : i32 to index
      %c0_5 = arith.constant 0 : index
      %7 = vector.load %arg1[%c0_4, %6, %c0_5] : memref<1x81x32xf32, #tpu.memory_space<vmem>>, vector<1x6x32xf32>
      %8 = vector.shape_cast %7 : vector<1x6x32xf32> to vector<6x32xf32>
      %9 = arith.truncf %8 : vector<6x32xf32> to vector<6x32xbf16>
      %c0_6 = arith.constant 0 : index
      %c0_7 = arith.constant 0 : index
      %10 = vector.load %arg2[%c0_6, %c0_7] : memref<512x1xbf16, #tpu.memory_space<vmem>>, vector<32x1xbf16>
      %cst_8 = arith.constant dense<0.000000e+00> : vector<6x1xf32>
      %11 = tpu.matmul %9, %10, %cst_8 {dimension_numbers = #tpu.dot_dimension_numbers<[1], [0], [0], [1], [0, 0, 1, 1], [], []>} : vector<6x32xbf16>, vector<32x1xbf16>, vector<6x1xf32> -> vector<6x1xf32>
      %12 = arith.addf %2, %11 : vector<6x1xf32>
      %c0_i32_9 = arith.constant 0 : i32
      %13 = arith.addi %arg5, %c0_i32_9 : i32
      %c9_i32_10 = arith.constant 9 : i32
      %14 = arith.muli %13, %c9_i32_10 : i32
      %c1_i32_11 = arith.constant 1 : i32
      %15 = arith.addi %14, %c1_i32_11 : i32
      %c0_12 = arith.constant 0 : index
      %16 = arith.index_cast %15 : i32 to index
      %c0_13 = arith.constant 0 : index
      %17 = vector.load %arg1[%c0_12, %16, %c0_13] : memref<1x81x32xf32, #tpu.memory_space<vmem>>, vector<1x6x32xf32>
      %18 = vector.shape_cast %17 : vector<1x6x32xf32> to vector<6x32xf32>
      %19 = arith.truncf %18 : vector<6x32xf32> to vector<6x32xbf16>
      %c32 = arith.constant 32 : index
      %c0_14 = arith.constant 0 : index
      %20 = vector.load %arg2[%c32, %c0_14] : memref<512x1xbf16, #tpu.memory_space<vmem>>, vector<32x1xbf16>
      %cst_15 = arith.constant dense<0.000000e+00> : vector<6x1xf32>
      %21 = tpu.matmul %19, %20, %cst_15 {dimension_numbers = #tpu.dot_dimension_numbers<[1], [0], [0], [1], [0, 0, 1, 1], [], []>} : vector<6x32xbf16>, vector<32x1xbf16>, vector<6x1xf32> -> vector<6x1xf32>
      %22 = arith.addf %12, %21 : vector<6x1xf32>
      %c0_i32_16 = arith.constant 0 : i32
      %23 = arith.addi %arg5, %c0_i32_16 : i32
      %c9_i32_17 = arith.constant 9 : i32
      %24 = arith.muli %23, %c9_i32_17 : i32
      %c2_i32 = arith.constant 2 : i32
      %25 = arith.addi %24, %c2_i32 : i32
      %c0_18 = arith.constant 0 : index
      %26 = arith.index_cast %25 : i32 to index
      %c0_19 = arith.constant 0 : index
      %27 = vector.load %arg1[%c0_18, %26, %c0_19] : memref<1x81x32xf32, #tpu.memory_space<vmem>>, vector<1x6x32xf32>
      %28 = vector.shape_cast %27 : vector<1x6x32xf32> to vector<6x32xf32>
      %29 = arith.truncf %28 : vector<6x32xf32> to vector<6x32xbf16>
      %c64 = arith.constant 64 : index
      %c0_20 = arith.constant 0 : index
      %30 = vector.load %arg2[%c64, %c0_20] : memref<512x1xbf16, #tpu.memory_space<vmem>>, vector<32x1xbf16>
      %cst_21 = arith.constant dense<0.000000e+00> : vector<6x1xf32>
      %31 = tpu.matmul %29, %30, %cst_21 {dimension_numbers = #tpu.dot_dimension_numbers<[1], [0], [0], [1], [0, 0, 1, 1], [], []>} : vector<6x32xbf16>, vector<32x1xbf16>, vector<6x1xf32> -> vector<6x1xf32>
      %32 = arith.addf %22, %31 : vector<6x1xf32>
      %c0_i32_22 = arith.constant 0 : i32
      %33 = arith.addi %arg5, %c0_i32_22 : i32
      %c9_i32_23 = arith.constant 9 : i32
      %34 = arith.muli %33, %c9_i32_23 : i32
      %c3_i32 = arith.constant 3 : i32
      %35 = arith.addi %34, %c3_i32 : i32
      %c0_24 = arith.constant 0 : index
      %36 = arith.index_cast %35 : i32 to index
      %c0_25 = arith.constant 0 : index
      %37 = vector.load %arg1[%c0_24, %36, %c0_25] : memref<1x81x32xf32, #tpu.memory_space<vmem>>, vector<1x6x32xf32>
      %38 = vector.shape_cast %37 : vector<1x6x32xf32> to vector<6x32xf32>
      %39 = arith.truncf %38 : vector<6x32xf32> to vector<6x32xbf16>
      %c96 = arith.constant 96 : index
      %c0_26 = arith.constant 0 : index
      %40 = vector.load %arg2[%c96, %c0_26] : memref<512x1xbf16, #tpu.memory_space<vmem>>, vector<32x1xbf16>
      %cst_27 = arith.constant dense<0.000000e+00> : vector<6x1xf32>
      %41 = tpu.matmul %39, %40, %cst_27 {dimension_numbers = #tpu.dot_dimension_numbers<[1], [0], [0], [1], [0, 0, 1, 1], [], []>} : vector<6x32xbf16>, vector<32x1xbf16>, vector<6x1xf32> -> vector<6x1xf32>
      %42 = arith.addf %32, %41 : vector<6x1xf32>
      %c1_i32_28 = arith.constant 1 : i32
      %43 = arith.addi %arg5, %c1_i32_28 : i32
      %c9_i32_29 = arith.constant 9 : i32
      %44 = arith.muli %43, %c9_i32_29 : i32
      %c0_i32_30 = arith.constant 0 : i32
      %45 = arith.addi %44, %c0_i32_30 : i32
      %c0_31 = arith.constant 0 : index
      %46 = arith.index_cast %45 : i32 to index
      %c0_32 = arith.constant 0 : index
      %47 = vector.load %arg1[%c0_31, %46, %c0_32] : memref<1x81x32xf32, #tpu.memory_space<vmem>>, vector<1x6x32xf32>
      %48 = vector.shape_cast %47 : vector<1x6x32xf32> to vector<6x32xf32>
      %49 = arith.truncf %48 : vector<6x32xf32> to vector<6x32xbf16>
      %c128 = arith.constant 128 : index
      %c0_33 = arith.constant 0 : index
      %50 = vector.load %arg2[%c128, %c0_33] : memref<512x1xbf16, #tpu.memory_space<vmem>>, vector<32x1xbf16>
      %cst_34 = arith.constant dense<0.000000e+00> : vector<6x1xf32>
      %51 = tpu.matmul %49, %50, %cst_34 {dimension_numbers = #tpu.dot_dimension_numbers<[1], [0], [0], [1], [0, 0, 1, 1], [], []>} : vector<6x32xbf16>, vector<32x1xbf16>, vector<6x1xf32> -> vector<6x1xf32>
      %52 = arith.addf %42, %51 : vector<6x1xf32>
      %c1_i32_35 = arith.constant 1 : i32
      %53 = arith.addi %arg5, %c1_i32_35 : i32
      %c9_i32_36 = arith.constant 9 : i32
      %54 = arith.muli %53, %c9_i32_36 : i32
      %c1_i32_37 = arith.constant 1 : i32
      %55 = arith.addi %54, %c1_i32_37 : i32
      %c0_38 = arith.constant 0 : index
      %56 = arith.index_cast %55 : i32 to index
      %c0_39 = arith.constant 0 : index
      %57 = vector.load %arg1[%c0_38, %56, %c0_39] : memref<1x81x32xf32, #tpu.memory_space<vmem>>, vector<1x6x32xf32>
      %58 = vector.shape_cast %57 : vector<1x6x32xf32> to vector<6x32xf32>
      %59 = arith.truncf %58 : vector<6x32xf32> to vector<6x32xbf16>
      %c160 = arith.constant 160 : index
      %c0_40 = arith.constant 0 : index
      %60 = vector.load %arg2[%c160, %c0_40] : memref<512x1xbf16, #tpu.memory_space<vmem>>, vector<32x1xbf16>
      %cst_41 = arith.constant dense<0.000000e+00> : vector<6x1xf32>
      %61 = tpu.matmul %59, %60, %cst_41 {dimension_numbers = #tpu.dot_dimension_numbers<[1], [0], [0], [1], [0, 0, 1, 1], [], []>} : vector<6x32xbf16>, vector<32x1xbf16>, vector<6x1xf32> -> vector<6x1xf32>
      %62 = arith.addf %52, %61 : vector<6x1xf32>
      %c1_i32_42 = arith.constant 1 : i32
      %63 = arith.addi %arg5, %c1_i32_42 : i32
      %c9_i32_43 = arith.constant 9 : i32
      %64 = arith.muli %63, %c9_i32_43 : i32
      %c2_i32_44 = arith.constant 2 : i32
      %65 = arith.addi %64, %c2_i32_44 : i32
      %c0_45 = arith.constant 0 : index
      %66 = arith.index_cast %65 : i32 to index
      %c0_46 = arith.constant 0 : index
      %67 = vector.load %arg1[%c0_45, %66, %c0_46] : memref<1x81x32xf32, #tpu.memory_space<vmem>>, vector<1x6x32xf32>
      %68 = vector.shape_cast %67 : vector<1x6x32xf32> to vector<6x32xf32>
      %69 = arith.truncf %68 : vector<6x32xf32> to vector<6x32xbf16>
      %c192 = arith.constant 192 : index
      %c0_47 = arith.constant 0 : index
      %70 = vector.load %arg2[%c192, %c0_47] : memref<512x1xbf16, #tpu.memory_space<vmem>>, vector<32x1xbf16>
      %cst_48 = arith.constant dense<0.000000e+00> : vector<6x1xf32>
      %71 = tpu.matmul %69, %70, %cst_48 {dimension_numbers = #tpu.dot_dimension_numbers<[1], [0], [0], [1], [0, 0, 1, 1], [], []>} : vector<6x32xbf16>, vector<32x1xbf16>, vector<6x1xf32> -> vector<6x1xf32>
      %72 = arith.addf %62, %71 : vector<6x1xf32>
      %c1_i32_49 = arith.constant 1 : i32
      %73 = arith.addi %arg5, %c1_i32_49 : i32
      %c9_i32_50 = arith.constant 9 : i32
      %74 = arith.muli %73, %c9_i32_50 : i32
      %c3_i32_51 = arith.constant 3 : i32
      %75 = arith.addi %74, %c3_i32_51 : i32
      %c0_52 = arith.constant 0 : index
      %76 = arith.index_cast %75 : i32 to index
      %c0_53 = arith.constant 0 : index
      %77 = vector.load %arg1[%c0_52, %76, %c0_53] : memref<1x81x32xf32, #tpu.memory_space<vmem>>, vector<1x6x32xf32>
      %78 = vector.shape_cast %77 : vector<1x6x32xf32> to vector<6x32xf32>
      %79 = arith.truncf %78 : vector<6x32xf32> to vector<6x32xbf16>
      %c224 = arith.constant 224 : index
      %c0_54 = arith.constant 0 : index
      %80 = vector.load %arg2[%c224, %c0_54] : memref<512x1xbf16, #tpu.memory_space<vmem>>, vector<32x1xbf16>
      %cst_55 = arith.constant dense<0.000000e+00> : vector<6x1xf32>
      %81 = tpu.matmul %79, %80, %cst_55 {dimension_numbers = #tpu.dot_dimension_numbers<[1], [0], [0], [1], [0, 0, 1, 1], [], []>} : vector<6x32xbf16>, vector<32x1xbf16>, vector<6x1xf32> -> vector<6x1xf32>
      %82 = arith.addf %72, %81 : vector<6x1xf32>
      %c2_i32_56 = arith.constant 2 : i32
      %83 = arith.addi %arg5, %c2_i32_56 : i32
      %c9_i32_57 = arith.constant 9 : i32
      %84 = arith.muli %83, %c9_i32_57 : i32
      %c0_i32_58 = arith.constant 0 : i32
      %85 = arith.addi %84, %c0_i32_58 : i32
      %c0_59 = arith.constant 0 : index
      %86 = arith.index_cast %85 : i32 to index
      %c0_60 = arith.constant 0 : index
      %87 = vector.load %arg1[%c0_59, %86, %c0_60] : memref<1x81x32xf32, #tpu.memory_space<vmem>>, vector<1x6x32xf32>
      %88 = vector.shape_cast %87 : vector<1x6x32xf32> to vector<6x32xf32>
      %89 = arith.truncf %88 : vector<6x32xf32> to vector<6x32xbf16>
      %c256 = arith.constant 256 : index
      %c0_61 = arith.constant 0 : index
      %90 = vector.load %arg2[%c256, %c0_61] : memref<512x1xbf16, #tpu.memory_space<vmem>>, vector<32x1xbf16>
      %cst_62 = arith.constant dense<0.000000e+00> : vector<6x1xf32>
      %91 = tpu.matmul %89, %90, %cst_62 {dimension_numbers = #tpu.dot_dimension_numbers<[1], [0], [0], [1], [0, 0, 1, 1], [], []>} : vector<6x32xbf16>, vector<32x1xbf16>, vector<6x1xf32> -> vector<6x1xf32>
      %92 = arith.addf %82, %91 : vector<6x1xf32>
      %c2_i32_63 = arith.constant 2 : i32
      %93 = arith.addi %arg5, %c2_i32_63 : i32
      %c9_i32_64 = arith.constant 9 : i32
      %94 = arith.muli %93, %c9_i32_64 : i32
      %c1_i32_65 = arith.constant 1 : i32
      %95 = arith.addi %94, %c1_i32_65 : i32
      %c0_66 = arith.constant 0 : index
      %96 = arith.index_cast %95 : i32 to index
      %c0_67 = arith.constant 0 : index
      %97 = vector.load %arg1[%c0_66, %96, %c0_67] : memref<1x81x32xf32, #tpu.memory_space<vmem>>, vector<1x6x32xf32>
      %98 = vector.shape_cast %97 : vector<1x6x32xf32> to vector<6x32xf32>
      %99 = arith.truncf %98 : vector<6x32xf32> to vector<6x32xbf16>
      %c288 = arith.constant 288 : index
      %c0_68 = arith.constant 0 : index
      %100 = vector.load %arg2[%c288, %c0_68] : memref<512x1xbf16, #tpu.memory_space<vmem>>, vector<32x1xbf16>
      %cst_69 = arith.constant dense<0.000000e+00> : vector<6x1xf32>
      %101 = tpu.matmul %99, %100, %cst_69 {dimension_numbers = #tpu.dot_dimension_numbers<[1], [0], [0], [1], [0, 0, 1, 1], [], []>} : vector<6x32xbf16>, vector<32x1xbf16>, vector<6x1xf32> -> vector<6x1xf32>
      %102 = arith.addf %92, %101 : vector<6x1xf32>
      %c2_i32_70 = arith.constant 2 : i32
      %103 = arith.addi %arg5, %c2_i32_70 : i32
      %c9_i32_71 = arith.constant 9 : i32
      %104 = arith.muli %103, %c9_i32_71 : i32
      %c2_i32_72 = arith.constant 2 : i32
      %105 = arith.addi %104, %c2_i32_72 : i32
      %c0_73 = arith.constant 0 : index
      %106 = arith.index_cast %105 : i32 to index
      %c0_74 = arith.constant 0 : index
      %107 = vector.load %arg1[%c0_73, %106, %c0_74] : memref<1x81x32xf32, #tpu.memory_space<vmem>>, vector<1x6x32xf32>
      %108 = vector.shape_cast %107 : vector<1x6x32xf32> to vector<6x32xf32>
      %109 = arith.truncf %108 : vector<6x32xf32> to vector<6x32xbf16>
      %c320 = arith.constant 320 : index
      %c0_75 = arith.constant 0 : index
      %110 = vector.load %arg2[%c320, %c0_75] : memref<512x1xbf16, #tpu.memory_space<vmem>>, vector<32x1xbf16>
      %cst_76 = arith.constant dense<0.000000e+00> : vector<6x1xf32>
      %111 = tpu.matmul %109, %110, %cst_76 {dimension_numbers = #tpu.dot_dimension_numbers<[1], [0], [0], [1], [0, 0, 1, 1], [], []>} : vector<6x32xbf16>, vector<32x1xbf16>, vector<6x1xf32> -> vector<6x1xf32>
      %112 = arith.addf %102, %111 : vector<6x1xf32>
      %c2_i32_77 = arith.constant 2 : i32
      %113 = arith.addi %arg5, %c2_i32_77 : i32
      %c9_i32_78 = arith.constant 9 : i32
      %114 = arith.muli %113, %c9_i32_78 : i32
      %c3_i32_79 = arith.constant 3 : i32
      %115 = arith.addi %114, %c3_i32_79 : i32
      %c0_80 = arith.constant 0 : index
      %116 = arith.index_cast %115 : i32 to index
      %c0_81 = arith.constant 0 : index
      %117 = vector.load %arg1[%c0_80, %116, %c0_81] : memref<1x81x32xf32, #tpu.memory_space<vmem>>, vector<1x6x32xf32>
      %118 = vector.shape_cast %117 : vector<1x6x32xf32> to vector<6x32xf32>
      %119 = arith.truncf %118 : vector<6x32xf32> to vector<6x32xbf16>
      %c352 = arith.constant 352 : index
      %c0_82 = arith.constant 0 : index
      %120 = vector.load %arg2[%c352, %c0_82] : memref<512x1xbf16, #tpu.memory_space<vmem>>, vector<32x1xbf16>
      %cst_83 = arith.constant dense<0.000000e+00> : vector<6x1xf32>
      %121 = tpu.matmul %119, %120, %cst_83 {dimension_numbers = #tpu.dot_dimension_numbers<[1], [0], [0], [1], [0, 0, 1, 1], [], []>} : vector<6x32xbf16>, vector<32x1xbf16>, vector<6x1xf32> -> vector<6x1xf32>
      %122 = arith.addf %112, %121 : vector<6x1xf32>
      %c3_i32_84 = arith.constant 3 : i32
      %123 = arith.addi %arg5, %c3_i32_84 : i32
      %c9_i32_85 = arith.constant 9 : i32
      %124 = arith.muli %123, %c9_i32_85 : i32
      %c0_i32_86 = arith.constant 0 : i32
      %125 = arith.addi %124, %c0_i32_86 : i32
      %c0_87 = arith.constant 0 : index
      %126 = arith.index_cast %125 : i32 to index
      %c0_88 = arith.constant 0 : index
      %127 = vector.load %arg1[%c0_87, %126, %c0_88] : memref<1x81x32xf32, #tpu.memory_space<vmem>>, vector<1x6x32xf32>
      %128 = vector.shape_cast %127 : vector<1x6x32xf32> to vector<6x32xf32>
      %129 = arith.truncf %128 : vector<6x32xf32> to vector<6x32xbf16>
      %c384 = arith.constant 384 : index
      %c0_89 = arith.constant 0 : index
      %130 = vector.load %arg2[%c384, %c0_89] : memref<512x1xbf16, #tpu.memory_space<vmem>>, vector<32x1xbf16>
      %cst_90 = arith.constant dense<0.000000e+00> : vector<6x1xf32>
      %131 = tpu.matmul %129, %130, %cst_90 {dimension_numbers = #tpu.dot_dimension_numbers<[1], [0], [0], [1], [0, 0, 1, 1], [], []>} : vector<6x32xbf16>, vector<32x1xbf16>, vector<6x1xf32> -> vector<6x1xf32>
      %132 = arith.addf %122, %131 : vector<6x1xf32>
      %c3_i32_91 = arith.constant 3 : i32
      %133 = arith.addi %arg5, %c3_i32_91 : i32
      %c9_i32_92 = arith.constant 9 : i32
      %134 = arith.muli %133, %c9_i32_92 : i32
      %c1_i32_93 = arith.constant 1 : i32
      %135 = arith.addi %134, %c1_i32_93 : i32
      %c0_94 = arith.constant 0 : index
      %136 = arith.index_cast %135 : i32 to index
      %c0_95 = arith.constant 0 : index
      %137 = vector.load %arg1[%c0_94, %136, %c0_95] : memref<1x81x32xf32, #tpu.memory_space<vmem>>, vector<1x6x32xf32>
      %138 = vector.shape_cast %137 : vector<1x6x32xf32> to vector<6x32xf32>
      %139 = arith.truncf %138 : vector<6x32xf32> to vector<6x32xbf16>
      %c416 = arith.constant 416 : index
      %c0_96 = arith.constant 0 : index
      %140 = vector.load %arg2[%c416, %c0_96] : memref<512x1xbf16, #tpu.memory_space<vmem>>, vector<32x1xbf16>
      %cst_97 = arith.constant dense<0.000000e+00> : vector<6x1xf32>
      %141 = tpu.matmul %139, %140, %cst_97 {dimension_numbers = #tpu.dot_dimension_numbers<[1], [0], [0], [1], [0, 0, 1, 1], [], []>} : vector<6x32xbf16>, vector<32x1xbf16>, vector<6x1xf32> -> vector<6x1xf32>
      %142 = arith.addf %132, %141 : vector<6x1xf32>
      %c3_i32_98 = arith.constant 3 : i32
      %143 = arith.addi %arg5, %c3_i32_98 : i32
      %c9_i32_99 = arith.constant 9 : i32
      %144 = arith.muli %143, %c9_i32_99 : i32
      %c2_i32_100 = arith.constant 2 : i32
      %145 = arith.addi %144, %c2_i32_100 : i32
      %c0_101 = arith.constant 0 : index
      %146 = arith.index_cast %145 : i32 to index
      %c0_102 = arith.constant 0 : index
      %147 = vector.load %arg1[%c0_101, %146, %c0_102] : memref<1x81x32xf32, #tpu.memory_space<vmem>>, vector<1x6x32xf32>
      %148 = vector.shape_cast %147 : vector<1x6x32xf32> to vector<6x32xf32>
      %149 = arith.truncf %148 : vector<6x32xf32> to vector<6x32xbf16>
      %c448 = arith.constant 448 : index
      %c0_103 = arith.constant 0 : index
      %150 = vector.load %arg2[%c448, %c0_103] : memref<512x1xbf16, #tpu.memory_space<vmem>>, vector<32x1xbf16>
      %cst_104 = arith.constant dense<0.000000e+00> : vector<6x1xf32>
      %151 = tpu.matmul %149, %150, %cst_104 {dimension_numbers = #tpu.dot_dimension_numbers<[1], [0], [0], [1], [0, 0, 1, 1], [], []>} : vector<6x32xbf16>, vector<32x1xbf16>, vector<6x1xf32> -> vector<6x1xf32>
      %152 = arith.addf %142, %151 : vector<6x1xf32>
      %c3_i32_105 = arith.constant 3 : i32
      %153 = arith.addi %arg5, %c3_i32_105 : i32
      %c9_i32_106 = arith.constant 9 : i32
      %154 = arith.muli %153, %c9_i32_106 : i32
      %c3_i32_107 = arith.constant 3 : i32
      %155 = arith.addi %154, %c3_i32_107 : i32
      %c0_108 = arith.constant 0 : index
      %156 = arith.index_cast %155 : i32 to index
      %c0_109 = arith.constant 0 : index
      %157 = vector.load %arg1[%c0_108, %156, %c0_109] : memref<1x81x32xf32, #tpu.memory_space<vmem>>, vector<1x6x32xf32>
      %158 = vector.shape_cast %157 : vector<1x6x32xf32> to vector<6x32xf32>
      %159 = arith.truncf %158 : vector<6x32xf32> to vector<6x32xbf16>
      %c480 = arith.constant 480 : index
      %c0_110 = arith.constant 0 : index
      %160 = vector.load %arg2[%c480, %c0_110] : memref<512x1xbf16, #tpu.memory_space<vmem>>, vector<32x1xbf16>
      %cst_111 = arith.constant dense<0.000000e+00> : vector<6x1xf32>
      %161 = tpu.matmul %159, %160, %cst_111 {dimension_numbers = #tpu.dot_dimension_numbers<[1], [0], [0], [1], [0, 0, 1, 1], [], []>} : vector<6x32xbf16>, vector<32x1xbf16>, vector<6x1xf32> -> vector<6x1xf32>
      %162 = arith.addf %152, %161 : vector<6x1xf32>
      %163 = vector.broadcast %0 : vector<1x1xf32> to vector<6x1xf32>
      %164 = arith.addf %162, %163 : vector<6x1xf32>
      %c6_i32_112 = arith.constant 6 : i32
      %165 = arith.muli %arg5, %c6_i32_112 : i32
      %c0_113 = arith.constant 0 : index
      %166 = arith.index_cast %165 : i32 to index
      %c0_114 = arith.constant 0 : index
      %167 = vector.load %arg4[%c0_113, %166, %c0_114] : memref<1x36x1xf32, #tpu.memory_space<vmem>>, vector<1x6x1xf32>
      %168 = vector.shape_cast %167 : vector<1x6x1xf32> to vector<6x1xf32>
      %169 = vector.shape_cast %164 : vector<6x1xf32> to vector<1x6x1xf32>
      tpu.vector_store %arg4[%c0_113, %166, %c0_114], %169 {strides = array<i32>} : memref<1x36x1xf32, #tpu.memory_space<vmem>>, vector<1x6x1xf32>,
    }
    %c6_i32_1 = arith.constant 6 : i32
    return
  }
  func.func @transform_0(%arg0: i32) -> (i32, i32, i32) {
    %c0_i32 = arith.constant 0 : i32
    %c0_i32_0 = arith.constant 0 : i32
    %c0_i32_1 = arith.constant 0 : i32
    return %arg0, %c0_i32, %c0_i32_0 : i32, i32, i32
  }
  func.func @transform_1(%arg0: i32) -> (i32, i32) {
    %c0_i32 = arith.constant 0 : i32
    %c0_i32_0 = arith.constant 0 : i32
    %c0_i32_1 = arith.constant 0 : i32
    return %c0_i32, %c0_i32_0 : i32, i32
  }
  func.func @transform_2(%arg0: i32) -> (i32, i32) {
    %c0_i32 = arith.constant 0 : i32
    %c0_i32_0 = arith.constant 0 : i32
    %c0_i32_1 = arith.constant 0 : i32
    return %c0_i32, %c0_i32_0 : i32, i32
  }
  func.func @transform_3(%arg0: i32) -> (i32, i32, i32) {
    %c0_i32 = arith.constant 0 : i32
    %c0_i32_0 = arith.constant 0 : i32
    %c0_i32_1 = arith.constant 0 : i32
    return %arg0, %c0_i32, %c0_i32_0 : i32, i32, i32
  }
}

module attributes {stable_mosaic.version = 11 : i64} {
  func.func @_head_kernel(%arg0: i32, %arg1: memref<1x36x1xf32, #tpu.memory_space<vmem>>, %arg2: memref<12xf32, #tpu.memory_space<smem>>, %arg3: memref<1x16x1xf32, #tpu.memory_space<vmem>>, %arg4: memref<1x16x1xf32, #tpu.memory_space<vmem>>) attributes {dimension_semantics = [#tpu.dimension_semantics<parallel>], iteration_bounds = array<i64: 2>, scalar_prefetch = 0 : i64, scratch_operands = 0 : i64, tpu.core_type = #tpu.core_type<tc>, window_params = [{transform_indices = @transform_0, window_bounds = array<i64: 1, 36, 1>}, {transform_indices = @transform_1, window_bounds = array<i64: 12>}, {transform_indices = @transform_2, window_bounds = array<i64: 1, 16, 1>}, {transform_indices = @transform_3, window_bounds = array<i64: 1, 16, 1>}]} {
    %c0_i32 = arith.constant 0 : i32
    %c4_i32 = arith.constant 4 : i32
    %0 = arith.addi %c0_i32, %c4_i32 : i32
    %c1_i32 = arith.constant 1 : i32
    scf.for %arg5 = %c0_i32 to %0 step %c1_i32  : i32 {
      %cst = arith.constant 0.000000e+00 : f32
      %1 = vector.broadcast %cst : f32 to vector<4x1xf32>
      %c0_i32_1 = arith.constant 0 : i32
      %2 = arith.addi %arg5, %c0_i32_1 : i32
      %c6_i32 = arith.constant 6 : i32
      %3 = arith.muli %2, %c6_i32 : i32
      %c0_i32_2 = arith.constant 0 : i32
      %4 = arith.addi %3, %c0_i32_2 : i32
      %c0 = arith.constant 0 : index
      %5 = arith.index_cast %4 : i32 to index
      %c0_3 = arith.constant 0 : index
      %6 = vector.load %arg1[%c0, %5, %c0_3] : memref<1x36x1xf32, #tpu.memory_space<vmem>>, vector<1x4x1xf32>
      %7 = vector.shape_cast %6 : vector<1x4x1xf32> to vector<4x1xf32>
      %c0_4 = arith.constant 0 : index
      %8 = memref.load %arg2[%c0_4] : memref<12xf32, #tpu.memory_space<smem>>
      %9 = vector.broadcast %8 : f32 to vector<4x1xf32>
      %10 = arith.mulf %7, %9 : vector<4x1xf32>
      %11 = arith.addf %1, %10 : vector<4x1xf32>
      %c0_i32_5 = arith.constant 0 : i32
      %12 = arith.addi %arg5, %c0_i32_5 : i32
      %c6_i32_6 = arith.constant 6 : i32
      %13 = arith.muli %12, %c6_i32_6 : i32
      %c1_i32_7 = arith.constant 1 : i32
      %14 = arith.addi %13, %c1_i32_7 : i32
      %c0_8 = arith.constant 0 : index
      %15 = arith.index_cast %14 : i32 to index
      %c0_9 = arith.constant 0 : index
      %16 = vector.load %arg1[%c0_8, %15, %c0_9] : memref<1x36x1xf32, #tpu.memory_space<vmem>>, vector<1x4x1xf32>
      %17 = vector.shape_cast %16 : vector<1x4x1xf32> to vector<4x1xf32>
      %c1 = arith.constant 1 : index
      %18 = memref.load %arg2[%c1] : memref<12xf32, #tpu.memory_space<smem>>
      %19 = vector.broadcast %18 : f32 to vector<4x1xf32>
      %20 = arith.mulf %17, %19 : vector<4x1xf32>
      %21 = arith.addf %11, %20 : vector<4x1xf32>
      %c0_i32_10 = arith.constant 0 : i32
      %22 = arith.addi %arg5, %c0_i32_10 : i32
      %c6_i32_11 = arith.constant 6 : i32
      %23 = arith.muli %22, %c6_i32_11 : i32
      %c2_i32 = arith.constant 2 : i32
      %24 = arith.addi %23, %c2_i32 : i32
      %c0_12 = arith.constant 0 : index
      %25 = arith.index_cast %24 : i32 to index
      %c0_13 = arith.constant 0 : index
      %26 = vector.load %arg1[%c0_12, %25, %c0_13] : memref<1x36x1xf32, #tpu.memory_space<vmem>>, vector<1x4x1xf32>
      %27 = vector.shape_cast %26 : vector<1x4x1xf32> to vector<4x1xf32>
      %c2 = arith.constant 2 : index
      %28 = memref.load %arg2[%c2] : memref<12xf32, #tpu.memory_space<smem>>
      %29 = vector.broadcast %28 : f32 to vector<4x1xf32>
      %30 = arith.mulf %27, %29 : vector<4x1xf32>
      %31 = arith.addf %21, %30 : vector<4x1xf32>
      %c1_i32_14 = arith.constant 1 : i32
      %32 = arith.addi %arg5, %c1_i32_14 : i32
      %c6_i32_15 = arith.constant 6 : i32
      %33 = arith.muli %32, %c6_i32_15 : i32
      %c0_i32_16 = arith.constant 0 : i32
      %34 = arith.addi %33, %c0_i32_16 : i32
      %c0_17 = arith.constant 0 : index
      %35 = arith.index_cast %34 : i32 to index
      %c0_18 = arith.constant 0 : index
      %36 = vector.load %arg1[%c0_17, %35, %c0_18] : memref<1x36x1xf32, #tpu.memory_space<vmem>>, vector<1x4x1xf32>
      %37 = vector.shape_cast %36 : vector<1x4x1xf32> to vector<4x1xf32>
      %c3 = arith.constant 3 : index
      %38 = memref.load %arg2[%c3] : memref<12xf32, #tpu.memory_space<smem>>
      %39 = vector.broadcast %38 : f32 to vector<4x1xf32>
      %40 = arith.mulf %37, %39 : vector<4x1xf32>
      %41 = arith.addf %31, %40 : vector<4x1xf32>
      %c1_i32_19 = arith.constant 1 : i32
      %42 = arith.addi %arg5, %c1_i32_19 : i32
      %c6_i32_20 = arith.constant 6 : i32
      %43 = arith.muli %42, %c6_i32_20 : i32
      %c1_i32_21 = arith.constant 1 : i32
      %44 = arith.addi %43, %c1_i32_21 : i32
      %c0_22 = arith.constant 0 : index
      %45 = arith.index_cast %44 : i32 to index
      %c0_23 = arith.constant 0 : index
      %46 = vector.load %arg1[%c0_22, %45, %c0_23] : memref<1x36x1xf32, #tpu.memory_space<vmem>>, vector<1x4x1xf32>
      %47 = vector.shape_cast %46 : vector<1x4x1xf32> to vector<4x1xf32>
      %c4 = arith.constant 4 : index
      %48 = memref.load %arg2[%c4] : memref<12xf32, #tpu.memory_space<smem>>
      %49 = vector.broadcast %48 : f32 to vector<4x1xf32>
      %50 = arith.mulf %47, %49 : vector<4x1xf32>
      %51 = arith.addf %41, %50 : vector<4x1xf32>
      %c1_i32_24 = arith.constant 1 : i32
      %52 = arith.addi %arg5, %c1_i32_24 : i32
      %c6_i32_25 = arith.constant 6 : i32
      %53 = arith.muli %52, %c6_i32_25 : i32
      %c2_i32_26 = arith.constant 2 : i32
      %54 = arith.addi %53, %c2_i32_26 : i32
      %c0_27 = arith.constant 0 : index
      %55 = arith.index_cast %54 : i32 to index
      %c0_28 = arith.constant 0 : index
      %56 = vector.load %arg1[%c0_27, %55, %c0_28] : memref<1x36x1xf32, #tpu.memory_space<vmem>>, vector<1x4x1xf32>
      %57 = vector.shape_cast %56 : vector<1x4x1xf32> to vector<4x1xf32>
      %c5 = arith.constant 5 : index
      %58 = memref.load %arg2[%c5] : memref<12xf32, #tpu.memory_space<smem>>
      %59 = vector.broadcast %58 : f32 to vector<4x1xf32>
      %60 = arith.mulf %57, %59 : vector<4x1xf32>
      %61 = arith.addf %51, %60 : vector<4x1xf32>
      %c2_i32_29 = arith.constant 2 : i32
      %62 = arith.addi %arg5, %c2_i32_29 : i32
      %c6_i32_30 = arith.constant 6 : i32
      %63 = arith.muli %62, %c6_i32_30 : i32
      %c0_i32_31 = arith.constant 0 : i32
      %64 = arith.addi %63, %c0_i32_31 : i32
      %c0_32 = arith.constant 0 : index
      %65 = arith.index_cast %64 : i32 to index
      %c0_33 = arith.constant 0 : index
      %66 = vector.load %arg1[%c0_32, %65, %c0_33] : memref<1x36x1xf32, #tpu.memory_space<vmem>>, vector<1x4x1xf32>
      %67 = vector.shape_cast %66 : vector<1x4x1xf32> to vector<4x1xf32>
      %c6 = arith.constant 6 : index
      %68 = memref.load %arg2[%c6] : memref<12xf32, #tpu.memory_space<smem>>
      %69 = vector.broadcast %68 : f32 to vector<4x1xf32>
      %70 = arith.mulf %67, %69 : vector<4x1xf32>
      %71 = arith.addf %61, %70 : vector<4x1xf32>
      %c2_i32_34 = arith.constant 2 : i32
      %72 = arith.addi %arg5, %c2_i32_34 : i32
      %c6_i32_35 = arith.constant 6 : i32
      %73 = arith.muli %72, %c6_i32_35 : i32
      %c1_i32_36 = arith.constant 1 : i32
      %74 = arith.addi %73, %c1_i32_36 : i32
      %c0_37 = arith.constant 0 : index
      %75 = arith.index_cast %74 : i32 to index
      %c0_38 = arith.constant 0 : index
      %76 = vector.load %arg1[%c0_37, %75, %c0_38] : memref<1x36x1xf32, #tpu.memory_space<vmem>>, vector<1x4x1xf32>
      %77 = vector.shape_cast %76 : vector<1x4x1xf32> to vector<4x1xf32>
      %c7 = arith.constant 7 : index
      %78 = memref.load %arg2[%c7] : memref<12xf32, #tpu.memory_space<smem>>
      %79 = vector.broadcast %78 : f32 to vector<4x1xf32>
      %80 = arith.mulf %77, %79 : vector<4x1xf32>
      %81 = arith.addf %71, %80 : vector<4x1xf32>
      %c2_i32_39 = arith.constant 2 : i32
      %82 = arith.addi %arg5, %c2_i32_39 : i32
      %c6_i32_40 = arith.constant 6 : i32
      %83 = arith.muli %82, %c6_i32_40 : i32
      %c2_i32_41 = arith.constant 2 : i32
      %84 = arith.addi %83, %c2_i32_41 : i32
      %c0_42 = arith.constant 0 : index
      %85 = arith.index_cast %84 : i32 to index
      %c0_43 = arith.constant 0 : index
      %86 = vector.load %arg1[%c0_42, %85, %c0_43] : memref<1x36x1xf32, #tpu.memory_space<vmem>>, vector<1x4x1xf32>
      %87 = vector.shape_cast %86 : vector<1x4x1xf32> to vector<4x1xf32>
      %c8 = arith.constant 8 : index
      %88 = memref.load %arg2[%c8] : memref<12xf32, #tpu.memory_space<smem>>
      %89 = vector.broadcast %88 : f32 to vector<4x1xf32>
      %90 = arith.mulf %87, %89 : vector<4x1xf32>
      %91 = arith.addf %81, %90 : vector<4x1xf32>
      %c9 = arith.constant 9 : index
      %92 = memref.load %arg2[%c9] : memref<12xf32, #tpu.memory_space<smem>>
      %93 = vector.broadcast %92 : f32 to vector<4x1xf32>
      %94 = arith.addf %91, %93 : vector<4x1xf32>
      %c4_i32_44 = arith.constant 4 : i32
      %95 = arith.muli %arg5, %c4_i32_44 : i32
      %c0_45 = arith.constant 0 : index
      %96 = arith.index_cast %95 : i32 to index
      %c0_46 = arith.constant 0 : index
      %97 = vector.load %arg3[%c0_45, %96, %c0_46] : memref<1x16x1xf32, #tpu.memory_space<vmem>>, vector<1x4x1xf32>
      %98 = vector.shape_cast %97 : vector<1x4x1xf32> to vector<4x1xf32>
      %99 = vector.shape_cast %94 : vector<4x1xf32> to vector<1x4x1xf32>
      tpu.vector_store %arg3[%c0_45, %96, %c0_46], %99 {strides = array<i32>} : memref<1x16x1xf32, #tpu.memory_space<vmem>>, vector<1x4x1xf32>,
      %cst_47 = arith.constant 0.000000e+00 : f32
      %100 = vector.broadcast %cst_47 : f32 to vector<4x1xf32>
      %101 = arith.cmpf oge, %94, %100 : vector<4x1xf32>
      %cst_48 = arith.constant 2.000000e-01 : f32
      %102 = vector.broadcast %cst_48 : f32 to vector<4x1xf32>
      %103 = arith.mulf %102, %94 : vector<4x1xf32>
      %104 = arith.select %101, %94, %103 : vector<4x1xi1>, vector<4x1xf32>
      %c10 = arith.constant 10 : index
      %105 = memref.load %arg2[%c10] : memref<12xf32, #tpu.memory_space<smem>>
      %106 = vector.broadcast %105 : f32 to vector<4x1xf32>
      %107 = arith.mulf %104, %106 : vector<4x1xf32>
      %c11 = arith.constant 11 : index
      %108 = memref.load %arg2[%c11] : memref<12xf32, #tpu.memory_space<smem>>
      %109 = vector.broadcast %108 : f32 to vector<4x1xf32>
      %110 = arith.addf %107, %109 : vector<4x1xf32>
      %cst_49 = arith.constant 0.000000e+00 : f32
      %111 = vector.broadcast %cst_49 : f32 to vector<4x1xf32>
      %112 = arith.maximumf %110, %111 : vector<4x1xf32>
      %c4_i32_50 = arith.constant 4 : i32
      %113 = arith.muli %arg5, %c4_i32_50 : i32
      %c0_51 = arith.constant 0 : index
      %114 = arith.index_cast %113 : i32 to index
      %c0_52 = arith.constant 0 : index
      %115 = vector.load %arg4[%c0_51, %114, %c0_52] : memref<1x16x1xf32, #tpu.memory_space<vmem>>, vector<1x4x1xf32>
      %116 = vector.shape_cast %115 : vector<1x4x1xf32> to vector<4x1xf32>
      %117 = vector.shape_cast %112 : vector<4x1xf32> to vector<1x4x1xf32>
      tpu.vector_store %arg4[%c0_51, %114, %c0_52], %117 {strides = array<i32>} : memref<1x16x1xf32, #tpu.memory_space<vmem>>, vector<1x4x1xf32>,
    }
    %c4_i32_0 = arith.constant 4 : i32
    return
  }
  func.func @transform_0(%arg0: i32) -> (i32, i32, i32) {
    %c0_i32 = arith.constant 0 : i32
    %c0_i32_0 = arith.constant 0 : i32
    %c0_i32_1 = arith.constant 0 : i32
    return %arg0, %c0_i32, %c0_i32_0 : i32, i32, i32
  }
  func.func @transform_1(%arg0: i32) -> i32 {
    %c0_i32 = arith.constant 0 : i32
    %c0_i32_0 = arith.constant 0 : i32
    return %c0_i32 : i32
  }
  func.func @transform_2(%arg0: i32) -> (i32, i32, i32) {
    %c0_i32 = arith.constant 0 : i32
    %c0_i32_0 = arith.constant 0 : i32
    %c0_i32_1 = arith.constant 0 : i32
    return %arg0, %c0_i32, %c0_i32_0 : i32, i32, i32
  }
  func.func @transform_3(%arg0: i32) -> (i32, i32, i32) {
    %c0_i32 = arith.constant 0 : i32
    %c0_i32_0 = arith.constant 0 : i32
    %c0_i32_1 = arith.constant 0 : i32
    return %arg0, %c0_i32, %c0_i32_0 : i32, i32, i32
  }
}

</mosaic_0001>

<bundles_post_ra>
// kernel: anigan_discriminator_forward.7
= control target key start
LH: loop header
LB: loop body
LE: loop exit
PB: predicated region body
PF: predicated region fallthrough
CT: control target
= control target key end

     0   :  { %s701_s12 = smov 0   ;;  %s784_s0 = inlined_call_operand.vmem [shape: f32[2,324,12], index: 0, kind: input, shape index: {}]   ;;  %s785_s1 = inlined_call_operand.vmem [shape: bf16[48,8], index: 1, kind: input, shape index: {}]   ;;  %s786_s2 = inlined_call_operand.vmem [shape: f32[1,8], index: 2, kind: input, shape index: {}]   ;;  %s787_s3 = inlined_call_operand.vmem [shape: f32[2,289,8], index: 3, kind: output, shape index: {}]  }
   0x1 LB: > { %s572_s13 = sadd.s32 4294967295, %s675_s12   ;;  %p576_p0 = scmp.ge.s32.totalorder %s675_s12, 1  ;;  %s675_s12 = sphi %s701_s12, %s13_s12  }
   0x2   : > { %p137_p1 = scmp.lt.s32.totalorder %s675_s12, 3 }
   0x4   : > { %p138_p2 = pnand %p576_p0, %p137_p1 }
   0x5   : > { %p161_p3 = scmp.lt.s32.totalorder (!%p138_p2), %s572_s13, 1  ;;  %v712_v0 = vld [vmem:[%s786_s2] ss:$0 sm:$0xff] (!%p138_p2)  ;;  %s724_s24 = smov (!%p138_p2), 0  }
   0x6   : > { %141 = sbr.rel (%p138_p2) target bundleno = 258 (0x102), region = 32 }
   0xd   : > { %s789_s13 = smov (!%p161_p3, %s572_s13), 1 }
   0xe   : > { %s643_s16 = smul.u32 328, %s789_s13 }
   0xf   : > { %s644_s17 = smul.u32 296, %s789_s13 }
  0x10   : > { %s717_s20 = scalar_lea.vmem %s784_s0, %s643_s16 }
  0x11   : > { %s722_s23 = scalar_lea.vmem %s787_s3, %s644_s17 }
  0x12 LB: >> { %v661_v1 = vld [vmem:[%s785_s1 + $0x4] sm:$0xfc]   ;;  %vm210_vm0 = vcmask 1045504   ;;  %v662_v3 = vld [vmem:[%s785_s1] sm:$0x3f]   ;;  %s179_s29 = smul.u32 18, %s679_s24  ;;  %s679_s24 = sphi %s724_s24, %s178_s24  }
  0x13   : >> { %v202_v2 = vrot.slane %v661_v1, 2  ;;  %v663_v4 = vld [vmem:[%s785_s1 + $0xc] sm:$0x3f]   ;;  %640 = vmatprep.subr.msk.bf16.mxu1 %vm210_vm0, %v662_v3  ;;  %v274_v6 = vsel %vm210_vm0, %v662_v3, 0  ;;  %v664_v7 = vld [vmem:[%s785_s1 + $0x10] sm:$0xfc]  }
  0x14   : >> { %s744_s5 = scalar_lea.vmem %s717_s20, %s179_s29  ;;  %622 = vmatpush3.bf16.msra.mxu1 %v274_v6  ;;  %vm203_vm1 = vcmask 97280   ;;  %v413_v15 = vrot.slane %v664_v7, 2  ;;  %v346_v19 = vsel %vm210_vm0, %v663_v4, 0  ;;  %s492_s8 = smul.u32 17, %s679_s24  ;;  %vm497_vm3 = vcmask 57344  }
  0x15   : >> { %639 = vmatprep.subr.msk.bf16.mxu0 %vm210_vm0, %v202_v2  ;;  %v212_v5 = vsel %vm210_vm0, %v202_v2, 0  ;;  %v579_v8 = vld [vmem:[%s744_s5 + $0x1] sm:$0xff]  ;;  %v580_v9 = vld [vmem:[%s744_s5 + $0x9] sm:$0xff]  ;;  %v581_v13 = vld [vmem:[%s744_s5 + $0x11] sm:$0x1]  ;;  %vm494_vm5 = vcmask 64512  }
  0x16   : >> { %616 = vmatpush3.bf16.msra.mxu0 %v212_v5  ;;  %v181_v10 = vld [vmem:[%s744_s5] sm:$0xff]  ;;  %v193_v11 = vpack.c.bf16 %v580_v9, %v579_v8  ;;  %v182_v12 = vld [vmem:[%s744_s5 + $0x8] sm:$0xff]  ;;  %v183_v14 = vld [vmem:[%s744_s5 + $0x10] sm:$0x1]  ;;  %v194_v17 = vpack.c.bf16 %v581_v13, %v581_v13  ;;  %642 = vmatprep.subr.msk.bf16.mxu1 %vm210_vm0, %v413_v15  ;;  %v421_v23 = vsel %vm210_vm0, %v413_v15, 0  ;;  %s493_s9 = scalar_lea.vmem %s722_s23, %s492_s8  ;;  %s178_s24 = sadd.s32 1, %s679_s24  }
  0x17   : >> { %641 = vmatprep.subr.msk.bf16.mxu0 %vm210_vm0, %v663_v4  ;;  %v184_v16 = vpack.c.bf16 %v182_v12, %v181_v10  ;;  %v185_v18 = vpack.c.bf16 %v183_v14, %v183_v14  ;;  %v588_v20 = vld [vmem:[%s744_s5 + $0x12] sm:$0xff]  ;;  %v589_v21 = vld [vmem:[%s744_s5 + $0x1a] sm:$0xff]  ;;  %v590_v27 = vld [vmem:[%s744_s5 + $0x22] sm:$0x1]  ;;  %p175_p4 = scmp.ge.s32.totalorder %s178_s24, 17  }
  0x18   : >> { %v594_v22 = vld [vmem:[%s744_s5 + $0x13] sm:$0xff]  ;;  %617 = vmatprep.mubr.msk.bf16.mxu0 %vm203_vm1, %v193_v11  ;;  %v330_v24 = vpack.c.bf16 %v589_v21, %v588_v20  ;;  %v595_v25 = vld [vmem:[%s744_s5 + $0x1b] sm:$0xff]  ;;  %v596_v28 = vld [vmem:[%s744_s5 + $0x23] sm:$0x1]  ;;  %v331_v29 = vpack.c.bf16 %v590_v27, %v590_v27 }
  0x19   : >> { %623 = vmatprep.mubr.msk.bf16.mxu1 %vm203_vm1, %v184_v16  ;;  %618 = vmatmul.mubr.msk.bf16.vlgmr.msra.gmra.mrb[0].mxu0 %vm203_vm1, %v194_v17  ;;  %v404_v26 = vpack.c.bf16 %v595_v25, %v594_v22  ;;  %v405_v30 = vpack.c.bf16 %v596_v28, %v596_v28 }
  0x1a   : >> { %624 = vmatmul.mubr.msk.bf16.vlgmr.msra.gmra.mrb[0].mxu1 %vm203_vm1, %v185_v18  ;;  %628 = vmatpush3.bf16.msra.mxu0 %v346_v19 }
  0x1b   : >> { %634 = vmatpush3.bf16.msra.mxu1 %v421_v23  ;;  %629 = vmatprep.mubr.msk.bf16.mxu0 %vm203_vm1, %v330_v24 }
  0x1c   : >> { %635 = vmatprep.mubr.msk.bf16.mxu1 %vm203_vm1, %v404_v26 }
  0x21   : >> { %630 = vmatmul.mubr.msk.bf16.vlgmr.msra.gmra.mrb[4].mxu0 %vm203_vm1, %v331_v29 }
  0x22   : >> { %636 = vmatmul.mubr.msk.bf16.vlgmr.msra.gmra.mrb[4].mxu1 %vm203_vm1, %v405_v30 }
  0xec   : >> { %v619_v31 = vpop.f32.mrb[0].mxu0 }
  0xed   : >> { %v625_v32 = vpop.f32.mrb[0].mxu1  ;;  %v248_v33 = vpop.f32.mrb[1].mxu0 }
  0xee   : >> { %v319_v34 = vadd.f32 %v625_v32, %v619_v31  ;;  %v310_v35 = vpop.f32.mrb[1].mxu1  ;;  %v620_v36 = vpop.f32.mrb[2].mxu0 }
  0xef   : >> { %v311_v37 = vadd.f32 %v310_v35, %v248_v33  ;;  %v626_v38 = vpop.f32.mrb[2].mxu1  ;;  %v251_v39 = vpop.f32.mrb[3].mxu0 }
  0xf0   : >> { %v313_v40 = vpop.f32.mrb[3].mxu1 }
  0xf1   : >> { %v314_v41 = vadd.f32 %v313_v40, %v251_v39 }
  0xf4   : >> { %v631_v42 = vpop.f32.mrb[4].mxu0 }
  0xf5   : >> { %v398_v43 = vadd.f32 %v631_v42, %v319_v34  ;;  %v637_v44 = vpop.f32.mrb[4].mxu1  ;;  %v382_v45 = vpop.f32.mrb[5].mxu0 }
  0xf6   : >> { %v396_v46 = vadd.f32 %v382_v45, %v311_v37  ;;  %v457_v47 = vpop.f32.mrb[5].mxu1  ;;  %v632_v48 = vpop.f32.mrb[6].mxu0 }
  0xf7   : >> { %v473_v49 = vadd.f32 %v637_v44, %v398_v43  ;;  %v638_v50 = vpop.f32.mrb[6].mxu1  ;;  %v385_v51 = vpop.f32.mrb[7].mxu0 }
  0xf8   : >> { %v471_v52 = vadd.f32 %v457_v47, %v396_v46  ;;  %v397_v53 = vadd.f32 %v385_v51, %v314_v41  ;;  %v460_v54 = vpop.f32.mrb[7].mxu1 }
  0xf9   : >> { %v482_v55 = vadd.f32 %v712_v0, %v473_v49 }
  0xfa   : >> { %v480_v56 = vadd.f32 %v712_v0, %v471_v52  ;;  %v472_v57 = vadd.f32 %v460_v54, %v397_v53 }
  0xfb   : >> { %vm485_vm2 = vcmp.ge.f32.partialorder %v482_v55, 0.0  ;;  %v488_v58 = vmul.f32 0.2, %v482_v55  ;;  %177 = sbr.rel (!%p175_p4) target bundleno = 18 (0x12), region = 74 }
  0xfc   : >> { %vm483_vm4 = vcmp.ge.f32.partialorder %v480_v56, 0.0  ;;  %v486_v59 = vmul.f32 0.2, %v480_v56  ;;  %v481_v60 = vadd.f32 %v712_v0, %v472_v57 }
  0xfd   : >> { %v491_v61 = vsel %vm485_vm2, %v482_v55, %v488_v58 }
  0xfe   : >> { %498 = vst.msk [vmem:[%s493_s9 + $0x10] sm:$0x1] %vm497_vm3, %v491_v61  ;;  %v489_v62 = vsel %vm483_vm4, %v480_v56, %v486_v59  ;;  %vm484_vm6 = vcmp.ge.f32.partialorder %v481_v60, 0.0  ;;  %v487_v63 = vmul.f32 0.2, %v481_v60 }
  0xff   : >> { %495 = vst.msk [vmem:[%s493_s9] sm:$0xff] %vm494_vm5, %v489_v62 }
 0x100   : >> { %v490_v1 = vsel %vm484_vm6, %v481_v60, %v487_v63 }
 0x101   : >> { %496 = vst.msk [vmem:[%s493_s9 + $0x8] sm:$0xff] %vm494_vm5, %v490_v1 }
 0x102 PF: > { %s13_s12 = sadd.s32 1, %s675_s12  }
 0x103   : > { %p10_p5 = scmp.ge.s32.totalorder %s13_s12, 4  }
 0x105   :  { %12 = sbr.rel (!%p10_p5) target bundleno = 1 (0x1), region = 85 }

// kernel: anigan_discriminator_forward.8
= control target key start
LH: loop header
LB: loop body
LE: loop exit
PB: predicated region body
PF: predicated region fallthrough
CT: control target
= control target key end

     0   :  { %s778_s18 = smov 0   ;;  %s873_s0 = inlined_call_operand.vmem [shape: f32[2,121,32], index: 0, kind: input, shape index: {}]   ;;  %s874_s1 = inlined_call_operand.vmem [shape: bf16[128,16], index: 1, kind: input, shape index: {}]   ;;  %s875_s2 = inlined_call_operand.vmem [shape: f32[1,16], index: 2, kind: input, shape index: {}]   ;;  %s876_s3 = inlined_call_operand.vmem [shape: f32[2,81,16], index: 3, kind: output, shape index: {0}]   ;;  %s877_s4 = inlined_call_operand.vmem [shape: f32[1,16], index: 4, kind: output, shape index: {1}]   ;;  %s878_s5 = inlined_call_operand.vmem [shape: f32[1,16], index: 5, kind: output, shape index: {2}]  }
   0x1 LB: > { %s626_s19 = sadd.s32 4294967295, %s739_s18   ;;  %p630_p0 = scmp.ge.s32.totalorder %s739_s18, 1  ;;  %s739_s18 = sphi %s778_s18, %s16_s18  }
   0x2   : > { %p182_p1 = scmp.lt.s32.totalorder %s739_s18, 3 }
   0x4   : > { %p183_p2 = pnand %p630_p0, %p182_p1 }
   0x5   : > { %p210_p3 = scmp.lt.s32.totalorder (!%p183_p2), %s626_s19, 1  ;;  %p634_p4 = scmp.ne.s32.totalorder (!%p183_p2), %s626_s19, 0 }
   0x6   : > { %186 = sbr.rel (%p183_p2) target bundleno = 279 (0x117), region = 32 }
   0xd   : > { %s211_s20 = scalar_select %p210_p3, %s626_s19, 1 }
   0xe   : > { %224 = sbr.rel (%p634_p4) target bundleno = 21 (0x15), region = 36  ;;  %vm225_vm0 = vcmask (!%p634_p4), 122880   ;;  %v745_v0 = vmov (!%p634_p4), 0.0  }
   0xf   : > { %s656_s21 = sshll.u32 %s211_s20, 7  ;;  %s701_s22 = smul.u32 88, %s211_s20  ;;  %226 = vst.msk [vmem:[%s877_s4] sm:$0x1] (!%p634_p4), %vm225_vm0, %v745_v0  ;;  %227 = vst.msk [vmem:[%s878_s5] sm:$0x1] (!%p634_p4), %vm225_vm0, %v745_v0 }
  0x10   : > { %s789_s25 = scalar_lea.vmem %s873_s0, %s656_s21 }
  0x11   : > { %s794_s28 = scalar_lea.vmem %s876_s3, %s701_s22 }
  0x15 PF: > { %v805_v1 = vld [vmem:[%s875_s2] ss:$0 sm:$0xff]  ;;  %s807_s10 = smov 0  }
  0x16 LB: >> { %v721_v2 = vld [vmem:[%s874_s1 + $0x10] sm:$0xff]   ;;  %v746_v3 = vmov 0.0   ;;  %v722_v4 = vld [vmem:[%s874_s1] sm:$0xff]   ;;  %v723_v5 = vld [vmem:[%s874_s1 + $0x18] sm:$0xff]   ;;  %vm747_vm1 = vmmov 0   ;;  %s235_s17 = smul.u32 11, %s743_s10  ;;  %s743_s10 = sphi %s807_s10, %s234_s10  }
  0x17   : >> { %669 = vmatprep.subr.bf16.mxu0 %v746_v3  ;;  %677 = vmatprep.subr.bf16.mxu1 %v746_v3  ;;  %v724_v6 = vld [vmem:[%s874_s1 + $0x8] sm:$0xff]   ;;  %v725_v7 = vld [vmem:[%s874_s1 + $0x20] sm:$0xff]   ;;  %vm265_vm2 = vcmask 261120   ;;  %v726_v14 = vld [vmem:[%s874_s1 + $0x30] sm:$0xff]   ;;  %s509_s7 = smul.u32 9, %s743_s10  ;;  %vm511_vm3 = vcmask 130048  }
  0x18   : >> { %670 = vmatpush3.bf16.msra.mxu0 %v721_v2  ;;  %673 = vmatprep.mubr.msk.bf16.mxu0 %vm747_vm1, %v746_v3  ;;  %s236_s21 = scalar_lea.vmem %s789_s25, %s235_s17  ;;  %v727_v15 = vld [vmem:[%s874_s1 + $0x28] sm:$0xff]   ;;  %v728_v18 = vld [vmem:[%s874_s1 + $0x38] sm:$0xff]   ;;  %vm513_vm4 = vcmask 122880   ;;  %v515_v0 = vld [vmem:[%s877_s4] sm:$0x1]  ;;  %s234_s10 = sadd.s32 1, %s743_s10  }
  0x19   : >> { %678 = vmatpush3.bf16.msra.mxu1 %v722_v4  ;;  %671 = vmatprep.subr.bf16.mxu0 %v746_v3  ;;  %v635_v8 = vld [vmem:[%s236_s21 + $0x1] sm:$0xff]  ;;  %v636_v9 = vld [vmem:[%s236_s21 + $0x9] sm:$0x1]  ;;  %v643_v16 = vld [vmem:[%s236_s21 + $0xb] sm:$0xff]  ;;  %s510_s8 = scalar_lea.vmem %s794_s28, %s509_s7  ;;  %p231_p5 = scmp.ge.s32.totalorder %s234_s10, 9  }
  0x1a   : >> { %679 = vmatprep.subr.bf16.mxu1 %v746_v3  ;;  %681 = vmatprep.mubr.msk.bf16.mxu1 %vm747_vm1, %v746_v3  ;;  %v237_v10 = vld [vmem:[%s236_s21] sm:$0xff]  ;;  %v248_v11 = vpack.c.bf16 %v636_v9, %v635_v8  ;;  %v238_v12 = vld [vmem:[%s236_s21 + $0x8] sm:$0x1]  ;;  %v644_v17 = vld [vmem:[%s236_s21 + $0x13] sm:$0x1] }
  0x1b   : >> { %v239_v13 = vpack.c.bf16 %v238_v12, %v237_v10  ;;  %v648_v19 = vld [vmem:[%s236_s21 + $0xc] sm:$0xff]  ;;  %v649_v20 = vld [vmem:[%s236_s21 + $0x14] sm:$0x1]  ;;  %v371_v21 = vpack.c.bf16 %v644_v17, %v643_v16  ;;  %v527_v4 = vld [vmem:[%s878_s5] sm:$0x1] }
  0x1c   : >> { %672 = vmatpush3.bf16.msra.mxu0 %v723_v5  ;;  %v438_v22 = vpack.c.bf16 %v649_v20, %v648_v19 }
  0x1d   : >> { %680 = vmatpush3.bf16.msra.mxu1 %v724_v6  ;;  %685 = vmatprep.subr.bf16.mxu0 %v746_v3 }
  0x1e   : >> { %693 = vmatprep.subr.bf16.mxu1 %v746_v3 }
  0x1f   : >> { %674 = vmatmul.mubr.msk.bf16.vlgmr.msra.gmra.mrb[0].mxu0 %vm265_vm2, %v248_v11 }
  0x20   : >> { %682 = vmatmul.mubr.msk.bf16.vlgmr.msra.gmra.mrb[0].mxu1 %vm265_vm2, %v239_v13  ;;  %686 = vmatpush3.bf16.msra.mxu0 %v725_v7 }
  0x21   : >> { %694 = vmatpush3.bf16.msra.mxu1 %v726_v14  ;;  %687 = vmatprep.subr.bf16.mxu0 %v746_v3 }
  0x22   : >> { %695 = vmatprep.subr.bf16.mxu1 %v746_v3  ;;  %689 = vmatprep.mubr.msk.bf16.mxu0 %vm747_vm1, %v746_v3 }
  0x23   : >> { %697 = vmatprep.mubr.msk.bf16.mxu1 %vm747_vm1, %v746_v3 }
  0x24   : >> { %688 = vmatpush3.bf16.msra.mxu0 %v727_v15 }
  0x25   : >> { %696 = vmatpush3.bf16.msra.mxu1 %v728_v18 }
  0x27   : >> { %690 = vmatmul.mubr.msk.bf16.vlgmr.msra.gmra.mrb[4].mxu0 %vm265_vm2, %v371_v21 }
  0x28   : >> { %698 = vmatmul.mubr.msk.bf16.vlgmr.msra.gmra.mrb[4].mxu1 %vm265_vm2, %v438_v22 }
  0xf2   : >> { %v303_v23 = vpop.f32.mrb[0].mxu0 }
  0xf3   : >> { %v359_v24 = vpop.f32.mrb[0].mxu1  ;;  %v675_v25 = vpop.f32.mrb[1].mxu0 }
  0xf4   : >> { %v360_v26 = vadd.f32 %v359_v24, %v303_v23  ;;  %v683_v27 = vpop.f32.mrb[1].mxu1  ;;  %v306_v28 = vpop.f32.mrb[2].mxu0 }
  0xf5   : >> { %v362_v29 = vpop.f32.mrb[2].mxu1  ;;  %v676_v30 = vpop.f32.mrb[3].mxu0 }
  0xf6   : >> { %v363_v31 = vadd.f32 %v362_v29, %v306_v28  ;;  %v684_v32 = vpop.f32.mrb[3].mxu1 }
  0xfa   : >> { %v425_v33 = vpop.f32.mrb[4].mxu0 }
  0xfb   : >> { %v432_v34 = vadd.f32 %v425_v33, %v360_v26  ;;  %v492_v35 = vpop.f32.mrb[4].mxu1  ;;  %v691_v36 = vpop.f32.mrb[5].mxu0 }
  0xfc   : >> { %v699_v37 = vpop.f32.mrb[5].mxu1  ;;  %v428_v38 = vpop.f32.mrb[6].mxu0 }
  0xfd   : >> { %v499_v39 = vadd.f32 %v492_v35, %v432_v34  ;;  %v433_v40 = vadd.f32 %v428_v38, %v363_v31  ;;  %v495_v41 = vpop.f32.mrb[6].mxu1  ;;  %v692_v42 = vpop.f32.mrb[7].mxu0 }
  0xfe   : >> { %v700_v43 = vpop.f32.mrb[7].mxu1 }
  0xff   : >> { %v507_v44 = vadd.f32 %v805_v1, %v499_v39  ;;  %v500_v45 = vadd.f32 %v495_v41, %v433_v40 }
 0x101   : >> { %512 = vst.msk [vmem:[%s510_s8] sm:$0xff] %vm511_vm3, %v507_v44  ;;  %v528_v46 = vmul.f32 %v507_v44, %v507_v44  ;;  %v508_v47 = vadd.f32 %v805_v1, %v500_v45  ;;  %v516_v48 = vsel %vm511_vm3, %v507_v44, 0.0 }
 0x103   : >> { %514 = vst.msk [vmem:[%s510_s8 + $0x8] sm:$0x1] %vm513_vm4, %v508_v47  ;;  %v517_v49 = vsel %vm513_vm4, %v508_v47, 0.0  ;;  %v529_v50 = vmul.f32 %v508_v47, %v508_v47  ;;  %v530_v52 = vsel %vm511_vm3, %v528_v46, 0.0 }
 0x104   : >> { %v518_v51 = vadd.f32 %v517_v49, %v516_v48 }
 0x105   : >> { %v531_v53 = vsel %vm513_vm4, %v529_v50, 0.0 }
 0x106   : >> { %v519_v54 = vrot.slane %v518_v51, 4  ;;  %v532_v55 = vadd.f32 %v531_v53, %v530_v52 }
 0x108   : >> { %v520_v56 = vadd.f32 %v519_v54, %v518_v51  ;;  %v533_v57 = vrot.slane %v532_v55, 4 }
 0x10a   : >> { %v521_v58 = vrot.slane %v520_v56, 2  ;;  %v534_v59 = vadd.f32 %v533_v57, %v532_v55 }
 0x10c   : >> { %v522_v60 = vadd.f32 %v521_v58, %v520_v56  ;;  %v535_v61 = vrot.slane %v534_v59, 2 }
 0x10e   : >> { %v523_v62 = vrot.slane %v522_v60, 1  ;;  %v536_v63 = vadd.f32 %v535_v61, %v534_v59 }
 0x110   : >> { %v524_v2 = vadd.f32 %v523_v62, %v522_v60  ;;  %v537_v3 = vrot.slane %v536_v63, 1  ;;  %233 = sbr.rel (!%p231_p5) target bundleno = 22 (0x16), region = 94 }
 0x112   : >> { %v525_v5 = vadd.f32 %v524_v2, %v515_v0  ;;  %v538_v6 = vadd.f32 %v537_v3, %v536_v63 }
 0x114   : >> { %526 = vst.msk [vmem:[%s877_s4] sm:$0x1] %vm513_vm4, %v525_v5  ;;  %v539_v7 = vadd.f32 %v538_v6, %v527_v4 }
 0x116   : >> { %540 = vst.msk [vmem:[%s878_s5] sm:$0x1] %vm513_vm4, %v539_v7 }
 0x117 PF: > { %s16_s18 = sadd.s32 1, %s739_s18  }
 0x118   : > { %p13_p6 = scmp.ge.s32.totalorder %s16_s18, 4  }
 0x11a   :  { %15 = sbr.rel (!%p13_p6) target bundleno = 1 (0x1), region = 105 }

// kernel: anigan_discriminator_forward.9
= control target key start
LH: loop header
LB: loop body
LE: loop exit
PB: predicated region body
PF: predicated region fallthrough
CT: control target
= control target key end

     0   :  { %vm154_vm0 = vcmask 130048   ;;  %s402_s0 = inlined_call_operand.vmem [shape: f32[162,16], index: 0, kind: input, shape index: {}]   ;;  %s403_s1 = inlined_call_operand.vmem [shape: f32[1,16], index: 1, kind: input, shape index: {}]   ;;  %s404_s2 = inlined_call_operand.vmem [shape: f32[1,16], index: 2, kind: input, shape index: {}]   ;;  %s405_s3 = inlined_call_operand.vmem [shape: f32[162,16], index: 3, kind: output, shape index: {}]  }
   0x1   :  { %v14_v0 = vld [vmem:[%s402_s0] sm:$0xff]  ;;  %v15_v4 = vld [vmem:[%s402_s0 + $0x8] sm:$0xff]  ;;  %v16_v5 = vld [vmem:[%s402_s0 + $0x10] sm:$0xff] }
   0x2   :  { %v209_v1 = vld [vmem:[%s403_s1] ss:$0 sm:$0xff]  ;;  %v17_v6 = vld [vmem:[%s402_s0 + $0x18] sm:$0xff]  ;;  %v19_v11 = vld [vmem:[%s402_s0 + $0x28] sm:$0xff] }
   0x3   :  { %v214_v2 = vld [vmem:[%s404_s2] ss:$0 sm:$0xff]  ;;  %v42_v3 = vmul.f32 %v209_v1, %v14_v0  ;;  %v43_v7 = vmul.f32 %v209_v1, %v15_v4  ;;  %v44_v8 = vmul.f32 %v209_v1, %v16_v5  ;;  %v45_v9 = vmul.f32 %v209_v1, %v17_v6  ;;  %v20_v12 = vld [vmem:[%s402_s0 + $0x30] sm:$0xff]  ;;  %v21_v17 = vld [vmem:[%s402_s0 + $0x38] sm:$0xff] }
   0x4   :  { %v18_v10 = vld [vmem:[%s402_s0 + $0x20] sm:$0xff]  ;;  %v47_v15 = vmul.f32 %v209_v1, %v19_v11  ;;  %v48_v16 = vmul.f32 %v209_v1, %v20_v12  ;;  %v49_v21 = vmul.f32 %v209_v1, %v21_v17  ;;  %v23_v30 = vld [vmem:[%s402_s0 + $0x48] sm:$0xff]  ;;  %v24_v31 = vld [vmem:[%s402_s0 + $0x50] sm:$0xff] }
   0x5   :  { %v70_v13 = vadd.f32 %v214_v2, %v42_v3  ;;  %v46_v14 = vmul.f32 %v209_v1, %v18_v10  ;;  %v71_v18 = vadd.f32 %v214_v2, %v43_v7  ;;  %v72_v19 = vadd.f32 %v214_v2, %v44_v8  ;;  %v22_v25 = vld [vmem:[%s402_s0 + $0x40] sm:$0xff]  ;;  %v25_v43 = vld [vmem:[%s402_s0 + $0x58] sm:$0xff]  ;;  %v27_v45 = vld [vmem:[%s402_s0 + $0x68] sm:$0xff] }
   0x6   :  { %v73_v20 = vadd.f32 %v214_v2, %v45_v9  ;;  %v75_v24 = vadd.f32 %v214_v2, %v47_v15  ;;  %v76_v37 = vadd.f32 %v214_v2, %v48_v16  ;;  %v77_v38 = vadd.f32 %v214_v2, %v49_v21  ;;  %v26_v44 = vld [vmem:[%s402_s0 + $0x60] sm:$0xff]  ;;  %v28_v56 = vld [vmem:[%s402_s0 + $0x70] sm:$0xff]  ;;  %v29_v4 = vld [vmem:[%s402_s0 + $0x78] sm:$0xff] }
   0x7   :  { %vm91_vm1 = vcmp.ge.f32.partialorder %v70_v13, 0.0  ;;  %v112_v22 = vmul.f32 0.2, %v70_v13  ;;  %v74_v23 = vadd.f32 %v214_v2, %v46_v14  ;;  %vm92_vm2 = vcmp.ge.f32.partialorder %v71_v18, 0.0  ;;  %v30_v5 = vld [vmem:[%s402_s0 + $0x80] sm:$0xff]  ;;  %v31_v9 = vld [vmem:[%s402_s0 + $0x88] sm:$0xff] }
   0x8   :  { %v113_v26 = vmul.f32 0.2, %v71_v18  ;;  %vm93_vm3 = vcmp.ge.f32.partialorder %v72_v19, 0.0  ;;  %v114_v27 = vmul.f32 0.2, %v72_v19  ;;  %vm94_vm4 = vcmp.ge.f32.partialorder %v73_v20, 0.0 }
   0x9   :  { %v133_v28 = vsel %vm91_vm1, %v70_v13, %v112_v22  ;;  %v115_v29 = vmul.f32 0.2, %v73_v20  ;;  %vm95_vm5 = vcmp.ge.f32.partialorder %v74_v23, 0.0  ;;  %v116_v34 = vmul.f32 0.2, %v74_v23  ;;  %v32_v10 = vld [vmem:[%s402_s0 + $0x90] sm:$0xff] }
   0xa   :  { %155 = vst.msk [vmem:[%s405_s3] sm:$0xff] %vm154_vm0, %v133_v28  ;;  %v134_v32 = vsel %vm92_vm2, %v71_v18, %v113_v26  ;;  %v135_v33 = vsel %vm93_vm3, %v72_v19, %v114_v27  ;;  %vm96_vm6 = vcmp.ge.f32.partialorder %v75_v24, 0.0  ;;  %v117_v36 = vmul.f32 0.2, %v75_v24  ;;  %v33_v17 = vld [vmem:[%s402_s0 + $0x98] sm:$0xff] }
   0xb   :  { %156 = vst.msk [vmem:[%s405_s3 + $0x8] sm:$0xff] %vm154_vm0, %v134_v32  ;;  %157 = vst.msk [vmem:[%s405_s3 + $0x10] sm:$0xff] %vm154_vm0, %v135_v33  ;;  %v136_v35 = vsel %vm94_vm4, %v73_v20, %v115_v29  ;;  %v137_v39 = vsel %vm95_vm5, %v74_v23, %v116_v34  ;;  %v50_v40 = vmul.f32 %v209_v1, %v22_v25  ;;  %vm97_vm7 = vcmp.ge.f32.partialorder %v76_v37, 0.0  ;;  %v34_v18 = vld [vmem:[%s402_s0 + $0xa0] sm:$0x3] }
   0xc   :  { %158 = vst.msk [vmem:[%s405_s3 + $0x18] sm:$0xff] %vm154_vm0, %v136_v35  ;;  %v51_v41 = vmul.f32 %v209_v1, %v23_v30  ;;  %v52_v42 = vmul.f32 %v209_v1, %v24_v31  ;;  %159 = vst.msk [vmem:[%s405_s3 + $0x20] sm:$0xff] %vm154_vm0, %v137_v39  ;;  %v138_v46 = vsel %vm96_vm6, %v75_v24, %v117_v36  ;;  %v118_v47 = vmul.f32 0.2, %v76_v37 }
   0xd   :  { %vm98_vm8 = vcmp.ge.f32.partialorder %v77_v38, 0.0  ;;  %160 = vst.msk [vmem:[%s405_s3 + $0x28] sm:$0xff] %vm154_vm0, %v138_v46  ;;  %v119_v48 = vmul.f32 0.2, %v77_v38  ;;  %v78_v49 = vadd.f32 %v214_v2, %v50_v40  ;;  %v53_v53 = vmul.f32 %v209_v1, %v25_v43 }
   0xe   :  { %v79_v50 = vadd.f32 %v214_v2, %v51_v41  ;;  %v80_v51 = vadd.f32 %v214_v2, %v52_v42  ;;  %v139_v52 = vsel %vm97_vm7, %v76_v37, %v118_v47  ;;  %v54_v54 = vmul.f32 %v209_v1, %v26_v44 }
   0xf   :  { %v55_v55 = vmul.f32 %v209_v1, %v27_v45  ;;  %161 = vst.msk [vmem:[%s405_s3 + $0x30] sm:$0xff] %vm154_vm0, %v139_v52  ;;  %v140_v57 = vsel %vm98_vm8, %v77_v38, %v119_v48  ;;  %vm99_vm9 = vcmp.ge.f32.partialorder %v78_v49, 0.0  ;;  %v120_v58 = vmul.f32 0.2, %v78_v49 }
  0x10   :  { %vm100_vm10 = vcmp.ge.f32.partialorder %v79_v50, 0.0  ;;  %162 = vst.msk [vmem:[%s405_s3 + $0x38] sm:$0xff] %vm154_vm0, %v140_v57  ;;  %v121_v59 = vmul.f32 0.2, %v79_v50  ;;  %vm101_vm11 = vcmp.ge.f32.partialorder %v80_v51, 0.0  ;;  %v81_v61 = vadd.f32 %v214_v2, %v53_v53 }
  0x11   :  { %v122_v60 = vmul.f32 0.2, %v80_v51  ;;  %v141_v62 = vsel %vm99_vm9, %v78_v49, %v120_v58  ;;  %v82_v63 = vadd.f32 %v214_v2, %v54_v54  ;;  %v83_v0 = vadd.f32 %v214_v2, %v55_v55 }
  0x12   :  { %v56_v3 = vmul.f32 %v209_v1, %v28_v56  ;;  %163 = vst.msk [vmem:[%s405_s3 + $0x40] sm:$0xff] %vm154_vm0, %v141_v62  ;;  %v142_v6 = vsel %vm100_vm10, %v79_v50, %v121_v59  ;;  %vm102_vm12 = vcmp.ge.f32.partialorder %v81_v61, 0.0  ;;  %v123_v8 = vmul.f32 0.2, %v81_v61 }
  0x13   :  { %v143_v7 = vsel %vm101_vm11, %v80_v51, %v122_v60  ;;  %164 = vst.msk [vmem:[%s405_s3 + $0x48] sm:$0xff] %vm154_vm0, %v142_v6  ;;  %vm103_vm13 = vcmp.ge.f32.partialorder %v82_v63, 0.0  ;;  %v124_v11 = vmul.f32 0.2, %v82_v63  ;;  %vm104_vm14 = vcmp.ge.f32.partialorder %v83_v0, 0.0 }
  0x14   :  { %165 = vst.msk [vmem:[%s405_s3 + $0x50] sm:$0xff] %vm154_vm0, %v143_v7  ;;  %v125_v12 = vmul.f32 0.2, %v83_v0  ;;  %v144_v13 = vsel %vm102_vm12, %v81_v61, %v123_v8  ;;  %v84_v14 = vadd.f32 %v214_v2, %v56_v3  ;;  %v57_v15 = vmul.f32 %v209_v1, %v29_v4 }
  0x15   :  { %v58_v16 = vmul.f32 %v209_v1, %v30_v5  ;;  %166 = vst.msk [vmem:[%s405_s3 + $0x58] sm:$0xff] %vm154_vm0, %v144_v13  ;;  %v145_v19 = vsel %vm103_vm13, %v82_v63, %v124_v11  ;;  %v59_v21 = vmul.f32 %v209_v1, %v31_v9  ;;  %v60_v22 = vmul.f32 %v209_v1, %v32_v10 }
  0x16   :  { %v146_v20 = vsel %vm104_vm14, %v83_v0, %v125_v12  ;;  %167 = vst.msk [vmem:[%s405_s3 + $0x60] sm:$0xff] %vm154_vm0, %v145_v19  ;;  %vm105_vm15 = vcmp.ge.f32.partialorder %v84_v14, 0.0  ;;  %v126_v23 = vmul.f32 0.2, %v84_v14  ;;  %v85_v24 = vadd.f32 %v214_v2, %v57_v15 }
  0x17   :  { %168 = vst.msk [vmem:[%s405_s3 + $0x68] sm:$0xff] %vm154_vm0, %v146_v20  ;;  %v86_v25 = vadd.f32 %v214_v2, %v58_v16  ;;  %v87_v26 = vadd.f32 %v214_v2, %v59_v21  ;;  %v88_v27 = vadd.f32 %v214_v2, %v60_v22  ;;  %v61_v28 = vmul.f32 %v209_v1, %v33_v17 }
  0x18   :  { %v62_v29 = vmul.f32 %v209_v1, %v34_v18  ;;  %v147_v30 = vsel %vm105_vm15, %v84_v14, %v126_v23  ;;  %vm106_vm1 = vcmp.ge.f32.partialorder %v85_v24, 0.0  ;;  %v127_v31 = vmul.f32 0.2, %v85_v24 }
  0x19   :  { %vm107_vm2 = vcmp.ge.f32.partialorder %v86_v25, 0.0  ;;  %169 = vst.msk [vmem:[%s405_s3 + $0x70] sm:$0xff] %vm154_vm0, %v147_v30  ;;  %v128_v32 = vmul.f32 0.2, %v86_v25  ;;  %vm108_vm3 = vcmp.ge.f32.partialorder %v87_v26, 0.0  ;;  %vm109_vm4 = vcmp.ge.f32.partialorder %v88_v27, 0.0 }
  0x1a   :  { %v129_v33 = vmul.f32 0.2, %v87_v26  ;;  %v148_v34 = vsel %vm106_vm1, %v85_v24, %v127_v31  ;;  %v130_v35 = vmul.f32 0.2, %v88_v27  ;;  %v89_v36 = vadd.f32 %v214_v2, %v61_v28 }
  0x1b   :  { %v90_v37 = vadd.f32 %v214_v2, %v62_v29  ;;  %170 = vst.msk [vmem:[%s405_s3 + $0x78] sm:$0xff] %vm154_vm0, %v148_v34  ;;  %v149_v1 = vsel %vm107_vm2, %v86_v25, %v128_v32  ;;  %vm175_vm7 = vcmask 123904  }
  0x1c   :  { %v150_v38 = vsel %vm108_vm3, %v87_v26, %v129_v33  ;;  %171 = vst.msk [vmem:[%s405_s3 + $0x80] sm:$0xff] %vm154_vm0, %v149_v1  ;;  %v151_v39 = vsel %vm109_vm4, %v88_v27, %v130_v35  ;;  %vm110_vm5 = vcmp.ge.f32.partialorder %v89_v36, 0.0  ;;  %v131_v2 = vmul.f32 0.2, %v89_v36 }
  0x1d   :  { %172 = vst.msk [vmem:[%s405_s3 + $0x88] sm:$0xff] %vm154_vm0, %v150_v38  ;;  %vm111_vm6 = vcmp.ge.f32.partialorder %v90_v37, 0.0  ;;  %173 = vst.msk [vmem:[%s405_s3 + $0x90] sm:$0xff] %vm154_vm0, %v151_v39  ;;  %v132_v40 = vmul.f32 0.2, %v90_v37 }
  0x1e   :  { %v152_v41 = vsel %vm110_vm5, %v89_v36, %v131_v2 }
  0x1f   :  { %174 = vst.msk [vmem:[%s405_s3 + $0x98] sm:$0xff] %vm154_vm0, %v152_v41  ;;  %v153_v42 = vsel %vm111_vm6, %v90_v37, %v132_v40 }
  0x20   :  { %176 = vst.msk [vmem:[%s405_s3 + $0xa0] sm:$0x3] %vm175_vm7, %v153_v42 }

// kernel: anigan_discriminator_forward.10
= control target key start
LH: loop header
LB: loop body
LE: loop exit
PB: predicated region body
PF: predicated region fallthrough
CT: control target
= control target key end

     0   :  { %s862_s18 = smov 0   ;;  %s981_s0 = inlined_call_operand.vmem [shape: f32[2,49,64], index: 0, kind: input, shape index: {}]   ;;  %s982_s1 = inlined_call_operand.vmem [shape: bf16[256,32], index: 1, kind: input, shape index: {}]   ;;  %s983_s2 = inlined_call_operand.vmem [shape: f32[1,32], index: 2, kind: input, shape index: {}]   ;;  %s984_s3 = inlined_call_operand.vmem [shape: f32[2,25,32], index: 3, kind: output, shape index: {0}]   ;;  %s985_s4 = inlined_call_operand.vmem [shape: f32[1,32], index: 4, kind: output, shape index: {1}]   ;;  %s986_s5 = inlined_call_operand.vmem [shape: f32[1,32], index: 5, kind: output, shape index: {2}]  }
   0x1 LB: > { %s673_s19 = sadd.s32 4294967295, %s823_s18   ;;  %p677_p0 = scmp.ge.s32.totalorder %s823_s18, 1  ;;  %s823_s18 = sphi %s862_s18, %s16_s18  }
   0x2   : > { %p182_p1 = scmp.lt.s32.totalorder %s823_s18, 3 }
   0x4   : > { %p183_p2 = pnand %p677_p0, %p182_p1 }
   0x5   : > { %p210_p3 = scmp.lt.s32.totalorder (!%p183_p2), %s673_s19, 1  ;;  %p681_p4 = scmp.ne.s32.totalorder (!%p183_p2), %s673_s19, 0 }
   0x6   : > { %186 = sbr.rel (%p183_p2) target bundleno = 291 (0x123), region = 32 }
   0xd   : > { %s211_s20 = scalar_select %p210_p3, %s673_s19, 1 }
   0xe   : > { %224 = sbr.rel (%p681_p4) target bundleno = 21 (0x15), region = 36  ;;  %vm225_vm0 = vcmask (!%p681_p4), 253952   ;;  %v829_v0 = vmov (!%p681_p4), 0.0  }
   0xf   : > { %s777_s21 = smul.u32 56, %s211_s20  ;;  %s708_s22 = sshll.u32 %s211_s20, 5  ;;  %226 = vst.msk [vmem:[%s985_s4] sm:$0x1] (!%p681_p4), %vm225_vm0, %v829_v0  ;;  %227 = vst.msk [vmem:[%s986_s5] sm:$0x1] (!%p681_p4), %vm225_vm0, %v829_v0 }
  0x10   : > { %s873_s25 = scalar_lea.vmem %s984_s3, %s708_s22 }
  0x11   : > { %s878_s28 = scalar_lea.vmem %s981_s0, %s777_s21 }
  0x15 PF: > { %v889_v1 = vld [vmem:[%s983_s2] ss:$0 sm:$0xff]  ;;  %s891_s10 = smov 0  }
  0x16 LB: >> { %v797_v2 = vld [vmem:[%s982_s1 + $0x20] sm:$0xff]   ;;  %v830_v3 = vmov 0.0   ;;  %v799_v5 = vld [vmem:[%s982_s1 + $0x28] sm:$0xff]   ;;  %vm831_vm1 = vmmov 0   ;;  %s235_s20 = smul.u32 7, %s827_s10  ;;  %v801_v7 = vld [vmem:[%s982_s1 + $0x30] sm:$0xff]   ;;  %s827_s10 = sphi %s891_s10, %s234_s10  }
  0x17   : >> { %729 = vmatprep.subr.bf16.mxu0 %v830_v3  ;;  %741 = vmatprep.subr.bf16.mxu1 %v830_v3  ;;  %v798_v4 = vld [vmem:[%s982_s1] sm:$0xff]   ;;  %v800_v6 = vld [vmem:[%s982_s1 + $0x8] sm:$0xff]   ;;  %v802_v8 = vld [vmem:[%s982_s1 + $0x10] sm:$0xff]   ;;  %vm283_vm2 = vcmask 523264   ;;  %vm564_vm3 = vcmask 258048   ;;  %vm575_vm4 = vcmask 253952  }
  0x18   : >> { %730 = vmatpush3.bf16.msra.mxu0 %v797_v2  ;;  %737 = vmatprep.mubr.msk.bf16.mxu0 %vm831_vm1, %v830_v3  ;;  %s918_s26 = scalar_lea.vmem %s878_s28, %s235_s20  ;;  %v803_v9 = vld [vmem:[%s982_s1 + $0x38] sm:$0xff]   ;;  %v805_v15 = vld [vmem:[%s982_s1 + $0x40] sm:$0xff]   ;;  %v807_v17 = vld [vmem:[%s982_s1 + $0x48] sm:$0xff]  }
  0x19   : >> { %742 = vmatpush3.bf16.msra.mxu1 %v798_v4  ;;  %731 = vmatprep.subr.bf16.mxu0 %v830_v3  ;;  %v804_v10 = vld [vmem:[%s982_s1 + $0x18] sm:$0xff]   ;;  %v682_v11 = vld [vmem:[%s918_s26 + $0x1] sm:$0x1f]  ;;  %v808_v18 = vld [vmem:[%s982_s1 + $0x68] sm:$0xff]  }
  0x1a   : >> { %743 = vmatprep.subr.bf16.mxu1 %v830_v3  ;;  %749 = vmatprep.mubr.msk.bf16.mxu1 %vm831_vm1, %v830_v3  ;;  %v237_v12 = vld [vmem:[%s918_s26] sm:$0x1f]  ;;  %v250_v13 = vpack.c.bf16 %v682_v11, %v682_v11  ;;  %v809_v19 = vld [vmem:[%s982_s1 + $0x50] sm:$0xff]   ;;  %v811_v21 = vld [vmem:[%s982_s1 + $0x58] sm:$0xff]  }
  0x1b   : >> { %v238_v14 = vpack.c.bf16 %v237_v12, %v237_v12  ;;  %v806_v16 = vld [vmem:[%s982_s1 + $0x60] sm:$0xff]   ;;  %v810_v20 = vld [vmem:[%s982_s1 + $0x70] sm:$0xff]   ;;  %v812_v23 = vld [vmem:[%s982_s1 + $0x78] sm:$0xff]  }
  0x1c   : >> { %732 = vmatpush3.bf16.msra.mxu0 %v799_v5  ;;  %v693_v22 = vld [vmem:[%s918_s26 + $0x7] sm:$0x1f]  ;;  %v566_v59 = vld [vmem:[%s985_s4] sm:$0x1] }
  0x1d   : >> { %744 = vmatpush3.bf16.msra.mxu1 %v800_v6  ;;  %733 = vmatprep.subr.bf16.mxu0 %v830_v3  ;;  %v699_v24 = vld [vmem:[%s918_s26 + $0x8] sm:$0x1f]  ;;  %v398_v25 = vpack.c.bf16 %v693_v22, %v693_v22  ;;  %s562_s26 = smul.u32 5, %s827_s10  ;;  %v577_v62 = vld [vmem:[%s986_s5] sm:$0x1]  ;;  %s234_s10 = sadd.s32 1, %s827_s10  }
  0x1e   : >> { %745 = vmatprep.subr.bf16.mxu1 %v830_v3  ;;  %v478_v26 = vpack.c.bf16 %v699_v24, %v699_v24  ;;  %p231_p5 = scmp.ge.s32.totalorder %s234_s10, 5  }
  0x1f   : >> { %s563_s27 = scalar_lea.vmem %s873_s25, %s562_s26 }
  0x20   : >> { %734 = vmatpush3.bf16.msra.mxu0 %v801_v7 }
  0x21   : >> { %746 = vmatpush3.bf16.msra.mxu1 %v802_v8  ;;  %735 = vmatprep.subr.bf16.mxu0 %v830_v3 }
  0x22   : >> { %747 = vmatprep.subr.bf16.mxu1 %v830_v3 }
  0x24   : >> { %736 = vmatpush3.bf16.msra.mxu0 %v803_v9 }
  0x25   : >> { %748 = vmatpush3.bf16.msra.mxu1 %v804_v10  ;;  %753 = vmatprep.subr.bf16.mxu0 %v830_v3 }
  0x26   : >> { %765 = vmatprep.subr.bf16.mxu1 %v830_v3 }
  0x27   : >> { %738 = vmatmul.mubr.msk.bf16.vlgmr.msra.gmra.mrb[0].mxu0 %vm283_vm2, %v250_v13 }
  0x28   : >> { %750 = vmatmul.mubr.msk.bf16.vlgmr.msra.gmra.mrb[0].mxu1 %vm283_vm2, %v238_v14  ;;  %754 = vmatpush3.bf16.msra.mxu0 %v805_v15 }
  0x29   : >> { %766 = vmatpush3.bf16.msra.mxu1 %v806_v16  ;;  %755 = vmatprep.subr.bf16.mxu0 %v830_v3 }
  0x2a   : >> { %767 = vmatprep.subr.bf16.mxu1 %v830_v3  ;;  %761 = vmatprep.mubr.msk.bf16.mxu0 %vm831_vm1, %v830_v3 }
  0x2b   : >> { %773 = vmatprep.mubr.msk.bf16.mxu1 %vm831_vm1, %v830_v3 }
  0x2c   : >> { %756 = vmatpush3.bf16.msra.mxu0 %v807_v17 }
  0x2d   : >> { %768 = vmatpush3.bf16.msra.mxu1 %v808_v18  ;;  %757 = vmatprep.subr.bf16.mxu0 %v830_v3 }
  0x2e   : >> { %769 = vmatprep.subr.bf16.mxu1 %v830_v3 }
  0x30   : >> { %758 = vmatpush3.bf16.msra.mxu0 %v809_v19 }
  0x31   : >> { %770 = vmatpush3.bf16.msra.mxu1 %v810_v20  ;;  %759 = vmatprep.subr.bf16.mxu0 %v830_v3 }
  0x32   : >> { %771 = vmatprep.subr.bf16.mxu1 %v830_v3 }
  0x34   : >> { %760 = vmatpush3.bf16.msra.mxu0 %v811_v21 }
  0x35   : >> { %772 = vmatpush3.bf16.msra.mxu1 %v812_v23 }
  0x37   : >> { %762 = vmatmul.mubr.msk.bf16.vlgmr.msra.gmra.mrb[4].mxu0 %vm283_vm2, %v398_v25 }
  0x38   : >> { %774 = vmatmul.mubr.msk.bf16.vlgmr.msra.gmra.mrb[4].mxu1 %vm283_vm2, %v478_v26 }
  0xfa   : >> { %v321_v27 = vpop.f32.mrb[0].mxu0 }
  0xfb   : >> { %v388_v28 = vpop.f32.mrb[0].mxu1  ;;  %v739_v29 = vpop.f32.mrb[1].mxu0 }
  0xfc   : >> { %v389_v30 = vadd.f32 %v388_v28, %v321_v27  ;;  %v751_v31 = vpop.f32.mrb[1].mxu1  ;;  %v324_v32 = vpop.f32.mrb[2].mxu0 }
  0xfd   : >> { %v391_v33 = vpop.f32.mrb[2].mxu1  ;;  %v740_v34 = vpop.f32.mrb[3].mxu0 }
  0xfe   : >> { %v752_v35 = vpop.f32.mrb[3].mxu1 }
 0x10a   : >> { %v468_v36 = vpop.f32.mrb[4].mxu0 }
 0x10b   : >> { %v474_v37 = vadd.f32 %v468_v36, %v389_v30  ;;  %v548_v38 = vpop.f32.mrb[4].mxu1  ;;  %v763_v39 = vpop.f32.mrb[5].mxu0 }
 0x10c   : >> { %v775_v40 = vpop.f32.mrb[5].mxu1  ;;  %v471_v41 = vpop.f32.mrb[6].mxu0 }
 0x10d   : >> { %v554_v42 = vadd.f32 %v548_v38, %v474_v37  ;;  %v551_v43 = vpop.f32.mrb[6].mxu1  ;;  %v764_v44 = vpop.f32.mrb[7].mxu0 }
 0x10e   : >> { %v776_v45 = vpop.f32.mrb[7].mxu1 }
 0x10f   : >> { %v561_v46 = vadd.f32 %v889_v1, %v554_v42 }
 0x111   : >> { %565 = vst.msk [vmem:[%s563_s27] sm:$0x1f] %vm564_vm3, %v561_v46  ;;  %v567_v47 = vsel %vm564_vm3, %v561_v46, 0.0  ;;  %v578_v48 = vmul.f32 %v561_v46, %v561_v46 }
 0x112   : >> { %v568_v49 = vrot.slane %v567_v47, 4 }
 0x113   : >> { %v579_v50 = vsel %vm564_vm3, %v578_v48, 0.0 }
 0x114   : >> { %v569_v51 = vadd.f32 %v568_v49, %v567_v47  ;;  %v580_v52 = vrot.slane %v579_v50, 4 }
 0x116   : >> { %v570_v53 = vrot.slane %v569_v51, 2  ;;  %v581_v54 = vadd.f32 %v580_v52, %v579_v50 }
 0x118   : >> { %v571_v55 = vadd.f32 %v570_v53, %v569_v51  ;;  %v582_v56 = vrot.slane %v581_v54, 2 }
 0x11a   : >> { %v572_v57 = vrot.slane %v571_v55, 1  ;;  %v583_v58 = vadd.f32 %v582_v56, %v581_v54 }
 0x11c   : >> { %v573_v60 = vadd.f32 %v572_v57, %v571_v55  ;;  %v584_v61 = vrot.slane %v583_v58, 1  ;;  %233 = sbr.rel (!%p231_p5) target bundleno = 22 (0x16), region = 94 }
 0x11e   : >> { %v574_v63 = vadd.f32 %v573_v60, %v566_v59  ;;  %v585_v0 = vadd.f32 %v584_v61, %v583_v58 }
 0x120   : >> { %576 = vst.msk [vmem:[%s985_s4] sm:$0x1] %vm575_vm4, %v574_v63  ;;  %v586_v2 = vadd.f32 %v585_v0, %v577_v62 }
 0x122   : >> { %587 = vst.msk [vmem:[%s986_s5] sm:$0x1] %vm575_vm4, %v586_v2 }
 0x123 PF: > { %s16_s18 = sadd.s32 1, %s823_s18  }
 0x124   : > { %p13_p6 = scmp.ge.s32.totalorder %s16_s18, 4  }
 0x126   :  { %15 = sbr.rel (!%p13_p6) target bundleno = 1 (0x1), region = 105 }

// kernel: anigan_discriminator_forward.11
= control target key start
LH: loop header
LB: loop body
LE: loop exit
PB: predicated region body
PF: predicated region fallthrough
CT: control target
= control target key end

     0   :  { %vm70_vm0 = vcmask 261120   ;;  %vm77_vm8 = vcmask 254976   ;;  %s159_s0 = inlined_call_operand.vmem [shape: f32[50,32], index: 0, kind: input, shape index: {}]   ;;  %s160_s1 = inlined_call_operand.vmem [shape: f32[1,32], index: 1, kind: input, shape index: {}]   ;;  %s161_s2 = inlined_call_operand.vmem [shape: f32[1,32], index: 2, kind: input, shape index: {}]   ;;  %s162_s3 = inlined_call_operand.vmem [shape: f32[50,32], index: 3, kind: output, shape index: {}]  }
   0x1   :  { %v14_v0 = vld [vmem:[%s159_s0] sm:$0xff]  ;;  %v15_v4 = vld [vmem:[%s159_s0 + $0x8] sm:$0xff]  ;;  %v16_v5 = vld [vmem:[%s159_s0 + $0x10] sm:$0xff] }
   0x2   :  { %v83_v1 = vld [vmem:[%s160_s1] ss:$0 sm:$0xff]  ;;  %v17_v6 = vld [vmem:[%s159_s0 + $0x18] sm:$0xff]  ;;  %v19_v11 = vld [vmem:[%s159_s0 + $0x28] sm:$0xff] }
   0x3   :  { %v84_v2 = vld [vmem:[%s161_s2] ss:$0 sm:$0xff]  ;;  %v28_v3 = vmul.f32 %v83_v1, %v14_v0  ;;  %v29_v7 = vmul.f32 %v83_v1, %v15_v4  ;;  %v30_v8 = vmul.f32 %v83_v1, %v16_v5  ;;  %v31_v9 = vmul.f32 %v83_v1, %v17_v6  ;;  %v20_v12 = vld [vmem:[%s159_s0 + $0x30] sm:$0x3] }
   0x4   :  { %v18_v10 = vld [vmem:[%s159_s0 + $0x20] sm:$0xff]  ;;  %v33_v15 = vmul.f32 %v83_v1, %v19_v11  ;;  %v34_v19 = vmul.f32 %v83_v1, %v20_v12 }
   0x5   :  { %v42_v13 = vadd.f32 %v84_v2, %v28_v3  ;;  %v32_v14 = vmul.f32 %v83_v1, %v18_v10  ;;  %v43_v16 = vadd.f32 %v84_v2, %v29_v7  ;;  %v44_v17 = vadd.f32 %v84_v2, %v30_v8 }
   0x6   :  { %v45_v18 = vadd.f32 %v84_v2, %v31_v9  ;;  %v47_v22 = vadd.f32 %v84_v2, %v33_v15  ;;  %v48_v32 = vadd.f32 %v84_v2, %v34_v19 }
   0x7   :  { %vm49_vm1 = vcmp.ge.f32.partialorder %v42_v13, 0.0  ;;  %v56_v20 = vmul.f32 0.2, %v42_v13  ;;  %v46_v21 = vadd.f32 %v84_v2, %v32_v14  ;;  %vm50_vm2 = vcmp.ge.f32.partialorder %v43_v16, 0.0 }
   0x8   :  { %v57_v23 = vmul.f32 0.2, %v43_v16  ;;  %vm51_vm3 = vcmp.ge.f32.partialorder %v44_v17, 0.0  ;;  %v58_v24 = vmul.f32 0.2, %v44_v17  ;;  %vm52_vm4 = vcmp.ge.f32.partialorder %v45_v18, 0.0 }
   0x9   :  { %v63_v25 = vsel %vm49_vm1, %v42_v13, %v56_v20  ;;  %v59_v26 = vmul.f32 0.2, %v45_v18  ;;  %vm53_vm5 = vcmp.ge.f32.partialorder %v46_v21, 0.0  ;;  %v60_v29 = vmul.f32 0.2, %v46_v21 }
   0xa   :  { %71 = vst.msk [vmem:[%s162_s3] sm:$0xff] %vm70_vm0, %v63_v25  ;;  %v64_v27 = vsel %vm50_vm2, %v43_v16, %v57_v23  ;;  %v65_v28 = vsel %vm51_vm3, %v44_v17, %v58_v24  ;;  %vm54_vm6 = vcmp.ge.f32.partialorder %v47_v22, 0.0  ;;  %v61_v31 = vmul.f32 0.2, %v47_v22 }
   0xb   :  { %72 = vst.msk [vmem:[%s162_s3 + $0x8] sm:$0xff] %vm70_vm0, %v64_v27  ;;  %73 = vst.msk [vmem:[%s162_s3 + $0x10] sm:$0xff] %vm70_vm0, %v65_v28  ;;  %v66_v30 = vsel %vm52_vm4, %v45_v18, %v59_v26  ;;  %v67_v33 = vsel %vm53_vm5, %v46_v21, %v60_v29  ;;  %vm55_vm7 = vcmp.ge.f32.partialorder %v48_v32, 0.0  ;;  %v62_v35 = vmul.f32 0.2, %v48_v32 }
   0xc   :  { %74 = vst.msk [vmem:[%s162_s3 + $0x18] sm:$0xff] %vm70_vm0, %v66_v30  ;;  %75 = vst.msk [vmem:[%s162_s3 + $0x20] sm:$0xff] %vm70_vm0, %v67_v33  ;;  %v68_v34 = vsel %vm54_vm6, %v47_v22, %v61_v31 }
   0xd   :  { %76 = vst.msk [vmem:[%s162_s3 + $0x28] sm:$0xff] %vm70_vm0, %v68_v34  ;;  %v69_v36 = vsel %vm55_vm7, %v48_v32, %v62_v35 }
   0xe   :  { %78 = vst.msk [vmem:[%s162_s3 + $0x30] sm:$0x3] %vm77_vm8, %v69_v36 }

// kernel: anigan_discriminator_forward.12
= control target key start
LH: loop header
LB: loop body
LE: loop exit
PB: predicated region body
PF: predicated region fallthrough
CT: control target
= control target key end

     0   :  { %s1669_s14 = smov 0   ;;  %s1899_s0 = inlined_call_operand.vmem [shape: f32[2,81,32], index: 0, kind: input, shape index: {}]   ;;  %s1900_s1 = inlined_call_operand.vmem [shape: bf16[512,1], index: 1, kind: input, shape index: {}]   ;;  %s1901_s2 = inlined_call_operand.<no memory space> [shape: f32[1,1], index: 2, kind: input, shape index: {}]   ;;  %s1902_s3 = inlined_call_operand.vmem [shape: f32[2,36,1], index: 3, kind: output, shape index: {}]  }
   0x1   :  { %v8_v0 = vstv %s1901_s2 }
   0x2   :  { %9 = vst [vmem:[#allocation2] sm:$0x1] %v8_v0 }
   0x3 LB: > { %s1327_s15 = sadd.s32 4294967295, %s1638_s14   ;;  %p1331_p0 = scmp.ge.s32.totalorder %s1638_s14, 1  ;;  %s1638_s14 = sphi %s1669_s14, %s15_s14  }
   0x4   : > { %p139_p1 = scmp.lt.s32.totalorder %s1638_s14, 3 }
   0x6   : > { %p140_p2 = pnand %p1331_p0, %p139_p1 }
   0x7   : > { %p163_p3 = scmp.lt.s32.totalorder (!%p140_p2), %s1327_s15, 1  ;;  %s1689_s23 = smov (!%p140_p2), 0  }
   0x8   : > { %143 = sbr.rel (%p140_p2) target bundleno = 304 (0x130), region = 32 }
   0x9   : > { %v1677_v1 = vld [vmem:[#allocation2] ss:$0 sm:$0xff] (!%p140_p2) }
   0xf   : > { %s1904_s15 = smov (!%p163_p3, %s1327_s15), 1 }
  0x10   : > { %s1576_s2 = smul.u32 88, %s1904_s15 }
  0x11   : > { %s1577_s16 = smul.u32 40, %s1904_s15 }
  0x12   : > { %s1682_s19 = scalar_lea.vmem %s1899_s0, %s1576_s2 }
  0x13   : > { %s1687_s22 = scalar_lea.vmem %s1902_s3, %s1577_s16 }
  0x14 LB: >> { %v1596_v2 = vld [vmem:[%s1900_s1 + $0x10] sm:$0xff]   ;;  %v1644_v3 = vmov 0.0   ;;  %v1597_v4 = vld [vmem:[%s1900_s1] sm:$0xff]   ;;  %v1598_v5 = vld [vmem:[%s1900_s1 + $0x18] sm:$0xff]   ;;  %vm1645_vm0 = vmmov 0   ;;  %s181_s30 = smul.u32 9, %s1642_s23  ;;  %s1642_s23 = sphi %s1689_s23, %s180_s23  }
  0x15   : >> { %1448 = vmatprep.subr.bf16.mxu0 %v1644_v3  ;;  %1456 = vmatprep.subr.bf16.mxu1 %v1644_v3  ;;  %v1599_v6 = vld [vmem:[%s1900_s1 + $0x8] sm:$0xff]   ;;  %vm209_vm1 = vcmask 261120   ;;  %v1600_v11 = vld [vmem:[%s1900_s1 + $0x20] sm:$0xff]   ;;  %v1601_v12 = vld [vmem:[%s1900_s1 + $0x30] sm:$0xff]   ;;  %vm1216_vm2 = vcmask 5120  }
  0x16   : >> { %1449 = vmatpush3.bf16.msra.mxu0 %v1596_v2  ;;  %1452 = vmatprep.mubr.msk.bf16.mxu0 %vm1645_vm0, %v1644_v3  ;;  %s1716_s6 = scalar_lea.vmem %s1682_s19, %s181_s30  ;;  %v1602_v13 = vld [vmem:[%s1900_s1 + $0x28] sm:$0xff]   ;;  %v1603_v14 = vld [vmem:[%s1900_s1 + $0x38] sm:$0xff]   ;;  %v1604_v19 = vld [vmem:[%s1900_s1 + $0x40] sm:$0xff]  }
  0x17   : >> { %1457 = vmatpush3.bf16.msra.mxu1 %v1597_v4  ;;  %1450 = vmatprep.subr.bf16.mxu0 %v1644_v3  ;;  %v1334_v7 = vld [vmem:[%s1716_s6 + $0x1] sm:$0x3f]  ;;  %v1605_v20 = vld [vmem:[%s1900_s1 + $0x50] sm:$0xff]   ;;  %v1606_v21 = vld [vmem:[%s1900_s1 + $0x48] sm:$0xff]  }
  0x18   : >> { %1458 = vmatprep.subr.bf16.mxu1 %v1644_v3  ;;  %1460 = vmatprep.mubr.msk.bf16.mxu1 %vm1645_vm0, %v1644_v3  ;;  %v183_v8 = vld [vmem:[%s1716_s6] sm:$0x3f]  ;;  %v192_v9 = vpack.c.bf16 %v1334_v7, %v1334_v7  ;;  %v1607_v22 = vld [vmem:[%s1900_s1 + $0x58] sm:$0xff]   ;;  %v1349_v23 = vld [vmem:[%s1716_s6 + $0x9] sm:$0x3f] }
  0x19   : >> { %v184_v10 = vpack.c.bf16 %v183_v8, %v183_v8  ;;  %v1341_v15 = vld [vmem:[%s1716_s6 + $0x2] sm:$0x3f]  ;;  %v1353_v24 = vld [vmem:[%s1716_s6 + $0xa] sm:$0x3f]  ;;  %v440_v25 = vpack.c.bf16 %v1349_v23, %v1349_v23  ;;  %v1609_v28 = vld [vmem:[%s1900_s1 + $0x70] sm:$0xff]  }
  0x1a   : >> { %1451 = vmatpush3.bf16.msra.mxu0 %v1598_v5  ;;  %v1345_v16 = vld [vmem:[%s1716_s6 + $0x3] sm:$0x3f]  ;;  %v311_v17 = vpack.c.bf16 %v1341_v15, %v1341_v15  ;;  %v504_v26 = vpack.c.bf16 %v1353_v24, %v1353_v24  ;;  %v1357_v30 = vld [vmem:[%s1716_s6 + $0xb] sm:$0x3f]  ;;  %v1611_v31 = vld [vmem:[%s1900_s1 + $0x78] sm:$0xff]  }
  0x1b   : >> { %1459 = vmatpush3.bf16.msra.mxu1 %v1599_v6  ;;  %1464 = vmatprep.subr.bf16.mxu0 %v1644_v3  ;;  %v375_v18 = vpack.c.bf16 %v1345_v16, %v1345_v16  ;;  %v1608_v27 = vld [vmem:[%s1900_s1 + $0x60] sm:$0xff]   ;;  %v1610_v29 = vld [vmem:[%s1900_s1 + $0x68] sm:$0xff]   ;;  %v568_v33 = vpack.c.bf16 %v1357_v30, %v1357_v30  ;;  %v1613_v36 = vld [vmem:[%s1900_s1 + $0x90] sm:$0xff]  }
  0x1c   : >> { %1472 = vmatprep.subr.bf16.mxu1 %v1644_v3  ;;  %v1361_v32 = vld [vmem:[%s1716_s6 + $0xc] sm:$0x3f]  ;;  %v1612_v35 = vld [vmem:[%s1900_s1 + $0x80] sm:$0xff]   ;;  %v1615_v38 = vld [vmem:[%s1900_s1 + $0x98] sm:$0xff]  }
  0x1d   : >> { %1453 = vmatmul.mubr.msk.bf16.vlgmr.msra.gmra.mrb[0].mxu0 %vm209_vm1, %v192_v9  ;;  %v632_v34 = vpack.c.bf16 %v1361_v32, %v1361_v32  ;;  %v1614_v37 = vld [vmem:[%s1900_s1 + $0x88] sm:$0xff]   ;;  %v1365_v39 = vld [vmem:[%s1716_s6 + $0x12] sm:$0x3f]  ;;  %v1616_v43 = vld [vmem:[%s1900_s1 + $0xa0] sm:$0xff]  }
  0x1e   : >> { %1461 = vmatmul.mubr.msk.bf16.vlgmr.msra.gmra.mrb[0].mxu1 %vm209_vm1, %v184_v10  ;;  %1465 = vmatpush3.bf16.msra.mxu0 %v1600_v11  ;;  %v1369_v40 = vld [vmem:[%s1716_s6 + $0x13] sm:$0x3f]  ;;  %v697_v41 = vpack.c.bf16 %v1365_v39, %v1365_v39  ;;  %v1618_v45 = vld [vmem:[%s1900_s1 + $0xa8] sm:$0xff]   ;;  %v1620_v51 = vld [vmem:[%s1900_s1 + $0xc0] sm:$0xff]  }
  0x1f   : >> { %1473 = vmatpush3.bf16.msra.mxu1 %v1601_v12  ;;  %1466 = vmatprep.subr.bf16.mxu0 %v1644_v3  ;;  %v761_v42 = vpack.c.bf16 %v1369_v40, %v1369_v40  ;;  %v1617_v44 = vld [vmem:[%s1900_s1 + $0xb0] sm:$0xff]   ;;  %v1619_v47 = vld [vmem:[%s1900_s1 + $0xb8] sm:$0xff]   ;;  %v1622_v53 = vld [vmem:[%s1900_s1 + $0xc8] sm:$0xff]  }
  0x20   : >> { %1474 = vmatprep.subr.bf16.mxu1 %v1644_v3  ;;  %1468 = vmatprep.mubr.msk.bf16.mxu0 %vm1645_vm0, %v1644_v3  ;;  %v1373_v46 = vld [vmem:[%s1716_s6 + $0x14] sm:$0x3f]  ;;  %v1381_v54 = vld [vmem:[%s1716_s6 + $0x1b] sm:$0x3f]  ;;  %v1626_v61 = vld [vmem:[%s1900_s1 + $0xe8] sm:$0xff]  }
  0x21   : >> { %1476 = vmatprep.mubr.msk.bf16.mxu1 %vm1645_vm0, %v1644_v3  ;;  %v1377_v48 = vld [vmem:[%s1716_s6 + $0x15] sm:$0x3f]  ;;  %v825_v49 = vpack.c.bf16 %v1373_v46, %v1373_v46  ;;  %v1385_v56 = vld [vmem:[%s1716_s6 + $0x1c] sm:$0x3f]  ;;  %v954_v57 = vpack.c.bf16 %v1381_v54, %v1381_v54 }
  0x22   : >> { %1467 = vmatpush3.bf16.msra.mxu0 %v1602_v13  ;;  %v889_v50 = vpack.c.bf16 %v1377_v48, %v1377_v48  ;;  %v1621_v52 = vld [vmem:[%s1900_s1 + $0xd0] sm:$0xff]   ;;  %v1623_v55 = vld [vmem:[%s1900_s1 + $0xd8] sm:$0xff]   ;;  %v1018_v58 = vpack.c.bf16 %v1385_v56, %v1385_v56  ;;  %v1624_v59 = vld [vmem:[%s1900_s1 + $0xe0] sm:$0xff]  }
  0x23   : >> { %1475 = vmatpush3.bf16.msra.mxu1 %v1603_v14  ;;  %1480 = vmatprep.subr.bf16.mxu0 %v1644_v3  ;;  %v1625_v60 = vld [vmem:[%s1900_s1 + $0xf0] sm:$0xff]   ;;  %v1389_v62 = vld [vmem:[%s1716_s6 + $0x1d] sm:$0x3f] }
  0x24   : >> { %1488 = vmatprep.subr.bf16.mxu1 %v1644_v3  ;;  %v1627_v63 = vld [vmem:[%s1900_s1 + $0xf8] sm:$0xff]   ;;  %v1082_v2 = vpack.c.bf16 %v1389_v62, %v1389_v62 }
  0x25   : >> { %1469 = vmatmul.mubr.msk.bf16.vlgmr.msra.gmra.mrb[4].mxu0 %vm209_vm1, %v311_v17  ;;  %v1393_v0 = vld [vmem:[%s1716_s6 + $0x1e] sm:$0x3f]  ;;  %s1214_s6 = smul.u32 6, %s1642_s23  ;;  %s180_s23 = sadd.s32 1, %s1642_s23  }
  0x26   : >> { %1477 = vmatmul.mubr.msk.bf16.vlgmr.msra.gmra.mrb[4].mxu1 %vm209_vm1, %v375_v18  ;;  %1481 = vmatpush3.bf16.msra.mxu0 %v1604_v19  ;;  %v1146_v4 = vpack.c.bf16 %v1393_v0, %v1393_v0  ;;  %p177_p4 = scmp.ge.s32.totalorder %s180_s23, 6  }
  0x27   : >> { %1489 = vmatpush3.bf16.msra.mxu1 %v1605_v20  ;;  %1482 = vmatprep.subr.bf16.mxu0 %v1644_v3  ;;  %s1215_s17 = scalar_lea.vmem %s1687_s22, %s1214_s6 }
  0x28   : >> { %1490 = vmatprep.subr.bf16.mxu1 %v1644_v3  ;;  %1484 = vmatprep.mubr.msk.bf16.mxu0 %vm1645_vm0, %v1644_v3 }
  0x29   : >> { %1492 = vmatprep.mubr.msk.bf16.mxu1 %vm1645_vm0, %v1644_v3 }
  0x2a   : >> { %1483 = vmatpush3.bf16.msra.mxu0 %v1606_v21 }
  0x2b   : >> { %1491 = vmatpush3.bf16.msra.mxu1 %v1607_v22  ;;  %1496 = vmatprep.subr.bf16.mxu0 %v1644_v3 }
  0x2c   : >> { %1504 = vmatprep.subr.bf16.mxu1 %v1644_v3 }
  0x2d   : >> { %1485 = vmatmul.mubr.msk.bf16.vlgmr.msra.gmra.mrb[8].mxu0 %vm209_vm1, %v440_v25 }
  0x2e   : >> { %1493 = vmatmul.mubr.msk.bf16.vlgmr.msra.gmra.mrb[8].mxu1 %vm209_vm1, %v504_v26  ;;  %1497 = vmatpush3.bf16.msra.mxu0 %v1608_v27 }
  0x2f   : >> { %1505 = vmatpush3.bf16.msra.mxu1 %v1609_v28  ;;  %1498 = vmatprep.subr.bf16.mxu0 %v1644_v3 }
  0x30   : >> { %1506 = vmatprep.subr.bf16.mxu1 %v1644_v3  ;;  %1500 = vmatprep.mubr.msk.bf16.mxu0 %vm1645_vm0, %v1644_v3 }
  0x31   : >> { %1508 = vmatprep.mubr.msk.bf16.mxu1 %vm1645_vm0, %v1644_v3 }
  0x32   : >> { %1499 = vmatpush3.bf16.msra.mxu0 %v1610_v29 }
  0x33   : >> { %1507 = vmatpush3.bf16.msra.mxu1 %v1611_v31  ;;  %1512 = vmatprep.subr.bf16.mxu0 %v1644_v3 }
  0x34   : >> { %1520 = vmatprep.subr.bf16.mxu1 %v1644_v3 }
  0x35   : >> { %1501 = vmatmul.mubr.msk.bf16.vlgmr.msra.gmra.mrb[12].mxu0 %vm209_vm1, %v568_v33 }
  0x36   : >> { %1509 = vmatmul.mubr.msk.bf16.vlgmr.msra.gmra.mrb[12].mxu1 %vm209_vm1, %v632_v34  ;;  %1513 = vmatpush3.bf16.msra.mxu0 %v1612_v35 }
  0x37   : >> { %1521 = vmatpush3.bf16.msra.mxu1 %v1613_v36  ;;  %1514 = vmatprep.subr.bf16.mxu0 %v1644_v3 }
  0x38   : >> { %1522 = vmatprep.subr.bf16.mxu1 %v1644_v3  ;;  %1516 = vmatprep.mubr.msk.bf16.mxu0 %vm1645_vm0, %v1644_v3 }
  0x39   : >> { %1524 = vmatprep.mubr.msk.bf16.mxu1 %vm1645_vm0, %v1644_v3 }
  0x3a   : >> { %1515 = vmatpush3.bf16.msra.mxu0 %v1614_v37 }
  0x3b   : >> { %1523 = vmatpush3.bf16.msra.mxu1 %v1615_v38  ;;  %1528 = vmatprep.subr.bf16.mxu0 %v1644_v3 }
  0x3c   : >> { %1536 = vmatprep.subr.bf16.mxu1 %v1644_v3 }
  0x3d   : >> { %1517 = vmatmul.mubr.msk.bf16.vlgmr.msra.gmra.mrb[16].mxu0 %vm209_vm1, %v697_v41 }
  0x3e   : >> { %1525 = vmatmul.mubr.msk.bf16.vlgmr.msra.gmra.mrb[16].mxu1 %vm209_vm1, %v761_v42  ;;  %1529 = vmatpush3.bf16.msra.mxu0 %v1616_v43 }
  0x3f   : >> { %1537 = vmatpush3.bf16.msra.mxu1 %v1617_v44  ;;  %1530 = vmatprep.subr.bf16.mxu0 %v1644_v3 }
  0x40   : >> { %1538 = vmatprep.subr.bf16.mxu1 %v1644_v3  ;;  %1532 = vmatprep.mubr.msk.bf16.mxu0 %vm1645_vm0, %v1644_v3 }
  0x41   : >> { %1540 = vmatprep.mubr.msk.bf16.mxu1 %vm1645_vm0, %v1644_v3 }
  0x42   : >> { %1531 = vmatpush3.bf16.msra.mxu0 %v1618_v45 }
  0x43   : >> { %1539 = vmatpush3.bf16.msra.mxu1 %v1619_v47  ;;  %1544 = vmatprep.subr.bf16.mxu0 %v1644_v3 }
  0x44   : >> { %1552 = vmatprep.subr.bf16.mxu1 %v1644_v3 }
  0x45   : >> { %1533 = vmatmul.mubr.msk.bf16.vlgmr.msra.gmra.mrb[20].mxu0 %vm209_vm1, %v825_v49 }
  0x46   : >> { %1541 = vmatmul.mubr.msk.bf16.vlgmr.msra.gmra.mrb[20].mxu1 %vm209_vm1, %v889_v50  ;;  %1545 = vmatpush3.bf16.msra.mxu0 %v1620_v51 }
  0x47   : >> { %1553 = vmatpush3.bf16.msra.mxu1 %v1621_v52  ;;  %1546 = vmatprep.subr.bf16.mxu0 %v1644_v3 }
  0x48   : >> { %1554 = vmatprep.subr.bf16.mxu1 %v1644_v3  ;;  %1548 = vmatprep.mubr.msk.bf16.mxu0 %vm1645_vm0, %v1644_v3 }
  0x49   : >> { %1556 = vmatprep.mubr.msk.bf16.mxu1 %vm1645_vm0, %v1644_v3 }
  0x4a   : >> { %1547 = vmatpush3.bf16.msra.mxu0 %v1622_v53 }
  0x4b   : >> { %1555 = vmatpush3.bf16.msra.mxu1 %v1623_v55  ;;  %1560 = vmatprep.subr.bf16.mxu0 %v1644_v3 }
  0x4c   : >> { %1568 = vmatprep.subr.bf16.mxu1 %v1644_v3 }
  0x4d   : >> { %1549 = vmatmul.mubr.msk.bf16.vlgmr.msra.gmra.mrb[24].mxu0 %vm209_vm1, %v954_v57 }
  0x4e   : >> { %1557 = vmatmul.mubr.msk.bf16.vlgmr.msra.gmra.mrb[24].mxu1 %vm209_vm1, %v1018_v58  ;;  %1561 = vmatpush3.bf16.msra.mxu0 %v1624_v59 }
  0x4f   : >> { %1569 = vmatpush3.bf16.msra.mxu1 %v1625_v60  ;;  %1562 = vmatprep.subr.bf16.mxu0 %v1644_v3 }
  0x50   : >> { %1570 = vmatprep.subr.bf16.mxu1 %v1644_v3  ;;  %1564 = vmatprep.mubr.msk.bf16.mxu0 %vm1645_vm0, %v1644_v3 }
  0x51   : >> { %1572 = vmatprep.mubr.msk.bf16.mxu1 %vm1645_vm0, %v1644_v3 }
  0x52   : >> { %1563 = vmatpush3.bf16.msra.mxu0 %v1626_v61 }
  0x53   : >> { %1571 = vmatpush3.bf16.msra.mxu1 %v1627_v63 }
  0x55   : >> { %1565 = vmatmul.mubr.msk.bf16.vlgmr.msra.gmra.mrb[28].mxu0 %vm209_vm1, %v1082_v2 }
  0x56   : >> { %1573 = vmatmul.mubr.msk.bf16.vlgmr.msra.gmra.mrb[28].mxu1 %vm209_vm1, %v1146_v4 }
  0xf0   : >> { %v247_v5 = vpop.f32.mrb[0].mxu0 }
  0xf1   : >> { %v302_v6 = vpop.f32.mrb[0].mxu1  ;;  %v1454_v7 = vpop.f32.mrb[1].mxu0 }
  0xf2   : >> { %v303_v8 = vadd.f32 %v302_v6, %v247_v5  ;;  %v1462_v9 = vpop.f32.mrb[1].mxu1  ;;  %v250_v10 = vpop.f32.mrb[2].mxu0 }
  0xf3   : >> { %v305_v11 = vpop.f32.mrb[2].mxu1  ;;  %v1455_v12 = vpop.f32.mrb[3].mxu0 }
  0xf4   : >> { %v1463_v13 = vpop.f32.mrb[3].mxu1 }
  0xf8   : >> { %v365_v14 = vpop.f32.mrb[4].mxu0 }
  0xf9   : >> { %v371_v15 = vadd.f32 %v365_v14, %v303_v8  ;;  %v429_v3 = vpop.f32.mrb[4].mxu1  ;;  %v1470_v16 = vpop.f32.mrb[5].mxu0 }
  0xfa   : >> { %v1478_v17 = vpop.f32.mrb[5].mxu1  ;;  %v368_v18 = vpop.f32.mrb[6].mxu0 }
  0xfb   : >> { %v435_v19 = vadd.f32 %v429_v3, %v371_v15  ;;  %v432_v20 = vpop.f32.mrb[6].mxu1  ;;  %v1471_v21 = vpop.f32.mrb[7].mxu0 }
  0xfc   : >> { %v1479_v22 = vpop.f32.mrb[7].mxu1 }
 0x100   : >> { %v494_v23 = vpop.f32.mrb[8].mxu0 }
 0x101   : >> { %v500_v24 = vadd.f32 %v494_v23, %v435_v19  ;;  %v558_v25 = vpop.f32.mrb[8].mxu1  ;;  %v1486_v26 = vpop.f32.mrb[9].mxu0 }
 0x102   : >> { %v1494_v27 = vpop.f32.mrb[9].mxu1  ;;  %v497_v28 = vpop.f32.mrb[10].mxu0 }
 0x103   : >> { %v564_v29 = vadd.f32 %v558_v25, %v500_v24  ;;  %v561_v30 = vpop.f32.mrb[10].mxu1  ;;  %v1487_v31 = vpop.f32.mrb[11].mxu0 }
 0x104   : >> { %v1495_v32 = vpop.f32.mrb[11].mxu1 }
 0x108   : >> { %v622_v33 = vpop.f32.mrb[12].mxu0 }
 0x109   : >> { %v628_v34 = vadd.f32 %v622_v33, %v564_v29  ;;  %v686_v35 = vpop.f32.mrb[12].mxu1  ;;  %v1502_v36 = vpop.f32.mrb[13].mxu0 }
 0x10a   : >> { %v1510_v37 = vpop.f32.mrb[13].mxu1  ;;  %v625_v38 = vpop.f32.mrb[14].mxu0 }
 0x10b   : >> { %v692_v39 = vadd.f32 %v686_v35, %v628_v34  ;;  %v689_v40 = vpop.f32.mrb[14].mxu1  ;;  %v1503_v41 = vpop.f32.mrb[15].mxu0 }
 0x10c   : >> { %v1511_v42 = vpop.f32.mrb[15].mxu1 }
 0x110   : >> { %v751_v43 = vpop.f32.mrb[16].mxu0 }
 0x111   : >> { %v757_v44 = vadd.f32 %v751_v43, %v692_v39  ;;  %v815_v45 = vpop.f32.mrb[16].mxu1  ;;  %v1518_v46 = vpop.f32.mrb[17].mxu0 }
 0x112   : >> { %v1526_v47 = vpop.f32.mrb[17].mxu1  ;;  %v754_v48 = vpop.f32.mrb[18].mxu0 }
 0x113   : >> { %v821_v49 = vadd.f32 %v815_v45, %v757_v44  ;;  %v818_v50 = vpop.f32.mrb[18].mxu1  ;;  %v1519_v51 = vpop.f32.mrb[19].mxu0 }
 0x114   : >> { %v1527_v52 = vpop.f32.mrb[19].mxu1 }
 0x118   : >> { %v879_v53 = vpop.f32.mrb[20].mxu0 }
 0x119   : >> { %v885_v54 = vadd.f32 %v879_v53, %v821_v49  ;;  %v943_v55 = vpop.f32.mrb[20].mxu1  ;;  %v1534_v56 = vpop.f32.mrb[21].mxu0 }
 0x11a   : >> { %v1542_v57 = vpop.f32.mrb[21].mxu1  ;;  %v882_v58 = vpop.f32.mrb[22].mxu0 }
 0x11b   : >> { %v949_v59 = vadd.f32 %v943_v55, %v885_v54  ;;  %v946_v60 = vpop.f32.mrb[22].mxu1  ;;  %v1535_v61 = vpop.f32.mrb[23].mxu0 }
 0x11c   : >> { %v1543_v62 = vpop.f32.mrb[23].mxu1 }
 0x120   : >> { %v1008_v63 = vpop.f32.mrb[24].mxu0 }
 0x121   : >> { %v1014_v0 = vadd.f32 %v1008_v63, %v949_v59  ;;  %v1072_v2 = vpop.f32.mrb[24].mxu1  ;;  %v1550_v4 = vpop.f32.mrb[25].mxu0 }
 0x122   : >> { %v1558_v5 = vpop.f32.mrb[25].mxu1  ;;  %v1011_v6 = vpop.f32.mrb[26].mxu0 }
 0x123   : >> { %v1078_v7 = vadd.f32 %v1072_v2, %v1014_v0  ;;  %v1075_v8 = vpop.f32.mrb[26].mxu1  ;;  %v1551_v9 = vpop.f32.mrb[27].mxu0 }
 0x124   : >> { %v1559_v10 = vpop.f32.mrb[27].mxu1 }
 0x128   : >> { %v1136_v11 = vpop.f32.mrb[28].mxu0 }
 0x129   : >> { %v1142_v12 = vadd.f32 %v1136_v11, %v1078_v7  ;;  %v1200_v13 = vpop.f32.mrb[28].mxu1  ;;  %v1566_v14 = vpop.f32.mrb[29].mxu0  ;;  %179 = sbr.rel (!%p177_p4) target bundleno = 20 (0x14), region = 86 }
 0x12a   : >> { %v1574_v15 = vpop.f32.mrb[29].mxu1  ;;  %v1139_v3 = vpop.f32.mrb[30].mxu0 }
 0x12b   : >> { %v1206_v16 = vadd.f32 %v1200_v13, %v1142_v12  ;;  %v1203_v17 = vpop.f32.mrb[30].mxu1  ;;  %v1567_v18 = vpop.f32.mrb[31].mxu0 }
 0x12c   : >> { %v1575_v19 = vpop.f32.mrb[31].mxu1 }
 0x12d   : >> { %v1213_v20 = vadd.f32 %v1677_v1, %v1206_v16 }
 0x12f   : >> { %1217 = vst.msk [vmem:[%s1215_s17] sm:$0x3f] %vm1216_vm2, %v1213_v20 }
 0x130 PF: > { %s15_s14 = sadd.s32 1, %s1638_s14  }
 0x131   : > { %p12_p5 = scmp.ge.s32.totalorder %s15_s14, 4  }
 0x133   :  { %14 = sbr.rel (!%p12_p5) target bundleno = 3 (0x3), region = 97 }

// kernel: anigan_discriminator_forward.13
= control target key start
LH: loop header
LB: loop body
LE: loop exit
PB: predicated region body
PF: predicated region fallthrough
CT: control target
= control target key end

     0   :  { %9 = vsyncpa [#allocation3], 0  ;;  %s543_s12 = smov 0   ;;  %s607_s0 = inlined_call_operand.vmem [shape: f32[2,36,1], index: 0, kind: input, shape index: {}]   ;;  %s608_s1 = inlined_call_operand.vmem [shape: f32[12], index: 1, kind: input, shape index: {}]   ;;  %s609_s2 = inlined_call_operand.vmem [shape: f32[2,16,1], index: 2, kind: output, shape index: {0}]   ;;  %s610_s3 = inlined_call_operand.vmem [shape: f32[2,16,1], index: 3, kind: output, shape index: {1}]  }
   0x1 LB: > { %s423_s13 = sadd.s32 4294967295, %s516_s12   ;;  %p425_p0 = scmp.ge.s32.totalorder %s516_s12, 1  ;;  %s516_s12 = sphi %s543_s12, %s15_s12  }
   0x2   : > { %p119_p1 = scmp.lt.s32.totalorder %s516_s12, 3  ;;  %s132_s16 = sshll.u32 %s608_s1, 4  ;;  %s133_s16 = int_to_ptr.vmem [resolvable:$true] %s132_s16 }
   0x3   : > { %p468_p3 = scmp.eq.s32.totalorder %s423_s13, 0  ;;  %s487_s18 = scalar_lea.vmem %s133_s16, 16 }
   0x4   : > { %p554_p2 = pnand %p425_p0, %p119_p1  ;;  %p488_p6 = scmp.ne.s32.totalorder %s133_s16, %s487_s18 }
   0x5   : > { %p495_p10 = scmp.lt.s32.totalorder %s133_s16, %s133_s16  ;;  %p496_p11 = scmp.lt.s32.totalorder %s487_s18, %s487_s18 }
   0x6   : > { %p464_p4 = pneg %p554_p2 }
   0x7   : > { %p497_p12 = por %p496_p11, %p495_p10 }
   0x8   : > { %p465_p5 = pnand %p468_p3, %p464_p4 }
   0xa   : > { %p489_p7 = pneg %p465_p5 }
   0xc   : > { %p490_p8 = pnand %p489_p7, %p488_p6 }
   0xe   : > { %p491_p9 = pneg %p490_p8 }
  0x10   : > { %p498_p13 = pnand %p497_p12, %p491_p9 }
  0x12   : > { %501 = shalt.err (!%p498_p13)
}
  0x13   : > { %s522_s19 = smov [#allocation2]   ;;  %153 = sbr.rel (%p554_p2) target bundleno = 72 (0x48), region = 28 }
  0x14   : > { %467 = dma.vmem_to_smem (!%p465_p5), %s133_s16, 16, %s522_s19, [#allocation3]  }
  0x1a   : > { %511 = dma.done.wait (%p468_p3), [#allocation3], 16  }
  0x1b   : > { %513 = vsyncadd (%p468_p3), [#allocation3], 4294967280 }
  0x1c   : > { %159 = sfence }
  0x1d   : > { %p183_p0 = scmp.lt.s32.totalorder %s423_s13, 1  ;;  %s580_s4 = smov 0  }
  0x1f   : > { %s613_s13 = smov (!%p183_p0, %s423_s13), 1 }
  0x20   : > { %s459_s20 = smul.u32 40, %s613_s13  ;;  %s457_s21 = sshll.u32 %s613_s13, 4 }
  0x21   : > { %s568_s24 = scalar_lea.vmem %s609_s2, %s457_s21  ;;  %s573_s27 = scalar_lea.vmem %s610_s3, %s457_s21 }
  0x22   : > { %s578_s30 = scalar_lea.vmem %s607_s0, %s459_s20 }
  0x23 LB: >> { %s207_s5 = sld [smem:[#allocation2]]  ;;  %s436_s6 = sld [smem:[#allocation2 + $0x1]]  ;;  %vm274_vm0 = vcmask 3072   ;;  %s520_s4 = sphi %s580_s4, %s203_s4  }
  0x24   : >> { %s204_s7 = smul.u32 6, %s520_s4  ;;  %s438_s8 = sld [smem:[#allocation2 + $0x2]] }
  0x25   : >> { %s440_s9 = sld [smem:[#allocation2 + $0x3]]  ;;  %s442_s10 = sld [smem:[#allocation2 + $0x4]] }
  0x26   : >> { %s587_s11 = scalar_lea.vmem %s578_s30, %s204_s7  ;;  %s444_s13 = sld [smem:[#allocation2 + $0x5]] }
  0x27   : >> { %v206_v0 = vld [vmem:[%s587_s11] sm:$0xf]  ;;  %v439_v6 = vld [vmem:[%s587_s11 + $0x6] sm:$0xf]  ;;  %s446_s14 = sld [smem:[#allocation2 + $0x6]]  ;;  %s448_s15 = sld [smem:[#allocation2 + $0x7]] }
  0x28   : >> { %v435_v1 = vld [vmem:[%s587_s11 + $0x1] sm:$0xf]  ;;  %v441_v11 = vld [vmem:[%s587_s11 + $0x7] sm:$0xf]  ;;  %s450_s16 = sld [smem:[#allocation2 + $0x8]]  ;;  %s451_s17 = sld [smem:[#allocation2 + $0x9]] }
  0x29   : >> { %v208_v2 = vstv %s207_s5  ;;  %v437_v3 = vld [vmem:[%s587_s11 + $0x2] sm:$0xf]  ;;  %v215_v5 = vstv %s436_s6  ;;  %v443_v15 = vld [vmem:[%s587_s11 + $0x8] sm:$0xf]  ;;  %s453_s18 = sld [smem:[#allocation2 + $0xa]]  ;;  %s452_s19 = sshll.u32 %s520_s4, 2 }
  0x2a   : >> { %v209_v4 = vmul.f32 %v208_v2, %v206_v0  ;;  %v216_v7 = vmul.f32 %v435_v1, %v215_v5  ;;  %v222_v8 = vstv %s438_s8  ;;  %v445_v19 = vld [vmem:[%s587_s11 + $0xc] sm:$0xf]  ;;  %s454_s20 = sld [smem:[#allocation2 + $0xb]]  ;;  %s273_s21 = scalar_lea.vmem %s568_s24, %s452_s19 }
  0x2b   : >> { %v223_v9 = vmul.f32 %v437_v3, %v222_v8  ;;  %v230_v10 = vstv %s440_s9  ;;  %v237_v12 = vstv %s442_s10  ;;  %v447_v23 = vld [vmem:[%s587_s11 + $0xd] sm:$0xf]  ;;  %s286_s22 = scalar_lea.vmem %s573_s27, %s452_s19  ;;  %s203_s4 = sadd.s32 1, %s520_s4  }
  0x2c   : >> { %v217_v13 = vadd.f32 %v216_v7, %v209_v4  ;;  %v231_v14 = vmul.f32 %v439_v6, %v230_v10  ;;  %v244_v16 = vstv %s444_s13  ;;  %v238_v18 = vmul.f32 %v441_v11, %v237_v12  ;;  %v449_v27 = vld [vmem:[%s587_s11 + $0xe] sm:$0xf]  ;;  %p200_p1 = scmp.ge.s32.totalorder %s203_s4, 4  }
  0x2d   : >> { %v252_v20 = vstv %s446_s14  ;;  %v245_v22 = vmul.f32 %v443_v15, %v244_v16  ;;  %v259_v24 = vstv %s448_s15 }
  0x2e   : >> { %v224_v17 = vadd.f32 %v223_v9, %v217_v13  ;;  %v253_v26 = vmul.f32 %v445_v19, %v252_v20  ;;  %v266_v28 = vstv %s450_s16  ;;  %v260_v30 = vmul.f32 %v447_v23, %v259_v24 }
  0x2f   : >> { %v267_v32 = vmul.f32 %v449_v27, %v266_v28  ;;  %v270_v34 = vstv %s451_s17  ;;  %v280_v38 = vstv %s453_s18 }
  0x30   : >> { %v232_v21 = vadd.f32 %v231_v14, %v224_v17  ;;  %v283_v40 = vstv %s454_s20 }
  0x32   : >> { %v239_v25 = vadd.f32 %v238_v18, %v232_v21 }
  0x34   : >> { %v246_v29 = vadd.f32 %v245_v22, %v239_v25 }
  0x36   : >> { %v254_v31 = vadd.f32 %v253_v26, %v246_v29 }
  0x38   : >> { %v261_v33 = vadd.f32 %v260_v30, %v254_v31 }
  0x3a   : >> { %v268_v35 = vadd.f32 %v267_v32, %v261_v33 }
  0x3c   : >> { %v271_v36 = vadd.f32 %v270_v34, %v268_v35 }
  0x3e   : >> { %275 = vst.msk [vmem:[%s273_s21] sm:$0xf] %vm274_vm0, %v271_v36  ;;  %vm276_vm1 = vcmp.ge.f32.partialorder %v271_v36, 0.0  ;;  %v277_v37 = vmul.f32 0.2, %v271_v36 }
  0x40   : >> { %v278_v39 = vsel %vm276_vm1, %v271_v36, %v277_v37 }
  0x41   : >> { %v281_v41 = vmul.f32 %v280_v38, %v278_v39  ;;  %202 = sbr.rel (!%p200_p1) target bundleno = 35 (0x23), region = 93 }
  0x43   : >> { %v284_v42 = vadd.f32 %v283_v40, %v281_v41 }
  0x45   : >> { %v285_v43 = vmax.f32 %v284_v42, 0.0 }
  0x47   : >> { %287 = vst.msk [vmem:[%s286_s22] sm:$0xf] %vm274_vm0, %v285_v43 }
  0x48 PF: > { %s15_s12 = sadd.s32 1, %s516_s12  }
  0x49   : > { %p12_p2 = scmp.ge.s32.totalorder %s15_s12, 4  }
  0x4b   :  { %14 = sbr.rel (!%p12_p2) target bundleno = 1 (0x1), region = 104 }
  0x52   :  { %325 = vsyncpa [#allocation3], 1 }
  0x53   :  { %327 = vsyncpa [#allocation3 + $0x1], 1 }

</bundles_post_ra>
